<compile_context>
chip_gen: v5e
topology: v5e:2x2
jax: 0.10.0
libtpu: 0.0.40
codegen_flags: <defaults>
</compile_context>

<pallas_src>
import jax
import jax.numpy as jnp
import numpy as np
from jax.experimental import pallas as pl
from jax.experimental.pallas import tpu as pltpu


# ---------------- Pallas kernel ----------------

def fc_kernel(x_ref, w_ref, b_ref, o_ref):
    """y = x @ W^T + b, with the contraction (K) tiled across the grid.

    x_ref : (M, tk)   slice of the flattened input
    w_ref : (tk, N)   slice of the pre-transposed weight
    b_ref : (1, N)    bias
    o_ref : (M, N)    resident output block, doubles as the f32 accumulator
    """
    @pl.when(pl.program_id(0) == 0)
    def _init():
        # seed the accumulator with the bias (added exactly once)
        o_ref[...] = jnp.broadcast_to(b_ref[...], o_ref.shape)

    o_ref[...] += jnp.dot(x_ref[...], w_ref[...],
                          preferred_element_type=jnp.float32)


# ---------------- pallas_call wrapper ----------------

def linear(x, w_t, b, *, tk=1024):
    """x:(M,K) @ w_t:(K,N) + b:(N,), K streamed in tiles of tk."""
    M, K = x.shape
    N = w_t.shape[1]
    assert K % tk == 0, (K, tk)
    nk = K // tk
    return pl.pallas_call(
        fc_kernel,
        out_shape=jax.ShapeDtypeStruct((M, N), jnp.float32),
        grid_spec=pltpu.PrefetchScalarGridSpec(
            num_scalar_prefetch=0,
            grid=(nk,),
            in_specs=[pl.BlockSpec((M, tk), lambda k: (0, k)),
                      pl.BlockSpec((tk, N), lambda k: (k, 0)),
                      pl.BlockSpec((1, N), lambda k: (0, 0))],
            out_specs=pl.BlockSpec((M, N), lambda k: (0, 0)),
        ),
        compiler_params=pltpu.CompilerParams(
            dimension_semantics=("arbitrary",),       # reduction axis (resident output)
            vmem_limit_bytes=32 * 1024 * 1024),       # headroom on v5e's 16 MiB default
    )(x, w_t, b.reshape(1, N))


# ---------------- forward (PyTorch semantics) ----------------

def modified_model_forward(x, params):
    B = x.shape[0]
    xf = x.reshape(B, -1)                           # FlattenLayer
    y = linear(xf, params["w_t"], params["b"])      # fc: (B, 1600)
    return y.reshape(8, 200)                        # x.view(8, 200)


# ---------------- pure-JAX reference ----------------

def reference_forward(x, w, b):
    xf = x.reshape(x.shape[0], -1)
    y = jnp.dot(xf, w.T, precision=jax.lax.Precision.HIGHEST) + b
    return y.reshape(8, 200)


if __name__ == "__main__":
    key = jax.random.PRNGKey(0)
    k0, k1, k2 = jax.random.split(key, 3)

    # The trailing view(8, 200) forces batch=1 with 6144 flattened features.
    x = jax.random.normal(k0, (1, 6, 32, 32), jnp.float32)    # 6*32*32 = 6144
    w = jax.random.normal(k1, (1600, 6144), jnp.float32) / np.sqrt(6144)
    b = jax.random.normal(k2, (1600,), jnp.float32) * 0.01

    # Pre-transpose the fc weight ONCE at parameter-prep time (no per-forward
    # transpose / extra HBM copy).
    params = {"w_t": jnp.asarray(w.T), "b": b}

    out = jax.block_until_ready(modified_model_forward(x, params))
    ref = jax.block_until_ready(reference_forward(x, w, b))

    assert out.shape == (8, 200), out.shape
    np.testing.assert_allclose(np.asarray(out), np.asarray(ref),
                               rtol=1e-3, atol=1e-3)
    print("KERNEL_OK")
</pallas_src>

<mosaic_0001>
module attributes {stable_mosaic.version = 11 : i64} {
  func.func @fc_kernel(%arg0: i32, %arg1: memref<1x1024xf32, #tpu.memory_space<vmem>>, %arg2: memref<1024x1600xf32, #tpu.memory_space<vmem>>, %arg3: memref<1x1600xf32, #tpu.memory_space<vmem>>, %arg4: memref<1x1600xf32, #tpu.memory_space<vmem>>) attributes {dimension_semantics = [#tpu.dimension_semantics<arbitrary>], iteration_bounds = array<i64: 6>, scalar_prefetch = 0 : i64, scratch_operands = 0 : i64, tpu.core_type = #tpu.core_type<tc>, window_params = [{transform_indices = @transform_0, window_bounds = array<i64: 1, 1024>}, {transform_indices = @transform_1, window_bounds = array<i64: 1024, 1600>}, {pipeline_mode = #tpu.pipeline_mode<synchronous>, transform_indices = @transform_2, window_bounds = array<i64: 1, 1600>}, {pipeline_mode = #tpu.pipeline_mode<synchronous>, transform_indices = @transform_3, window_bounds = array<i64: 1, 1600>}]} {
    %c0_i32 = arith.constant 0 : i32
    %0 = arith.cmpi eq, %arg0, %c0_i32 : i32
    %1 = arith.extui %0 : i1 to i32
    %c0_i32_0 = arith.constant 0 : i32
    %2 = arith.cmpi ne, %1, %c0_i32_0 : i32
    scf.if %2 {
      %c0_8 = arith.constant 0 : index
      %c0_9 = arith.constant 0 : index
      %9 = vector.load %arg3[%c0_8, %c0_9] : memref<1x1600xf32, #tpu.memory_space<vmem>>, vector<1x1600xf32>
      %c0_10 = arith.constant 0 : index
      %c0_11 = arith.constant 0 : index
      %10 = vector.load %arg4[%c0_10, %c0_11] : memref<1x1600xf32, #tpu.memory_space<vmem>>, vector<1x1600xf32>
      tpu.vector_store %arg4[%c0_10, %c0_11], %9 {strides = array<i32>} : memref<1x1600xf32, #tpu.memory_space<vmem>>, vector<1x1600xf32>,
    } else {
    }
    %c0 = arith.constant 0 : index
    %c0_1 = arith.constant 0 : index
    %3 = vector.load %arg4[%c0, %c0_1] : memref<1x1600xf32, #tpu.memory_space<vmem>>, vector<1x1600xf32>
    %c0_2 = arith.constant 0 : index
    %c0_3 = arith.constant 0 : index
    %4 = vector.load %arg1[%c0_2, %c0_3] : memref<1x1024xf32, #tpu.memory_space<vmem>>, vector<1x1024xf32>
    %c0_4 = arith.constant 0 : index
    %c0_5 = arith.constant 0 : index
    %5 = vector.load %arg2[%c0_4, %c0_5] : memref<1024x1600xf32, #tpu.memory_space<vmem>>, vector<1024x1600xf32>
    %cst = arith.constant dense<0.000000e+00> : vector<1x1600xf32>
    %6 = tpu.matmul %4, %5, %cst {dimension_numbers = #tpu.dot_dimension_numbers<[1], [0], [0], [1], [0, 0, 1, 1], [], []>} : vector<1x1024xf32>, vector<1024x1600xf32>, vector<1x1600xf32> -> vector<1x1600xf32>
    %7 = arith.addf %3, %6 : vector<1x1600xf32>
    %c0_6 = arith.constant 0 : index
    %c0_7 = arith.constant 0 : index
    %8 = vector.load %arg4[%c0_6, %c0_7] : memref<1x1600xf32, #tpu.memory_space<vmem>>, vector<1x1600xf32>
    tpu.vector_store %arg4[%c0_6, %c0_7], %7 {strides = array<i32>} : memref<1x1600xf32, #tpu.memory_space<vmem>>, vector<1x1600xf32>,
    return
  }
  func.func @transform_0(%arg0: i32) -> (i32, i32) {
    %c0_i32 = arith.constant 0 : i32
    %c0_i32_0 = arith.constant 0 : i32
    return %c0_i32, %arg0 : i32, i32
  }
  func.func @transform_1(%arg0: i32) -> (i32, i32) {
    %c0_i32 = arith.constant 0 : i32
    %c0_i32_0 = arith.constant 0 : i32
    return %arg0, %c0_i32 : i32, i32
  }
  func.func @transform_2(%arg0: i32) -> (i32, i32) {
    %c0_i32 = arith.constant 0 : i32
    %c0_i32_0 = arith.constant 0 : i32
    %c0_i32_1 = arith.constant 0 : i32
    return %c0_i32, %c0_i32_0 : i32, i32
  }
  func.func @transform_3(%arg0: i32) -> (i32, i32) {
    %c0_i32 = arith.constant 0 : i32
    %c0_i32_0 = arith.constant 0 : i32
    %c0_i32_1 = arith.constant 0 : i32
    return %c0_i32, %c0_i32_0 : i32, i32
  }
}

</mosaic_0001>

<bundles_post_ra>
// kernel: tpu_custom_call.1
= control target key start
LH: loop header
LB: loop body
LE: loop exit
PB: predicated region body
PF: predicated region fallthrough
CT: control target
= control target key end

     0   :  { %8 = vsyncpa [#allocation3], 0  ;;  %s4157_s12 = smov 0   ;;  %s6095_s0 = inlined_call_operand.vmem [shape: f32[1,6144], index: 0, kind: input, shape index: {}]   ;;  %s6096_s1 = inlined_call_operand.vmem [shape: f32[6144,1600], index: 1, kind: input, shape index: {}]   ;;  %s6097_s2 = inlined_call_operand.vmem [shape: f32[1,1600], index: 2, kind: input, shape index: {}]   ;;  %s6098_s3 = inlined_call_operand.hbm [shape: f32[1,1600], index: 3, kind: output, shape index: {}]  }
   0x1 LB: > { %s4163_s13 = sadd.s32 4294967295, %s4134_s12   ;;  %p4071_p0 = scmp.ge.s32.totalorder %s4134_s12, 1  ;;  %s4134_s12 = sphi %s4157_s12, %s14_s12  }
   0x2   : > { %p145_p1 = scmp.lt.s32.totalorder %s4134_s12, 7 }
   0x4   : > { %p146_p2 = pnand %p4071_p0, %p145_p1 }
   0x5   : > { %s4072_s14 = sshll.u32 (!%p146_p2), %s4163_s13, 3  ;;  %s4073_s15 = sshll.u32 (!%p146_p2), %s4163_s13, 7 }
   0x6   : > { %149 = sbr.rel (%p146_p2) target bundleno = 1051 (0x41b), region = 32  ;;  %p170_p3 = scmp.lt.s32.totalorder (!%p146_p2), %s4072_s14, 47 }
   0x7   : > { %p175_p4 = scmp.lt.s32.totalorder (!%p146_p2), %s4073_s15, 767  ;;  %p4075_p5 = scmp.ne.s32.totalorder (!%p146_p2), %s4163_s13, 0 }
   0xb   : > { %s6100_s14 = smov (!%p170_p3, %s4072_s14), 47  ;;  %s6102_s15 = smov (!%p175_p4, %s4073_s15), 767 }
   0xc   : > { %s172_s18 = scalar_lea.vmem %s6095_s0, %s6100_s14  ;;  %s4080_s19 = smul.u32 104, %s6102_s15 }
   0xd   : > { %184 = sbr.rel (%p4075_p5) target bundleno = 22 (0x16), region = 36 }
   0xe   : > { %s4178_s22 = scalar_lea.vmem %s6096_s1, %s4080_s19 }
  0x12   : > { %v185_v0 = vld [vmem:[%s6097_s2] sm:$0xff]  ;;  %v186_v1 = vld [vmem:[%s6097_s2 + $0x8] sm:$0x1f]  ;;  %v188_v2 = vlaneseq }
  0x13   : > { %187 = vst [vmem:[#allocation2] sm:$0xff] %v185_v0 }
  0x14   : > { %vm190_vm0 = vcmp.lt.s32.totalorder %v188_v2, 576 }
  0x15   : > { %192 = vst.msk [vmem:[#allocation2 + $0x8] sm:$0x1f] %vm190_vm0, %v186_v1 }
  0x16 PF: > { %v391_v3 = vld [vmem:[%s4178_s22 + $0x618] sm:$0xff]  ;;  %v378_v5 = vld [vmem:[%s4178_s22 + $0x5b0] sm:$0xff]  ;;  %v365_v9 = vld [vmem:[%s4178_s22 + $0x548] sm:$0xff]  ;;  %vm3981_vm1 = vcmask 1040384   ;;  %vm3983_vm2 = vcmask 1042434   ;;  %vm3985_vm3 = vcmask 1041408  }
  0x17   : > { %v807_v4 = vld [vmem:[%s4178_s22 + $0x1318] sm:$0xff]  ;;  %1877 = vmatpush.msra.mxu0 %v391_v3  ;;  %v794_v7 = vld [vmem:[%s4178_s22 + $0x12b0] sm:$0xff]  ;;  %v781_v11 = vld [vmem:[%s4178_s22 + $0x1248] sm:$0xff]  ;;  %vm3987_vm4 = vcmask 1044484   ;;  %vm3989_vm5 = vcmask 1046534   ;;  %vm3991_vm6 = vcmask 1045508  }
  0x18   : > { %1917 = vmatpush.msra.mxu2 %v807_v4  ;;  %v599_v6 = vld [vmem:[%s4178_s22 + $0xc98] sm:$0xff]  ;;  %v586_v10 = vld [vmem:[%s4178_s22 + $0xc30] sm:$0xff]  ;;  %v573_v13 = vld [vmem:[%s4178_s22 + $0xbc8] sm:$0xff]  ;;  %vm3993_vm7 = vcmask 1043456   ;;  %vm3997_vm8 = vcmask 1043459   ;;  %vm3999_vm9 = vcmask 1042432  }
  0x19   : > { %v1015_v8 = vld [vmem:[%s4178_s22 + $0x1998] sm:$0xff]  ;;  %1897 = vmatpush.msra.mxu1 %v599_v6  ;;  %1878 = vmatpush.msra.mxu0 %v378_v5  ;;  %v1002_v12 = vld [vmem:[%s4178_s22 + $0x1930] sm:$0xff]  ;;  %v352_v14 = vld [vmem:[%s4178_s22 + $0x4e0] sm:$0xff]  ;;  %s4136_s29 = smov [#allocation2]   ;;  %s4019_s6 = sshll.u32 %s6098_s3, 4  ;;  %s4020_s6 = int_to_ptr.hbm [resolvable:$true] %s4019_s6 }
  0x1a   : > { %1937 = vmatpush.msra.mxu3 %v1015_v8  ;;  %1918 = vmatpush.msra.mxu2 %v794_v7  ;;  %v768_v15 = vld [vmem:[%s4178_s22 + $0x11e0] sm:$0xff]  ;;  %v989_v16 = vld [vmem:[%s4178_s22 + $0x18c8] sm:$0xff]  ;;  %v339_v19 = vld [vmem:[%s4178_s22 + $0x478] sm:$0xff]  ;;  %s4017_s30 = sshll.u32 %s4136_s29, 4  ;;  %p4085_p6 = scmp.eq.s32.totalorder %s4163_s13, 5  ;;  %s4018_s30 = int_to_ptr.vmem [resolvable:$true] %s4017_s30 }
  0x1b   : > { %1898 = vmatpush.msra.mxu1 %v586_v10  ;;  %1879 = vmatpush.msra.mxu0 %v365_v9  ;;  %v560_v17 = vld [vmem:[%s4178_s22 + $0xb60] sm:$0xff]  ;;  %v755_v20 = vld [vmem:[%s4178_s22 + $0x1178] sm:$0xff]  ;;  %v326_v23 = vld [vmem:[%s4178_s22 + $0x410] sm:$0xff] }
  0x1c   : > { %1938 = vmatpush.msra.mxu3 %v1002_v12  ;;  %1919 = vmatpush.msra.mxu2 %v781_v11  ;;  %v976_v18 = vld [vmem:[%s4178_s22 + $0x1860] sm:$0xff]  ;;  %v547_v21 = vld [vmem:[%s4178_s22 + $0xaf8] sm:$0xff]  ;;  %v742_v24 = vld [vmem:[%s4178_s22 + $0x1110] sm:$0xff] }
  0x1d   : > { %1899 = vmatpush.msra.mxu1 %v573_v13  ;;  %1880 = vmatpush.msra.mxu0 %v352_v14  ;;  %v963_v22 = vld [vmem:[%s4178_s22 + $0x17f8] sm:$0xff]  ;;  %v534_v25 = vld [vmem:[%s4178_s22 + $0xa90] sm:$0xff]  ;;  %v313_v27 = vld [vmem:[%s4178_s22 + $0x3a8] sm:$0xff] }
  0x1e   : > { %1939 = vmatpush.msra.mxu3 %v989_v16  ;;  %1920 = vmatpush.msra.mxu2 %v768_v15  ;;  %v950_v26 = vld [vmem:[%s4178_s22 + $0x1790] sm:$0xff]  ;;  %v729_v28 = vld [vmem:[%s4178_s22 + $0x10a8] sm:$0xff]  ;;  %v300_v31 = vld [vmem:[%s4178_s22 + $0x340] sm:$0xff] }
  0x1f   : > { %1900 = vmatpush.msra.mxu1 %v560_v17  ;;  %1881 = vmatpush.msra.mxu0 %v339_v19  ;;  %v521_v29 = vld [vmem:[%s4178_s22 + $0xa28] sm:$0xff]  ;;  %v716_v32 = vld [vmem:[%s4178_s22 + $0x1040] sm:$0xff]  ;;  %v287_v35 = vld [vmem:[%s4178_s22 + $0x2d8] sm:$0xff] }
  0x20   : > { %1940 = vmatpush.msra.mxu3 %v976_v18  ;;  %1921 = vmatpush.msra.mxu2 %v755_v20  ;;  %v937_v30 = vld [vmem:[%s4178_s22 + $0x1728] sm:$0xff]  ;;  %v508_v33 = vld [vmem:[%s4178_s22 + $0x9c0] sm:$0xff]  ;;  %v703_v36 = vld [vmem:[%s4178_s22 + $0xfd8] sm:$0xff] }
  0x21   : > { %1901 = vmatpush.msra.mxu1 %v547_v21  ;;  %1882 = vmatpush.msra.mxu0 %v326_v23  ;;  %v924_v34 = vld [vmem:[%s4178_s22 + $0x16c0] sm:$0xff]  ;;  %v495_v37 = vld [vmem:[%s4178_s22 + $0x958] sm:$0xff]  ;;  %v274_v39 = vld [vmem:[%s4178_s22 + $0x270] sm:$0xff] }
  0x22   : > { %1941 = vmatpush.msra.mxu3 %v963_v22  ;;  %1922 = vmatpush.msra.mxu2 %v742_v24  ;;  %v911_v38 = vld [vmem:[%s4178_s22 + $0x1658] sm:$0xff]  ;;  %v690_v40 = vld [vmem:[%s4178_s22 + $0xf70] sm:$0xff]  ;;  %v261_v43 = vld [vmem:[%s4178_s22 + $0x208] sm:$0xff] }
  0x23   : > { %1902 = vmatpush.msra.mxu1 %v534_v25  ;;  %1883 = vmatpush.msra.mxu0 %v313_v27  ;;  %v482_v41 = vld [vmem:[%s4178_s22 + $0x8f0] sm:$0xff]  ;;  %v677_v44 = vld [vmem:[%s4178_s22 + $0xf08] sm:$0xff]  ;;  %v248_v47 = vld [vmem:[%s4178_s22 + $0x1a0] sm:$0xff] }
  0x24   : > { %1942 = vmatpush.msra.mxu3 %v950_v26  ;;  %1923 = vmatpush.msra.mxu2 %v729_v28  ;;  %v898_v42 = vld [vmem:[%s4178_s22 + $0x15f0] sm:$0xff]  ;;  %v469_v45 = vld [vmem:[%s4178_s22 + $0x888] sm:$0xff]  ;;  %v664_v48 = vld [vmem:[%s4178_s22 + $0xea0] sm:$0xff] }
  0x25   : > { %1903 = vmatpush.msra.mxu1 %v521_v29  ;;  %1884 = vmatpush.msra.mxu0 %v300_v31  ;;  %v885_v46 = vld [vmem:[%s4178_s22 + $0x1588] sm:$0xff]  ;;  %v456_v49 = vld [vmem:[%s4178_s22 + $0x820] sm:$0xff]  ;;  %v235_v51 = vld [vmem:[%s4178_s22 + $0x138] sm:$0xff] }
  0x26   : > { %1943 = vmatpush.msra.mxu3 %v937_v30  ;;  %1924 = vmatpush.msra.mxu2 %v716_v32  ;;  %v872_v50 = vld [vmem:[%s4178_s22 + $0x1520] sm:$0xff]  ;;  %v651_v52 = vld [vmem:[%s4178_s22 + $0xe38] sm:$0xff]  ;;  %v222_v55 = vld [vmem:[%s4178_s22 + $0xd0] sm:$0xff] }
  0x27   : > { %1904 = vmatpush.msra.mxu1 %v508_v33  ;;  %1885 = vmatpush.msra.mxu0 %v287_v35  ;;  %v443_v53 = vld [vmem:[%s4178_s22 + $0x7b8] sm:$0xff]  ;;  %v638_v56 = vld [vmem:[%s4178_s22 + $0xdd0] sm:$0xff]  ;;  %v209_v59 = vld [vmem:[%s4178_s22 + $0x68] sm:$0xff] }
  0x28   : > { %1944 = vmatpush.msra.mxu3 %v924_v34  ;;  %1925 = vmatpush.msra.mxu2 %v703_v36  ;;  %v859_v54 = vld [vmem:[%s4178_s22 + $0x14b8] sm:$0xff]  ;;  %v430_v57 = vld [vmem:[%s4178_s22 + $0x750] sm:$0xff]  ;;  %v625_v60 = vld [vmem:[%s4178_s22 + $0xd68] sm:$0xff] }
  0x29   : > { %1905 = vmatpush.msra.mxu1 %v495_v37  ;;  %1886 = vmatpush.msra.mxu0 %v274_v39  ;;  %v846_v58 = vld [vmem:[%s4178_s22 + $0x1450] sm:$0xff]  ;;  %v417_v61 = vld [vmem:[%s4178_s22 + $0x6e8] sm:$0xff]  ;;  %v196_v63 = vld [vmem:[%s4178_s22] sm:$0xff] }
  0x2a   : > { %1945 = vmatpush.msra.mxu3 %v911_v38  ;;  %1926 = vmatpush.msra.mxu2 %v690_v40  ;;  %v833_v62 = vld [vmem:[%s4178_s22 + $0x13e8] sm:$0xff]  ;;  %v612_v0 = vld [vmem:[%s4178_s22 + $0xd00] sm:$0xff]  ;;  %v1223_v1 = vld [vmem:[%s4178_s22 + $0x2018] sm:$0xff] }
  0x2b   : > { %1906 = vmatpush.msra.mxu1 %v482_v41  ;;  %1887 = vmatpush.msra.mxu0 %v261_v43  ;;  %v1639_v2 = vld [vmem:[%s4178_s22 + $0x2d18] sm:$0xff]  ;;  %v404_v3 = vld [vmem:[%s4178_s22 + $0x680] sm:$0xff]  ;;  %v1210_v5 = vld [vmem:[%s4178_s22 + $0x1fb0] sm:$0xff] }
  0x2c   : > { %1946 = vmatpush.msra.mxu3 %v898_v42  ;;  %1927 = vmatpush.msra.mxu2 %v677_v44  ;;  %v820_v4 = vld [vmem:[%s4178_s22 + $0x1380] sm:$0xff]  ;;  %v1431_v6 = vld [vmem:[%s4178_s22 + $0x2698] sm:$0xff]  ;;  %v1626_v7 = vld [vmem:[%s4178_s22 + $0x2cb0] sm:$0xff] }
  0x2d   : > { %1907 = vmatpush.msra.mxu1 %v469_v45  ;;  %1888 = vmatpush.msra.mxu0 %v248_v47  ;;  %v1847_v8 = vld [vmem:[%s4178_s22 + $0x3398] sm:$0xff]  ;;  %v1197_v9 = vld [vmem:[%s4178_s22 + $0x1f48] sm:$0xff]  ;;  %v1418_v10 = vld [vmem:[%s4178_s22 + $0x2630] sm:$0xff] }
  0x2e   : > { %1947 = vmatpush.msra.mxu3 %v885_v46  ;;  %1928 = vmatpush.msra.mxu2 %v664_v48  ;;  %v1613_v11 = vld [vmem:[%s4178_s22 + $0x2c48] sm:$0xff]  ;;  %v1834_v12 = vld [vmem:[%s4178_s22 + $0x3330] sm:$0xff]  ;;  %v1184_v13 = vld [vmem:[%s4178_s22 + $0x1ee0] sm:$0xff] }
  0x2f   : > { %1908 = vmatpush.msra.mxu1 %v456_v49  ;;  %1889 = vmatpush.msra.mxu0 %v235_v51  ;;  %v1405_v14 = vld [vmem:[%s4178_s22 + $0x25c8] sm:$0xff]  ;;  %v1600_v15 = vld [vmem:[%s4178_s22 + $0x2be0] sm:$0xff]  ;;  %v1171_v17 = vld [vmem:[%s4178_s22 + $0x1e78] sm:$0xff] }
  0x30   : > { %1948 = vmatpush.msra.mxu3 %v872_v50  ;;  %1929 = vmatpush.msra.mxu2 %v651_v52  ;;  %v1821_v16 = vld [vmem:[%s4178_s22 + $0x32c8] sm:$0xff]  ;;  %v1392_v18 = vld [vmem:[%s4178_s22 + $0x2560] sm:$0xff]  ;;  %v1587_v19 = vld [vmem:[%s4178_s22 + $0x2b78] sm:$0xff] }
  0x31   : > { %1909 = vmatpush.msra.mxu1 %v443_v53  ;;  %1890 = vmatpush.msra.mxu0 %v222_v55  ;;  %v1808_v20 = vld [vmem:[%s4178_s22 + $0x3260] sm:$0xff]  ;;  %v1158_v21 = vld [vmem:[%s4178_s22 + $0x1e10] sm:$0xff]  ;;  %v1379_v22 = vld [vmem:[%s4178_s22 + $0x24f8] sm:$0xff] }
  0x32   : > { %1949 = vmatpush.msra.mxu3 %v859_v54  ;;  %1930 = vmatpush.msra.mxu2 %v638_v56  ;;  %v1574_v23 = vld [vmem:[%s4178_s22 + $0x2b10] sm:$0xff]  ;;  %v1795_v24 = vld [vmem:[%s4178_s22 + $0x31f8] sm:$0xff]  ;;  %v1145_v25 = vld [vmem:[%s4178_s22 + $0x1da8] sm:$0xff] }
  0x33   : > { %1910 = vmatpush.msra.mxu1 %v430_v57  ;;  %1891 = vmatpush.msra.mxu0 %v209_v59  ;;  %v1366_v26 = vld [vmem:[%s4178_s22 + $0x2490] sm:$0xff]  ;;  %v1561_v27 = vld [vmem:[%s4178_s22 + $0x2aa8] sm:$0xff]  ;;  %v1132_v29 = vld [vmem:[%s4178_s22 + $0x1d40] sm:$0xff] }
  0x34   : > { %1950 = vmatpush.msra.mxu3 %v846_v58  ;;  %1931 = vmatpush.msra.mxu2 %v625_v60  ;;  %v1782_v28 = vld [vmem:[%s4178_s22 + $0x3190] sm:$0xff]  ;;  %v1353_v30 = vld [vmem:[%s4178_s22 + $0x2428] sm:$0xff]  ;;  %v1548_v31 = vld [vmem:[%s4178_s22 + $0x2a40] sm:$0xff] }
  0x35   : > { %1911 = vmatpush.msra.mxu1 %v417_v61  ;;  %1892 = vmatpush.msra.mxu0 %v196_v63  ;;  %v1769_v32 = vld [vmem:[%s4178_s22 + $0x3128] sm:$0xff]  ;;  %v1119_v33 = vld [vmem:[%s4178_s22 + $0x1cd8] sm:$0xff]  ;;  %v1340_v34 = vld [vmem:[%s4178_s22 + $0x23c0] sm:$0xff] }
  0x36   : > { %1951 = vmatpush.msra.mxu3 %v833_v62  ;;  %1932 = vmatpush.msra.mxu2 %v612_v0  ;;  %v1535_v35 = vld [vmem:[%s4178_s22 + $0x29d8] sm:$0xff]  ;;  %v1756_v36 = vld [vmem:[%s4178_s22 + $0x30c0] sm:$0xff]  ;;  %v1106_v37 = vld [vmem:[%s4178_s22 + $0x1c70] sm:$0xff] }
  0x37   : > { %1957 = vmatpush.msrb.mxu0 %v1223_v1  ;;  %1912 = vmatpush.msra.mxu1 %v404_v3  ;;  %v1327_v38 = vld [vmem:[%s4178_s22 + $0x2358] sm:$0xff]  ;;  %v1522_v39 = vld [vmem:[%s4178_s22 + $0x2970] sm:$0xff]  ;;  %v1093_v41 = vld [vmem:[%s4178_s22 + $0x1c08] sm:$0xff] }
  0x38   : > { %1997 = vmatpush.msrb.mxu2 %v1639_v2  ;;  %1952 = vmatpush.msra.mxu3 %v820_v4  ;;  %v1743_v40 = vld [vmem:[%s4178_s22 + $0x3058] sm:$0xff]  ;;  %v1314_v42 = vld [vmem:[%s4178_s22 + $0x22f0] sm:$0xff]  ;;  %v1509_v43 = vld [vmem:[%s4178_s22 + $0x2908] sm:$0xff] }
  0x39   : > { %1958 = vmatpush.msrb.mxu0 %v1210_v5  ;;  %1977 = vmatpush.msrb.mxu1 %v1431_v6  ;;  %v1730_v44 = vld [vmem:[%s4178_s22 + $0x2ff0] sm:$0xff]  ;;  %v1080_v45 = vld [vmem:[%s4178_s22 + $0x1ba0] sm:$0xff]  ;;  %v1301_v46 = vld [vmem:[%s4178_s22 + $0x2288] sm:$0xff] }
  0x3a   : > { %1998 = vmatpush.msrb.mxu2 %v1626_v7  ;;  %2017 = vmatpush.msrb.mxu3 %v1847_v8  ;;  %v1496_v47 = vld [vmem:[%s4178_s22 + $0x28a0] sm:$0xff]  ;;  %v1717_v48 = vld [vmem:[%s4178_s22 + $0x2f88] sm:$0xff]  ;;  %v1067_v49 = vld [vmem:[%s4178_s22 + $0x1b38] sm:$0xff] }
  0x3b   : > { %1959 = vmatpush.msrb.mxu0 %v1197_v9  ;;  %1978 = vmatpush.msrb.mxu1 %v1418_v10  ;;  %v1288_v50 = vld [vmem:[%s4178_s22 + $0x2220] sm:$0xff]  ;;  %v1483_v51 = vld [vmem:[%s4178_s22 + $0x2838] sm:$0xff]  ;;  %v1054_v53 = vld [vmem:[%s4178_s22 + $0x1ad0] sm:$0xff] }
  0x3c   : > { %1999 = vmatpush.msrb.mxu2 %v1613_v11  ;;  %2018 = vmatpush.msrb.mxu3 %v1834_v12  ;;  %v1704_v52 = vld [vmem:[%s4178_s22 + $0x2f20] sm:$0xff]  ;;  %v1275_v54 = vld [vmem:[%s4178_s22 + $0x21b8] sm:$0xff]  ;;  %v1470_v56 = vld [vmem:[%s4178_s22 + $0x27d0] sm:$0xff] }
  0x3d   : > { %1960 = vmatpush.msrb.mxu0 %v1184_v13  ;;  %1979 = vmatpush.msrb.mxu1 %v1405_v14  ;;  %v4308_v55 = vld [vmem:[%s172_s18] sm:$0xff]  ;;  %v1691_v57 = vld [vmem:[%s4178_s22 + $0x2eb8] sm:$0xff]  ;;  %v1041_v58 = vld [vmem:[%s4178_s22 + $0x1a68] sm:$0xff] }
  0x3e   : > { %2000 = vmatpush.msrb.mxu2 %v1600_v15  ;;  %2019 = vmatpush.msrb.mxu3 %v1821_v16  ;;  %v1262_v59 = vld [vmem:[%s4178_s22 + $0x2150] sm:$0xff]  ;;  %v1457_v60 = vld [vmem:[%s4178_s22 + $0x2768] sm:$0xff]  ;;  %v4317_v62 = vperm.slane %v4308_v55, 2  ;;  %v1028_v63 = vld [vmem:[%s4178_s22 + $0x1a00] sm:$0xff]  ;;  %v4323_v2 = vperm.slane %v4308_v55, 0  ;;  %v4327_v4 = vperm.slane %v4308_v55, 3 }
  0x3f   : > { %1961 = vmatpush.msrb.mxu0 %v1171_v17  ;;  %1980 = vmatpush.msrb.mxu1 %v1392_v18  ;;  %v1678_v61 = vld [vmem:[%s4178_s22 + $0x2e50] sm:$0xff]  ;;  %v1249_v0 = vld [vmem:[%s4178_s22 + $0x20e8] sm:$0xff]  ;;  %v1444_v1 = vld [vmem:[%s4178_s22 + $0x2700] sm:$0xff]  ;;  %v4334_v8 = vperm.slane %v4308_v55, 1  ;;  %v4349_v18 = vperm.slane %v4308_v55, 6 }
  0x40   : > { %2001 = vmatpush.msrb.mxu2 %v1587_v19  ;;  %2020 = vmatpush.msrb.mxu3 %v1808_v20  ;;  %v1665_v3 = vld [vmem:[%s4178_s22 + $0x2de8] sm:$0xff]  ;;  %v392_v5 = vld [vmem:[%s4178_s22 + $0x620] sm:$0xff]  ;;  %v379_v10 = vld [vmem:[%s4178_s22 + $0x5b8] sm:$0xff] }
  0x41   : > { %1962 = vmatpush.msrb.mxu0 %v1158_v21  ;;  %1981 = vmatpush.msrb.mxu1 %v1379_v22  ;;  %v808_v6 = vld [vmem:[%s4178_s22 + $0x1320] sm:$0xff]  ;;  %v795_v12 = vld [vmem:[%s4178_s22 + $0x12b8] sm:$0xff]  ;;  %v366_v14 = vld [vmem:[%s4178_s22 + $0x550] sm:$0xff]  ;;  %v4355_v22 = vperm.slane %v4308_v55, 4 }
  0x42   : > { %2002 = vmatpush.msrb.mxu2 %v1574_v23  ;;  %2021 = vmatpush.msrb.mxu3 %v1795_v24  ;;  %v1236_v7 = vld [vmem:[%s4178_s22 + $0x2080] sm:$0xff]  ;;  %v587_v15 = vld [vmem:[%s4178_s22 + $0xc38] sm:$0xff]  ;;  %v782_v16 = vld [vmem:[%s4178_s22 + $0x1250] sm:$0xff]  ;;  %v4359_v24 = vperm.slane %v4308_v55, 7 }
  0x43   : > { %1963 = vmatpush.msrb.mxu0 %v1145_v25  ;;  %1982 = vmatpush.msrb.mxu1 %v1366_v26  ;;  %v1652_v9 = vld [vmem:[%s4178_s22 + $0x2d80] sm:$0xff]  ;;  %v1003_v17 = vld [vmem:[%s4178_s22 + $0x1938] sm:$0xff]  ;;  %v353_v19 = vld [vmem:[%s4178_s22 + $0x4e8] sm:$0xff] }
  0x44   : > { %2003 = vmatpush.msrb.mxu2 %v1561_v27  ;;  %2022 = vmatpush.msrb.mxu3 %v1782_v28  ;;  %v600_v11 = vld [vmem:[%s4178_s22 + $0xca0] sm:$0xff]  ;;  %v574_v20 = vld [vmem:[%s4178_s22 + $0xbd0] sm:$0xff]  ;;  %v769_v21 = vld [vmem:[%s4178_s22 + $0x11e8] sm:$0xff]  ;;  %v4366_v28 = vperm.slane %v4308_v55, 5 }
  0x45   : > { %1964 = vmatpush.msrb.mxu0 %v1132_v29  ;;  %1983 = vmatpush.msrb.mxu1 %v1353_v30  ;;  %v1016_v13 = vld [vmem:[%s4178_s22 + $0x19a0] sm:$0xff]  ;;  %v990_v23 = vld [vmem:[%s4178_s22 + $0x18d0] sm:$0xff]  ;;  %v561_v26 = vld [vmem:[%s4178_s22 + $0xb68] sm:$0xff] }
  0x46   : > { %2004 = vmatpush.msrb.mxu2 %v1548_v31  ;;  %2023 = vmatpush.msrb.mxu3 %v1769_v32  ;;  %v340_v25 = vld [vmem:[%s4178_s22 + $0x480] sm:$0xff]  ;;  %v977_v29 = vld [vmem:[%s4178_s22 + $0x1868] sm:$0xff]  ;;  %v327_v30 = vld [vmem:[%s4178_s22 + $0x418] sm:$0xff] }
  0x47   : > { %1965 = vmatpush.msrb.mxu0 %v1119_v33  ;;  %1984 = vmatpush.msrb.mxu1 %v1340_v34  ;;  %v756_v27 = vld [vmem:[%s4178_s22 + $0x1180] sm:$0xff]  ;;  %v743_v32 = vld [vmem:[%s4178_s22 + $0x1118] sm:$0xff]  ;;  %v314_v34 = vld [vmem:[%s4178_s22 + $0x3b0] sm:$0xff] }
  0x48   : > { %2005 = vmatpush.msrb.mxu2 %v1535_v35  ;;  %2024 = vmatpush.msrb.mxu3 %v1756_v36  ;;  %v548_v31 = vld [vmem:[%s4178_s22 + $0xb00] sm:$0xff]  ;;  %v535_v35 = vld [vmem:[%s4178_s22 + $0xa98] sm:$0xff]  ;;  %v730_v36 = vld [vmem:[%s4178_s22 + $0x10b0] sm:$0xff] }
  0x49   : > { %1966 = vmatpush.msrb.mxu0 %v1106_v37  ;;  %1985 = vmatpush.msrb.mxu1 %v1327_v38  ;;  %v964_v33 = vld [vmem:[%s4178_s22 + $0x1800] sm:$0xff]  ;;  %v951_v37 = vld [vmem:[%s4178_s22 + $0x1798] sm:$0xff]  ;;  %v301_v38 = vld [vmem:[%s4178_s22 + $0x348] sm:$0xff] }
  0x4a   : > { %2006 = vmatpush.msrb.mxu2 %v1522_v39  ;;  %2025 = vmatpush.msrb.mxu3 %v1743_v40  ;;  %v522_v39 = vld [vmem:[%s4178_s22 + $0xa30] sm:$0xff]  ;;  %v717_v40 = vld [vmem:[%s4178_s22 + $0x1048] sm:$0xff] }
  0x4b   : > { %1967 = vmatpush.msrb.mxu0 %v1093_v41  ;;  %1986 = vmatpush.msrb.mxu1 %v1314_v42  ;;  %v938_v41 = vld [vmem:[%s4178_s22 + $0x1730] sm:$0xff]  ;;  %v288_v42 = vld [vmem:[%s4178_s22 + $0x2e0] sm:$0xff] }
  0x4c   : > { %2007 = vmatpush.msrb.mxu2 %v1509_v43  ;;  %2026 = vmatpush.msrb.mxu3 %v1730_v44  ;;  %v509_v43 = vld [vmem:[%s4178_s22 + $0x9c8] sm:$0xff]  ;;  %v704_v44 = vld [vmem:[%s4178_s22 + $0xfe0] sm:$0xff]  ;;  %v470_v55 = vld [vmem:[%s4178_s22 + $0x890] sm:$0xff] }
  0x4d   : > { %1968 = vmatpush.msrb.mxu0 %v1080_v45  ;;  %1987 = vmatpush.msrb.mxu1 %v1301_v46  ;;  %v925_v45 = vld [vmem:[%s4178_s22 + $0x16c8] sm:$0xff]  ;;  %v275_v46 = vld [vmem:[%s4178_s22 + $0x278] sm:$0xff] }
  0x4e   : > { %2008 = vmatpush.msrb.mxu2 %v1496_v47  ;;  %2027 = vmatpush.msrb.mxu3 %v1717_v48  ;;  %v496_v47 = vld [vmem:[%s4178_s22 + $0x960] sm:$0xff]  ;;  %v691_v48 = vld [vmem:[%s4178_s22 + $0xf78] sm:$0xff] }
  0x4f   : > { %1969 = vmatpush.msrb.mxu0 %v1067_v49  ;;  %1988 = vmatpush.msrb.mxu1 %v1288_v50  ;;  %v912_v49 = vld [vmem:[%s4178_s22 + $0x1660] sm:$0xff]  ;;  %v262_v50 = vld [vmem:[%s4178_s22 + $0x210] sm:$0xff] }
  0x50   : > { %2009 = vmatpush.msrb.mxu2 %v1483_v51  ;;  %2028 = vmatpush.msrb.mxu3 %v1704_v52  ;;  %v483_v51 = vld [vmem:[%s4178_s22 + $0x8f8] sm:$0xff]  ;;  %v678_v52 = vld [vmem:[%s4178_s22 + $0xf10] sm:$0xff] }
  0x51   : > { %1970 = vmatpush.msrb.mxu0 %v1054_v53  ;;  %1989 = vmatpush.msrb.mxu1 %v1275_v54  ;;  %v899_v53 = vld [vmem:[%s4178_s22 + $0x15f8] sm:$0xff]  ;;  %v249_v54 = vld [vmem:[%s4178_s22 + $0x1a8] sm:$0xff] }
  0x52   : > { %2010 = vmatpush.msrb.mxu2 %v1470_v56  ;;  %2029 = vmatpush.msrb.mxu3 %v1691_v57  ;;  %v665_v56 = vld [vmem:[%s4178_s22 + $0xea8] sm:$0xff]  ;;  %v886_v57 = vld [vmem:[%s4178_s22 + $0x1590] sm:$0xff] }
  0x53   : > { %1971 = vmatpush.msrb.mxu0 %v1041_v58  ;;  %1990 = vmatpush.msrb.mxu1 %v1262_v59  ;;  %v236_v58 = vld [vmem:[%s4178_s22 + $0x140] sm:$0xff]  ;;  %v457_v59 = vld [vmem:[%s4178_s22 + $0x828] sm:$0xff] }
  0x54   : > { %2011 = vmatpush.msrb.mxu2 %v1457_v60  ;;  %2030 = vmatpush.msrb.mxu3 %v1678_v61  ;;  %v652_v60 = vld [vmem:[%s4178_s22 + $0xe40] sm:$0xff]  ;;  %v873_v61 = vld [vmem:[%s4178_s22 + $0x1528] sm:$0xff] }
  0x55   : > { %1933 = vmatmul.f32.vlgmr.msra.gmra.mxu2 %v4317_v62  ;;  %1972 = vmatpush.msrb.mxu0 %v1028_v63  ;;  %v223_v63 = vld [vmem:[%s4178_s22 + $0xd8] sm:$0xff] }
  0x56   : > { %1991 = vmatpush.msrb.mxu1 %v1249_v0  ;;  %2012 = vmatpush.msrb.mxu2 %v1444_v1  ;;  %v444_v0 = vld [vmem:[%s4178_s22 + $0x7c0] sm:$0xff]  ;;  %v639_v1 = vld [vmem:[%s4178_s22 + $0xdd8] sm:$0xff] }
  0x57   : > { %2031 = vmatpush.msrb.mxu3 %v1665_v3  ;;  %1893 = vmatmul.f32.vlgmr.msra.gmra.mxu0 %v4323_v2  ;;  %v860_v3 = vld [vmem:[%s4178_s22 + $0x14c0] sm:$0xff] }
  0x58   : > { %1953 = vmatmul.f32.vlgmr.msra.gmra.mxu3 %v4327_v4  ;;  %2037 = vmatpush.msra.mxu0 %v392_v5  ;;  %v210_v5 = vld [vmem:[%s4178_s22 + $0x70] sm:$0xff] }
  0x59   : > { %2077 = vmatpush.msra.mxu2 %v808_v6  ;;  %1992 = vmatpush.msrb.mxu1 %v1236_v7  ;;  %v431_v6 = vld [vmem:[%s4178_s22 + $0x758] sm:$0xff]  ;;  %v626_v7 = vld [vmem:[%s4178_s22 + $0xd70] sm:$0xff] }
  0x5a   : > { %2032 = vmatpush.msrb.mxu3 %v1652_v9  ;;  %1913 = vmatmul.f32.vlgmr.msra.gmra.mxu1 %v4334_v8  ;;  %v847_v9 = vld [vmem:[%s4178_s22 + $0x1458] sm:$0xff] }
  0x5b   : > { %2038 = vmatpush.msra.mxu0 %v379_v10  ;;  %2057 = vmatpush.msra.mxu1 %v600_v11  ;;  %v197_v10 = vld [vmem:[%s4178_s22 + $0x8] sm:$0xff]  ;;  %v418_v11 = vld [vmem:[%s4178_s22 + $0x6f0] sm:$0xff] }
  0x5c   : > { %2078 = vmatpush.msra.mxu2 %v795_v12  ;;  %2097 = vmatpush.msra.mxu3 %v1016_v13  ;;  %v613_v12 = vld [vmem:[%s4178_s22 + $0xd08] sm:$0xff]  ;;  %v834_v13 = vld [vmem:[%s4178_s22 + $0x13f0] sm:$0xff] }
  0x5d   : > { %2039 = vmatpush.msra.mxu0 %v366_v14  ;;  %2058 = vmatpush.msra.mxu1 %v587_v15  ;;  %v1224_v14 = vld [vmem:[%s4178_s22 + $0x2020] sm:$0xff] }
  0x5e   : > { %2079 = vmatpush.msra.mxu2 %v782_v16  ;;  %2098 = vmatpush.msra.mxu3 %v1003_v17  ;;  %v1640_v15 = vld [vmem:[%s4178_s22 + $0x2d20] sm:$0xff]  ;;  %v405_v16 = vld [vmem:[%s4178_s22 + $0x688] sm:$0xff] }
  0x5f   : > { %2013 = vmatmul.f32.vlgmr.msrb.gmra.mxu2 %v4349_v18  ;;  %2040 = vmatpush.msra.mxu0 %v353_v19  ;;  %v821_v17 = vld [vmem:[%s4178_s22 + $0x1388] sm:$0xff]  ;;  %v1211_v19 = vld [vmem:[%s4178_s22 + $0x1fb8] sm:$0xff] }
  0x60   : > { %2059 = vmatpush.msra.mxu1 %v574_v20  ;;  %2080 = vmatpush.msra.mxu2 %v769_v21  ;;  %v1432_v20 = vld [vmem:[%s4178_s22 + $0x26a0] sm:$0xff]  ;;  %v1627_v21 = vld [vmem:[%s4178_s22 + $0x2cb8] sm:$0xff] }
  0x61   : > { %2099 = vmatpush.msra.mxu3 %v990_v23  ;;  %1973 = vmatmul.f32.vlgmr.msrb.gmra.mxu0 %v4355_v22  ;;  %v1848_v23 = vld [vmem:[%s4178_s22 + $0x33a0] sm:$0xff] }
  0x62   : > { %2033 = vmatmul.f32.vlgmr.msrb.gmra.mxu3 %v4359_v24  ;;  %2041 = vmatpush.msra.mxu0 %v340_v25  ;;  %v1198_v25 = vld [vmem:[%s4178_s22 + $0x1f50] sm:$0xff] }
  0x63   : > { %2060 = vmatpush.msra.mxu1 %v561_v26  ;;  %2081 = vmatpush.msra.mxu2 %v756_v27  ;;  %v1419_v26 = vld [vmem:[%s4178_s22 + $0x2638] sm:$0xff]  ;;  %v1614_v27 = vld [vmem:[%s4178_s22 + $0x2c50] sm:$0xff] }
  0x64   : > { %2100 = vmatpush.msra.mxu3 %v977_v29  ;;  %1993 = vmatmul.f32.vlgmr.msrb.gmra.mxu1 %v4366_v28  ;;  %v1835_v29 = vld [vmem:[%s4178_s22 + $0x3338] sm:$0xff] }
  0x65   : > { %2042 = vmatpush.msra.mxu0 %v327_v30  ;;  %2061 = vmatpush.msra.mxu1 %v548_v31  ;;  %v1185_v30 = vld [vmem:[%s4178_s22 + $0x1ee8] sm:$0xff]  ;;  %v1406_v31 = vld [vmem:[%s4178_s22 + $0x25d0] sm:$0xff] }
  0x66   : > { %2082 = vmatpush.msra.mxu2 %v743_v32  ;;  %2101 = vmatpush.msra.mxu3 %v964_v33  ;;  %v1601_v32 = vld [vmem:[%s4178_s22 + $0x2be8] sm:$0xff]  ;;  %v1822_v33 = vld [vmem:[%s4178_s22 + $0x32d0] sm:$0xff] }
  0x67   : > { %2043 = vmatpush.msra.mxu0 %v314_v34  ;;  %2062 = vmatpush.msra.mxu1 %v535_v35  ;;  %v1172_v34 = vld [vmem:[%s4178_s22 + $0x1e80] sm:$0xff]  ;;  %v1393_v35 = vld [vmem:[%s4178_s22 + $0x2568] sm:$0xff] }
  0x68   : > { %2083 = vmatpush.msra.mxu2 %v730_v36  ;;  %2102 = vmatpush.msra.mxu3 %v951_v37  ;;  %v1588_v36 = vld [vmem:[%s4178_s22 + $0x2b80] sm:$0xff]  ;;  %v1809_v37 = vld [vmem:[%s4178_s22 + $0x3268] sm:$0xff] }
  0x69   : > { %2044 = vmatpush.msra.mxu0 %v301_v38  ;;  %2063 = vmatpush.msra.mxu1 %v522_v39  ;;  %v1159_v38 = vld [vmem:[%s4178_s22 + $0x1e18] sm:$0xff]  ;;  %v1380_v39 = vld [vmem:[%s4178_s22 + $0x2500] sm:$0xff] }
  0x6a   : > { %2084 = vmatpush.msra.mxu2 %v717_v40  ;;  %2103 = vmatpush.msra.mxu3 %v938_v41  ;;  %v1575_v40 = vld [vmem:[%s4178_s22 + $0x2b18] sm:$0xff]  ;;  %v1796_v41 = vld [vmem:[%s4178_s22 + $0x3200] sm:$0xff] }
  0x6b   : > { %2045 = vmatpush.msra.mxu0 %v288_v42  ;;  %2064 = vmatpush.msra.mxu1 %v509_v43  ;;  %v1146_v42 = vld [vmem:[%s4178_s22 + $0x1db0] sm:$0xff]  ;;  %v1367_v43 = vld [vmem:[%s4178_s22 + $0x2498] sm:$0xff] }
  0x6c   : > { %2085 = vmatpush.msra.mxu2 %v704_v44  ;;  %2104 = vmatpush.msra.mxu3 %v925_v45  ;;  %v1562_v44 = vld [vmem:[%s4178_s22 + $0x2ab0] sm:$0xff]  ;;  %v1783_v45 = vld [vmem:[%s4178_s22 + $0x3198] sm:$0xff] }
  0x6d   : > { %2046 = vmatpush.msra.mxu0 %v275_v46  ;;  %2065 = vmatpush.msra.mxu1 %v496_v47  ;;  %v1133_v46 = vld [vmem:[%s4178_s22 + $0x1d48] sm:$0xff]  ;;  %v1354_v47 = vld [vmem:[%s4178_s22 + $0x2430] sm:$0xff] }
  0x6e   : > { %2086 = vmatpush.msra.mxu2 %v691_v48  ;;  %2105 = vmatpush.msra.mxu3 %v912_v49  ;;  %v1549_v48 = vld [vmem:[%s4178_s22 + $0x2a48] sm:$0xff]  ;;  %v1770_v49 = vld [vmem:[%s4178_s22 + $0x3130] sm:$0xff] }
  0x6f   : > { %2047 = vmatpush.msra.mxu0 %v262_v50  ;;  %2066 = vmatpush.msra.mxu1 %v483_v51  ;;  %v1120_v50 = vld [vmem:[%s4178_s22 + $0x1ce0] sm:$0xff]  ;;  %v1341_v51 = vld [vmem:[%s4178_s22 + $0x23c8] sm:$0xff] }
  0x70   : > { %2087 = vmatpush.msra.mxu2 %v678_v52  ;;  %2106 = vmatpush.msra.mxu3 %v899_v53  ;;  %v1536_v52 = vld [vmem:[%s4178_s22 + $0x29e0] sm:$0xff]  ;;  %v1757_v53 = vld [vmem:[%s4178_s22 + $0x30c8] sm:$0xff] }
  0x71   : > { %2048 = vmatpush.msra.mxu0 %v249_v54  ;;  %2067 = vmatpush.msra.mxu1 %v470_v55  ;;  %v1107_v54 = vld [vmem:[%s4178_s22 + $0x1c78] sm:$0xff]  ;;  %v1328_v55 = vld [vmem:[%s4178_s22 + $0x2360] sm:$0xff] }
  0x72   : > { %2088 = vmatpush.msra.mxu2 %v665_v56  ;;  %2107 = vmatpush.msra.mxu3 %v886_v57  ;;  %v1523_v56 = vld [vmem:[%s4178_s22 + $0x2978] sm:$0xff]  ;;  %v1744_v57 = vld [vmem:[%s4178_s22 + $0x3060] sm:$0xff] }
  0x73   : > { %2049 = vmatpush.msra.mxu0 %v236_v58  ;;  %2068 = vmatpush.msra.mxu1 %v457_v59  ;;  %v1094_v58 = vld [vmem:[%s4178_s22 + $0x1c10] sm:$0xff]  ;;  %v1315_v59 = vld [vmem:[%s4178_s22 + $0x22f8] sm:$0xff] }
  0x74   : > { %2089 = vmatpush.msra.mxu2 %v652_v60  ;;  %2108 = vmatpush.msra.mxu3 %v873_v61  ;;  %v1510_v60 = vld [vmem:[%s4178_s22 + $0x2910] sm:$0xff]  ;;  %v1731_v61 = vld [vmem:[%s4178_s22 + $0x2ff8] sm:$0xff] }
  0x75   : > { %2050 = vmatpush.msra.mxu0 %v223_v63  ;;  %2069 = vmatpush.msra.mxu1 %v444_v0  ;;  %v1081_v63 = vld [vmem:[%s4178_s22 + $0x1ba8] sm:$0xff]  ;;  %v1302_v0 = vld [vmem:[%s4178_s22 + $0x2290] sm:$0xff] }
  0x76   : > { %2090 = vmatpush.msra.mxu2 %v639_v1  ;;  %2109 = vmatpush.msra.mxu3 %v860_v3  ;;  %v1497_v1 = vld [vmem:[%s4178_s22 + $0x28a8] sm:$0xff]  ;;  %v1718_v3 = vld [vmem:[%s4178_s22 + $0x2f90] sm:$0xff] }
  0x77   : > { %2051 = vmatpush.msra.mxu0 %v210_v5  ;;  %2070 = vmatpush.msra.mxu1 %v431_v6  ;;  %v1068_v5 = vld [vmem:[%s4178_s22 + $0x1b40] sm:$0xff]  ;;  %v1289_v6 = vld [vmem:[%s4178_s22 + $0x2228] sm:$0xff] }
  0x78   : > { %2091 = vmatpush.msra.mxu2 %v626_v7  ;;  %2110 = vmatpush.msra.mxu3 %v847_v9  ;;  %v1484_v7 = vld [vmem:[%s4178_s22 + $0x2840] sm:$0xff]  ;;  %v1705_v9 = vld [vmem:[%s4178_s22 + $0x2f28] sm:$0xff] }
  0x79   : > { %2052 = vmatpush.msra.mxu0 %v197_v10  ;;  %2071 = vmatpush.msra.mxu1 %v418_v11  ;;  %v1055_v10 = vld [vmem:[%s4178_s22 + $0x1ad8] sm:$0xff]  ;;  %v1276_v11 = vld [vmem:[%s4178_s22 + $0x21c0] sm:$0xff] }
  0x7a   : > { %2092 = vmatpush.msra.mxu2 %v613_v12  ;;  %2111 = vmatpush.msra.mxu3 %v834_v13  ;;  %v1471_v12 = vld [vmem:[%s4178_s22 + $0x27d8] sm:$0xff]  ;;  %v1692_v13 = vld [vmem:[%s4178_s22 + $0x2ec0] sm:$0xff] }
  0x7b   : > { %2117 = vmatpush.msrb.mxu0 %v1224_v14  ;;  %2072 = vmatpush.msra.mxu1 %v405_v16  ;;  %v1042_v14 = vld [vmem:[%s4178_s22 + $0x1a70] sm:$0xff] }
  0x7c   : > { %2157 = vmatpush.msrb.mxu2 %v1640_v15  ;;  %2112 = vmatpush.msra.mxu3 %v821_v17  ;;  %v1263_v15 = vld [vmem:[%s4178_s22 + $0x2158] sm:$0xff]  ;;  %v1458_v16 = vld [vmem:[%s4178_s22 + $0x2770] sm:$0xff] }
  0x7d   : > { %2118 = vmatpush.msrb.mxu0 %v1211_v19  ;;  %2137 = vmatpush.msrb.mxu1 %v1432_v20  ;;  %v1679_v17 = vld [vmem:[%s4178_s22 + $0x2e58] sm:$0xff]  ;;  %v1029_v19 = vld [vmem:[%s4178_s22 + $0x1a08] sm:$0xff]  ;;  %v1250_v20 = vld [vmem:[%s4178_s22 + $0x20f0] sm:$0xff] }
  0x7e   : > { %2158 = vmatpush.msrb.mxu2 %v1627_v21  ;;  %2177 = vmatpush.msrb.mxu3 %v1848_v23  ;;  %v1445_v21 = vld [vmem:[%s4178_s22 + $0x2708] sm:$0xff]  ;;  %v1666_v23 = vld [vmem:[%s4178_s22 + $0x2df0] sm:$0xff] }
  0x7f   : > { %2119 = vmatpush.msrb.mxu0 %v1198_v25  ;;  %2138 = vmatpush.msrb.mxu1 %v1419_v26  ;;  %v393_v25 = vld [vmem:[%s4178_s22 + $0x628] sm:$0xff] }
  0x80   : > { %2159 = vmatpush.msrb.mxu2 %v1614_v27  ;;  %2178 = vmatpush.msrb.mxu3 %v1835_v29  ;;  %v809_v26 = vld [vmem:[%s4178_s22 + $0x1328] sm:$0xff] }
  0x81   : > { %2120 = vmatpush.msrb.mxu0 %v1185_v30  ;;  %2139 = vmatpush.msrb.mxu1 %v1406_v31  ;;  %v1237_v27 = vld [vmem:[%s4178_s22 + $0x2088] sm:$0xff]  ;;  %v380_v30 = vld [vmem:[%s4178_s22 + $0x5c0] sm:$0xff] }
  0x82   : > { %2160 = vmatpush.msrb.mxu2 %v1601_v32  ;;  %2179 = vmatpush.msrb.mxu3 %v1822_v33  ;;  %v1653_v29 = vld [vmem:[%s4178_s22 + $0x2d88] sm:$0xff]  ;;  %v796_v32 = vld [vmem:[%s4178_s22 + $0x12c0] sm:$0xff] }
  0x83   : > { %2121 = vmatpush.msrb.mxu0 %v1172_v34  ;;  %2140 = vmatpush.msrb.mxu1 %v1393_v35  ;;  %v601_v31 = vld [vmem:[%s4178_s22 + $0xca8] sm:$0xff]  ;;  %v367_v34 = vld [vmem:[%s4178_s22 + $0x558] sm:$0xff]  ;;  %v588_v35 = vld [vmem:[%s4178_s22 + $0xc40] sm:$0xff] }
  0x84   : > { %2161 = vmatpush.msrb.mxu2 %v1588_v36  ;;  %2180 = vmatpush.msrb.mxu3 %v1809_v37  ;;  %v1017_v33 = vld [vmem:[%s4178_s22 + $0x19a8] sm:$0xff]  ;;  %v783_v36 = vld [vmem:[%s4178_s22 + $0x1258] sm:$0xff]  ;;  %v1004_v37 = vld [vmem:[%s4178_s22 + $0x1940] sm:$0xff] }
  0x85   : > { %2122 = vmatpush.msrb.mxu0 %v1159_v38  ;;  %2141 = vmatpush.msrb.mxu1 %v1380_v39  ;;  %v354_v38 = vld [vmem:[%s4178_s22 + $0x4f0] sm:$0xff]  ;;  %v575_v39 = vld [vmem:[%s4178_s22 + $0xbd8] sm:$0xff] }
  0x86   : > { %2162 = vmatpush.msrb.mxu2 %v1575_v40  ;;  %2181 = vmatpush.msrb.mxu3 %v1796_v41  ;;  %v770_v40 = vld [vmem:[%s4178_s22 + $0x11f0] sm:$0xff]  ;;  %v991_v41 = vld [vmem:[%s4178_s22 + $0x18d8] sm:$0xff] }
  0x87   : > { %2123 = vmatpush.msrb.mxu0 %v1146_v42  ;;  %2142 = vmatpush.msrb.mxu1 %v1367_v43  ;;  %v341_v42 = vld [vmem:[%s4178_s22 + $0x488] sm:$0xff]  ;;  %v562_v43 = vld [vmem:[%s4178_s22 + $0xb70] sm:$0xff] }
  0x88   : > { %2163 = vmatpush.msrb.mxu2 %v1562_v44  ;;  %2182 = vmatpush.msrb.mxu3 %v1783_v45  ;;  %v757_v44 = vld [vmem:[%s4178_s22 + $0x1188] sm:$0xff]  ;;  %v978_v45 = vld [vmem:[%s4178_s22 + $0x1870] sm:$0xff] }
  0x89   : > { %2124 = vmatpush.msrb.mxu0 %v1133_v46  ;;  %2143 = vmatpush.msrb.mxu1 %v1354_v47  ;;  %v328_v46 = vld [vmem:[%s4178_s22 + $0x420] sm:$0xff]  ;;  %v549_v47 = vld [vmem:[%s4178_s22 + $0xb08] sm:$0xff] }
  0x8a   : > { %2164 = vmatpush.msrb.mxu2 %v1549_v48  ;;  %2183 = vmatpush.msrb.mxu3 %v1770_v49  ;;  %v744_v48 = vld [vmem:[%s4178_s22 + $0x1120] sm:$0xff]  ;;  %v965_v49 = vld [vmem:[%s4178_s22 + $0x1808] sm:$0xff] }
  0x8b   : > { %2125 = vmatpush.msrb.mxu0 %v1120_v50  ;;  %2144 = vmatpush.msrb.mxu1 %v1341_v51  ;;  %v315_v50 = vld [vmem:[%s4178_s22 + $0x3b8] sm:$0xff]  ;;  %v536_v51 = vld [vmem:[%s4178_s22 + $0xaa0] sm:$0xff] }
  0x8c   : > { %2165 = vmatpush.msrb.mxu2 %v1536_v52  ;;  %2184 = vmatpush.msrb.mxu3 %v1757_v53  ;;  %v731_v52 = vld [vmem:[%s4178_s22 + $0x10b8] sm:$0xff]  ;;  %v952_v53 = vld [vmem:[%s4178_s22 + $0x17a0] sm:$0xff] }
  0x8d   : > { %2126 = vmatpush.msrb.mxu0 %v1107_v54  ;;  %2145 = vmatpush.msrb.mxu1 %v1328_v55  ;;  %v302_v54 = vld [vmem:[%s4178_s22 + $0x350] sm:$0xff]  ;;  %v523_v55 = vld [vmem:[%s4178_s22 + $0xa38] sm:$0xff] }
  0x8e   : > { %2166 = vmatpush.msrb.mxu2 %v1523_v56  ;;  %2185 = vmatpush.msrb.mxu3 %v1744_v57  ;;  %v718_v56 = vld [vmem:[%s4178_s22 + $0x1050] sm:$0xff]  ;;  %v939_v57 = vld [vmem:[%s4178_s22 + $0x1738] sm:$0xff] }
  0x8f   : > { %2127 = vmatpush.msrb.mxu0 %v1094_v58  ;;  %2146 = vmatpush.msrb.mxu1 %v1315_v59  ;;  %v289_v58 = vld [vmem:[%s4178_s22 + $0x2e8] sm:$0xff]  ;;  %v510_v59 = vld [vmem:[%s4178_s22 + $0x9d0] sm:$0xff] }
  0x90   : > { %2167 = vmatpush.msrb.mxu2 %v1510_v60  ;;  %2186 = vmatpush.msrb.mxu3 %v1731_v61  ;;  %v705_v60 = vld [vmem:[%s4178_s22 + $0xfe8] sm:$0xff]  ;;  %v926_v61 = vld [vmem:[%s4178_s22 + $0x16d0] sm:$0xff] }
  0x91   : > { %2128 = vmatpush.msrb.mxu0 %v1081_v63  ;;  %2147 = vmatpush.msrb.mxu1 %v1302_v0  ;;  %v276_v63 = vld [vmem:[%s4178_s22 + $0x280] sm:$0xff]  ;;  %v497_v0 = vld [vmem:[%s4178_s22 + $0x968] sm:$0xff] }
  0x92   : > { %2168 = vmatpush.msrb.mxu2 %v1497_v1  ;;  %2187 = vmatpush.msrb.mxu3 %v1718_v3  ;;  %v692_v1 = vld [vmem:[%s4178_s22 + $0xf80] sm:$0xff]  ;;  %v913_v3 = vld [vmem:[%s4178_s22 + $0x1668] sm:$0xff] }
  0x93   : > { %2093 = vmatmul.f32.vlgmr.msra.gmra.mxu2 %v4317_v62  ;;  %2129 = vmatpush.msrb.mxu0 %v1068_v5  ;;  %v263_v5 = vld [vmem:[%s4178_s22 + $0x218] sm:$0xff] }
  0x94   : > { %2148 = vmatpush.msrb.mxu1 %v1289_v6  ;;  %2169 = vmatpush.msrb.mxu2 %v1484_v7  ;;  %v484_v6 = vld [vmem:[%s4178_s22 + $0x900] sm:$0xff]  ;;  %v679_v7 = vld [vmem:[%s4178_s22 + $0xf18] sm:$0xff] }
  0x95   : > { %2188 = vmatpush.msrb.mxu3 %v1705_v9  ;;  %2053 = vmatmul.f32.vlgmr.msra.gmra.mxu0 %v4323_v2  ;;  %v900_v9 = vld [vmem:[%s4178_s22 + $0x1600] sm:$0xff] }
  0x96   : > { %2113 = vmatmul.f32.vlgmr.msra.gmra.mxu3 %v4327_v4  ;;  %2130 = vmatpush.msrb.mxu0 %v1055_v10  ;;  %v250_v10 = vld [vmem:[%s4178_s22 + $0x1b0] sm:$0xff] }
  0x97   : > { %2149 = vmatpush.msrb.mxu1 %v1276_v11  ;;  %2170 = vmatpush.msrb.mxu2 %v1471_v12  ;;  %v471_v11 = vld [vmem:[%s4178_s22 + $0x898] sm:$0xff]  ;;  %v666_v12 = vld [vmem:[%s4178_s22 + $0xeb0] sm:$0xff] }
  0x98   : > { %2189 = vmatpush.msrb.mxu3 %v1692_v13  ;;  %2073 = vmatmul.f32.vlgmr.msra.gmra.mxu1 %v4334_v8  ;;  %v887_v13 = vld [vmem:[%s4178_s22 + $0x1598] sm:$0xff] }
  0x99   : > { %2131 = vmatpush.msrb.mxu0 %v1042_v14  ;;  %2150 = vmatpush.msrb.mxu1 %v1263_v15  ;;  %v237_v14 = vld [vmem:[%s4178_s22 + $0x148] sm:$0xff]  ;;  %v458_v15 = vld [vmem:[%s4178_s22 + $0x830] sm:$0xff] }
  0x9a   : > { %2171 = vmatpush.msrb.mxu2 %v1458_v16  ;;  %2190 = vmatpush.msrb.mxu3 %v1679_v17  ;;  %v653_v16 = vld [vmem:[%s4178_s22 + $0xe48] sm:$0xff]  ;;  %v874_v17 = vld [vmem:[%s4178_s22 + $0x1530] sm:$0xff] }
  0x9b   : > { %2132 = vmatpush.msrb.mxu0 %v1029_v19  ;;  %2151 = vmatpush.msrb.mxu1 %v1250_v20  ;;  %v224_v19 = vld [vmem:[%s4178_s22 + $0xe0] sm:$0xff]  ;;  %v445_v20 = vld [vmem:[%s4178_s22 + $0x7c8] sm:$0xff] }
  0x9c   : > { %2172 = vmatpush.msrb.mxu2 %v1445_v21  ;;  %2191 = vmatpush.msrb.mxu3 %v1666_v23  ;;  %v640_v21 = vld [vmem:[%s4178_s22 + $0xde0] sm:$0xff]  ;;  %v861_v23 = vld [vmem:[%s4178_s22 + $0x14c8] sm:$0xff] }
  0x9d   : > { %2173 = vmatmul.f32.vlgmr.msrb.gmra.mxu2 %v4349_v18  ;;  %2197 = vmatpush.msra.mxu0 %v393_v25  ;;  %v211_v25 = vld [vmem:[%s4178_s22 + $0x78] sm:$0xff] }
  0x9e   : > { %2237 = vmatpush.msra.mxu2 %v809_v26  ;;  %2152 = vmatpush.msrb.mxu1 %v1237_v27  ;;  %v432_v26 = vld [vmem:[%s4178_s22 + $0x760] sm:$0xff]  ;;  %v627_v27 = vld [vmem:[%s4178_s22 + $0xd78] sm:$0xff] }
  0x9f   : > { %2192 = vmatpush.msrb.mxu3 %v1653_v29  ;;  %2133 = vmatmul.f32.vlgmr.msrb.gmra.mxu0 %v4355_v22  ;;  %v848_v29 = vld [vmem:[%s4178_s22 + $0x1460] sm:$0xff] }
  0xa0   : > { %2193 = vmatmul.f32.vlgmr.msrb.gmra.mxu3 %v4359_v24  ;;  %2198 = vmatpush.msra.mxu0 %v380_v30  ;;  %v198_v30 = vld [vmem:[%s4178_s22 + $0x10] sm:$0xff] }
  0xa1   : > { %2217 = vmatpush.msra.mxu1 %v601_v31  ;;  %2238 = vmatpush.msra.mxu2 %v796_v32  ;;  %v419_v31 = vld [vmem:[%s4178_s22 + $0x6f8] sm:$0xff]  ;;  %v614_v32 = vld [vmem:[%s4178_s22 + $0xd10] sm:$0xff] }
  0xa2   : > { %2257 = vmatpush.msra.mxu3 %v1017_v33  ;;  %2153 = vmatmul.f32.vlgmr.msrb.gmra.mxu1 %v4366_v28  ;;  %v835_v33 = vld [vmem:[%s4178_s22 + $0x13f8] sm:$0xff] }
  0xa3   : > { %2199 = vmatpush.msra.mxu0 %v367_v34  ;;  %2218 = vmatpush.msra.mxu1 %v588_v35  ;;  %v1225_v34 = vld [vmem:[%s4178_s22 + $0x2028] sm:$0xff] }
  0xa4   : > { %2239 = vmatpush.msra.mxu2 %v783_v36  ;;  %2258 = vmatpush.msra.mxu3 %v1004_v37  ;;  %v1641_v35 = vld [vmem:[%s4178_s22 + $0x2d28] sm:$0xff]  ;;  %v406_v36 = vld [vmem:[%s4178_s22 + $0x690] sm:$0xff] }
  0xa5   : > { %2200 = vmatpush.msra.mxu0 %v354_v38  ;;  %2219 = vmatpush.msra.mxu1 %v575_v39  ;;  %v822_v37 = vld [vmem:[%s4178_s22 + $0x1390] sm:$0xff]  ;;  %v1212_v38 = vld [vmem:[%s4178_s22 + $0x1fc0] sm:$0xff]  ;;  %v1433_v39 = vld [vmem:[%s4178_s22 + $0x26a8] sm:$0xff] }
  0xa6   : > { %2240 = vmatpush.msra.mxu2 %v770_v40  ;;  %2259 = vmatpush.msra.mxu3 %v991_v41  ;;  %v1628_v40 = vld [vmem:[%s4178_s22 + $0x2cc0] sm:$0xff]  ;;  %v1849_v41 = vld [vmem:[%s4178_s22 + $0x33a8] sm:$0xff] }
  0xa7   : > { %2201 = vmatpush.msra.mxu0 %v341_v42  ;;  %2220 = vmatpush.msra.mxu1 %v562_v43  ;;  %v1199_v42 = vld [vmem:[%s4178_s22 + $0x1f58] sm:$0xff]  ;;  %v1420_v43 = vld [vmem:[%s4178_s22 + $0x2640] sm:$0xff] }
  0xa8   : > { %2241 = vmatpush.msra.mxu2 %v757_v44  ;;  %2260 = vmatpush.msra.mxu3 %v978_v45  ;;  %v1615_v44 = vld [vmem:[%s4178_s22 + $0x2c58] sm:$0xff]  ;;  %v1836_v45 = vld [vmem:[%s4178_s22 + $0x3340] sm:$0xff] }
  0xa9   : > { %2202 = vmatpush.msra.mxu0 %v328_v46  ;;  %2221 = vmatpush.msra.mxu1 %v549_v47  ;;  %v1186_v46 = vld [vmem:[%s4178_s22 + $0x1ef0] sm:$0xff]  ;;  %v1407_v47 = vld [vmem:[%s4178_s22 + $0x25d8] sm:$0xff] }
  0xaa   : > { %2242 = vmatpush.msra.mxu2 %v744_v48  ;;  %2261 = vmatpush.msra.mxu3 %v965_v49  ;;  %v1602_v48 = vld [vmem:[%s4178_s22 + $0x2bf0] sm:$0xff]  ;;  %v1823_v49 = vld [vmem:[%s4178_s22 + $0x32d8] sm:$0xff] }
  0xab   : > { %2203 = vmatpush.msra.mxu0 %v315_v50  ;;  %2222 = vmatpush.msra.mxu1 %v536_v51  ;;  %v1173_v50 = vld [vmem:[%s4178_s22 + $0x1e88] sm:$0xff]  ;;  %v1394_v51 = vld [vmem:[%s4178_s22 + $0x2570] sm:$0xff] }
  0xac   : > { %2243 = vmatpush.msra.mxu2 %v731_v52  ;;  %2262 = vmatpush.msra.mxu3 %v952_v53  ;;  %v1589_v52 = vld [vmem:[%s4178_s22 + $0x2b88] sm:$0xff]  ;;  %v1810_v53 = vld [vmem:[%s4178_s22 + $0x3270] sm:$0xff] }
  0xad   : > { %2204 = vmatpush.msra.mxu0 %v302_v54  ;;  %2223 = vmatpush.msra.mxu1 %v523_v55  ;;  %v1160_v54 = vld [vmem:[%s4178_s22 + $0x1e20] sm:$0xff]  ;;  %v1381_v55 = vld [vmem:[%s4178_s22 + $0x2508] sm:$0xff] }
  0xae   : > { %2244 = vmatpush.msra.mxu2 %v718_v56  ;;  %2263 = vmatpush.msra.mxu3 %v939_v57  ;;  %v1576_v56 = vld [vmem:[%s4178_s22 + $0x2b20] sm:$0xff]  ;;  %v1797_v57 = vld [vmem:[%s4178_s22 + $0x3208] sm:$0xff] }
  0xaf   : > { %2205 = vmatpush.msra.mxu0 %v289_v58  ;;  %2224 = vmatpush.msra.mxu1 %v510_v59  ;;  %v1147_v58 = vld [vmem:[%s4178_s22 + $0x1db8] sm:$0xff]  ;;  %v1368_v59 = vld [vmem:[%s4178_s22 + $0x24a0] sm:$0xff] }
  0xb0   : > { %2245 = vmatpush.msra.mxu2 %v705_v60  ;;  %2264 = vmatpush.msra.mxu3 %v926_v61  ;;  %v1563_v60 = vld [vmem:[%s4178_s22 + $0x2ab8] sm:$0xff]  ;;  %v1784_v61 = vld [vmem:[%s4178_s22 + $0x31a0] sm:$0xff] }
  0xb1   : > { %2206 = vmatpush.msra.mxu0 %v276_v63  ;;  %2225 = vmatpush.msra.mxu1 %v497_v0  ;;  %v1134_v63 = vld [vmem:[%s4178_s22 + $0x1d50] sm:$0xff]  ;;  %v1355_v0 = vld [vmem:[%s4178_s22 + $0x2438] sm:$0xff] }
  0xb2   : > { %2246 = vmatpush.msra.mxu2 %v692_v1  ;;  %2265 = vmatpush.msra.mxu3 %v913_v3  ;;  %v1550_v1 = vld [vmem:[%s4178_s22 + $0x2a50] sm:$0xff]  ;;  %v1771_v3 = vld [vmem:[%s4178_s22 + $0x3138] sm:$0xff] }
  0xb3   : > { %2207 = vmatpush.msra.mxu0 %v263_v5  ;;  %2226 = vmatpush.msra.mxu1 %v484_v6  ;;  %v1121_v5 = vld [vmem:[%s4178_s22 + $0x1ce8] sm:$0xff]  ;;  %v1342_v6 = vld [vmem:[%s4178_s22 + $0x23d0] sm:$0xff] }
  0xb4   : > { %2247 = vmatpush.msra.mxu2 %v679_v7  ;;  %2266 = vmatpush.msra.mxu3 %v900_v9  ;;  %v1537_v7 = vld [vmem:[%s4178_s22 + $0x29e8] sm:$0xff]  ;;  %v1758_v9 = vld [vmem:[%s4178_s22 + $0x30d0] sm:$0xff] }
  0xb5   : > { %2208 = vmatpush.msra.mxu0 %v250_v10  ;;  %2227 = vmatpush.msra.mxu1 %v471_v11  ;;  %v1108_v10 = vld [vmem:[%s4178_s22 + $0x1c80] sm:$0xff]  ;;  %v1329_v11 = vld [vmem:[%s4178_s22 + $0x2368] sm:$0xff] }
  0xb6   : > { %2248 = vmatpush.msra.mxu2 %v666_v12  ;;  %2267 = vmatpush.msra.mxu3 %v887_v13  ;;  %v1524_v12 = vld [vmem:[%s4178_s22 + $0x2980] sm:$0xff]  ;;  %v1745_v13 = vld [vmem:[%s4178_s22 + $0x3068] sm:$0xff] }
  0xb7   : > { %2209 = vmatpush.msra.mxu0 %v237_v14  ;;  %2228 = vmatpush.msra.mxu1 %v458_v15  ;;  %v1095_v14 = vld [vmem:[%s4178_s22 + $0x1c18] sm:$0xff]  ;;  %v1316_v15 = vld [vmem:[%s4178_s22 + $0x2300] sm:$0xff] }
  0xb8   : > { %2249 = vmatpush.msra.mxu2 %v653_v16  ;;  %2268 = vmatpush.msra.mxu3 %v874_v17  ;;  %v1511_v16 = vld [vmem:[%s4178_s22 + $0x2918] sm:$0xff]  ;;  %v1732_v17 = vld [vmem:[%s4178_s22 + $0x3000] sm:$0xff] }
  0xb9   : > { %2210 = vmatpush.msra.mxu0 %v224_v19  ;;  %2229 = vmatpush.msra.mxu1 %v445_v20  ;;  %v1082_v19 = vld [vmem:[%s4178_s22 + $0x1bb0] sm:$0xff]  ;;  %v1303_v20 = vld [vmem:[%s4178_s22 + $0x2298] sm:$0xff] }
  0xba   : > { %2250 = vmatpush.msra.mxu2 %v640_v21  ;;  %2269 = vmatpush.msra.mxu3 %v861_v23  ;;  %v1498_v21 = vld [vmem:[%s4178_s22 + $0x28b0] sm:$0xff]  ;;  %v1719_v23 = vld [vmem:[%s4178_s22 + $0x2f98] sm:$0xff] }
  0xbb   : > { %2211 = vmatpush.msra.mxu0 %v211_v25  ;;  %2230 = vmatpush.msra.mxu1 %v432_v26  ;;  %v1069_v25 = vld [vmem:[%s4178_s22 + $0x1b48] sm:$0xff]  ;;  %v1290_v26 = vld [vmem:[%s4178_s22 + $0x2230] sm:$0xff] }
  0xbc   : > { %2251 = vmatpush.msra.mxu2 %v627_v27  ;;  %2270 = vmatpush.msra.mxu3 %v848_v29  ;;  %v1485_v27 = vld [vmem:[%s4178_s22 + $0x2848] sm:$0xff]  ;;  %v1706_v29 = vld [vmem:[%s4178_s22 + $0x2f30] sm:$0xff] }
  0xbd   : > { %2212 = vmatpush.msra.mxu0 %v198_v30  ;;  %2231 = vmatpush.msra.mxu1 %v419_v31  ;;  %v1056_v30 = vld [vmem:[%s4178_s22 + $0x1ae0] sm:$0xff]  ;;  %v1277_v31 = vld [vmem:[%s4178_s22 + $0x21c8] sm:$0xff] }
  0xbe   : > { %2252 = vmatpush.msra.mxu2 %v614_v32  ;;  %2271 = vmatpush.msra.mxu3 %v835_v33  ;;  %v1472_v32 = vld [vmem:[%s4178_s22 + $0x27e0] sm:$0xff]  ;;  %v1693_v33 = vld [vmem:[%s4178_s22 + $0x2ec8] sm:$0xff] }
  0xbf   : > { %2277 = vmatpush.msrb.mxu0 %v1225_v34  ;;  %2232 = vmatpush.msra.mxu1 %v406_v36  ;;  %v1043_v34 = vld [vmem:[%s4178_s22 + $0x1a78] sm:$0xff] }
  0xc0   : > { %2317 = vmatpush.msrb.mxu2 %v1641_v35  ;;  %2272 = vmatpush.msra.mxu3 %v822_v37  ;;  %v1264_v35 = vld [vmem:[%s4178_s22 + $0x2160] sm:$0xff]  ;;  %v1459_v36 = vld [vmem:[%s4178_s22 + $0x2778] sm:$0xff] }
  0xc1   : > { %2278 = vmatpush.msrb.mxu0 %v1212_v38  ;;  %2297 = vmatpush.msrb.mxu1 %v1433_v39  ;;  %v1680_v37 = vld [vmem:[%s4178_s22 + $0x2e60] sm:$0xff]  ;;  %v1030_v38 = vld [vmem:[%s4178_s22 + $0x1a10] sm:$0xff]  ;;  %v1251_v39 = vld [vmem:[%s4178_s22 + $0x20f8] sm:$0xff] }
  0xc2   : > { %2318 = vmatpush.msrb.mxu2 %v1628_v40  ;;  %2337 = vmatpush.msrb.mxu3 %v1849_v41  ;;  %v1446_v40 = vld [vmem:[%s4178_s22 + $0x2710] sm:$0xff]  ;;  %v1667_v41 = vld [vmem:[%s4178_s22 + $0x2df8] sm:$0xff] }
  0xc3   : > { %2279 = vmatpush.msrb.mxu0 %v1199_v42  ;;  %2298 = vmatpush.msrb.mxu1 %v1420_v43  ;;  %v394_v42 = vld [vmem:[%s4178_s22 + $0x630] sm:$0xff] }
  0xc4   : > { %2319 = vmatpush.msrb.mxu2 %v1615_v44  ;;  %2338 = vmatpush.msrb.mxu3 %v1836_v45  ;;  %v810_v43 = vld [vmem:[%s4178_s22 + $0x1330] sm:$0xff] }
  0xc5   : > { %2280 = vmatpush.msrb.mxu0 %v1186_v46  ;;  %2299 = vmatpush.msrb.mxu1 %v1407_v47  ;;  %v1238_v44 = vld [vmem:[%s4178_s22 + $0x2090] sm:$0xff]  ;;  %v381_v46 = vld [vmem:[%s4178_s22 + $0x5c8] sm:$0xff] }
  0xc6   : > { %2320 = vmatpush.msrb.mxu2 %v1602_v48  ;;  %2339 = vmatpush.msrb.mxu3 %v1823_v49  ;;  %v1654_v45 = vld [vmem:[%s4178_s22 + $0x2d90] sm:$0xff]  ;;  %v797_v48 = vld [vmem:[%s4178_s22 + $0x12c8] sm:$0xff] }
  0xc7   : > { %2281 = vmatpush.msrb.mxu0 %v1173_v50  ;;  %2300 = vmatpush.msrb.mxu1 %v1394_v51  ;;  %v602_v47 = vld [vmem:[%s4178_s22 + $0xcb0] sm:$0xff]  ;;  %v368_v50 = vld [vmem:[%s4178_s22 + $0x560] sm:$0xff]  ;;  %v589_v51 = vld [vmem:[%s4178_s22 + $0xc48] sm:$0xff] }
  0xc8   : > { %2321 = vmatpush.msrb.mxu2 %v1589_v52  ;;  %2340 = vmatpush.msrb.mxu3 %v1810_v53  ;;  %v1018_v49 = vld [vmem:[%s4178_s22 + $0x19b0] sm:$0xff]  ;;  %v784_v52 = vld [vmem:[%s4178_s22 + $0x1260] sm:$0xff]  ;;  %v1005_v53 = vld [vmem:[%s4178_s22 + $0x1948] sm:$0xff] }
  0xc9   : > { %2282 = vmatpush.msrb.mxu0 %v1160_v54  ;;  %2301 = vmatpush.msrb.mxu1 %v1381_v55  ;;  %v355_v54 = vld [vmem:[%s4178_s22 + $0x4f8] sm:$0xff]  ;;  %v576_v55 = vld [vmem:[%s4178_s22 + $0xbe0] sm:$0xff] }
  0xca   : > { %2322 = vmatpush.msrb.mxu2 %v1576_v56  ;;  %2341 = vmatpush.msrb.mxu3 %v1797_v57  ;;  %v771_v56 = vld [vmem:[%s4178_s22 + $0x11f8] sm:$0xff]  ;;  %v992_v57 = vld [vmem:[%s4178_s22 + $0x18e0] sm:$0xff] }
  0xcb   : > { %2283 = vmatpush.msrb.mxu0 %v1147_v58  ;;  %2302 = vmatpush.msrb.mxu1 %v1368_v59  ;;  %v342_v58 = vld [vmem:[%s4178_s22 + $0x490] sm:$0xff]  ;;  %v563_v59 = vld [vmem:[%s4178_s22 + $0xb78] sm:$0xff] }
  0xcc   : > { %2323 = vmatpush.msrb.mxu2 %v1563_v60  ;;  %2342 = vmatpush.msrb.mxu3 %v1784_v61  ;;  %v758_v60 = vld [vmem:[%s4178_s22 + $0x1190] sm:$0xff]  ;;  %v979_v61 = vld [vmem:[%s4178_s22 + $0x1878] sm:$0xff] }
  0xcd   : > { %2284 = vmatpush.msrb.mxu0 %v1134_v63  ;;  %2303 = vmatpush.msrb.mxu1 %v1355_v0  ;;  %v329_v63 = vld [vmem:[%s4178_s22 + $0x428] sm:$0xff]  ;;  %v550_v0 = vld [vmem:[%s4178_s22 + $0xb10] sm:$0xff] }
  0xce   : > { %2324 = vmatpush.msrb.mxu2 %v1550_v1  ;;  %2343 = vmatpush.msrb.mxu3 %v1771_v3  ;;  %v745_v1 = vld [vmem:[%s4178_s22 + $0x1128] sm:$0xff]  ;;  %v966_v3 = vld [vmem:[%s4178_s22 + $0x1810] sm:$0xff] }
  0xcf   : > { %2285 = vmatpush.msrb.mxu0 %v1121_v5  ;;  %2304 = vmatpush.msrb.mxu1 %v1342_v6  ;;  %v316_v5 = vld [vmem:[%s4178_s22 + $0x3c0] sm:$0xff]  ;;  %v537_v6 = vld [vmem:[%s4178_s22 + $0xaa8] sm:$0xff] }
  0xd0   : > { %2325 = vmatpush.msrb.mxu2 %v1537_v7  ;;  %2344 = vmatpush.msrb.mxu3 %v1758_v9  ;;  %v732_v7 = vld [vmem:[%s4178_s22 + $0x10c0] sm:$0xff]  ;;  %v953_v9 = vld [vmem:[%s4178_s22 + $0x17a8] sm:$0xff] }
  0xd1   : > { %2286 = vmatpush.msrb.mxu0 %v1108_v10  ;;  %2305 = vmatpush.msrb.mxu1 %v1329_v11  ;;  %v303_v10 = vld [vmem:[%s4178_s22 + $0x358] sm:$0xff]  ;;  %v524_v11 = vld [vmem:[%s4178_s22 + $0xa40] sm:$0xff] }
  0xd2   : > { %2326 = vmatpush.msrb.mxu2 %v1524_v12  ;;  %2345 = vmatpush.msrb.mxu3 %v1745_v13  ;;  %v719_v12 = vld [vmem:[%s4178_s22 + $0x1058] sm:$0xff]  ;;  %v940_v13 = vld [vmem:[%s4178_s22 + $0x1740] sm:$0xff] }
  0xd3   : > { %2287 = vmatpush.msrb.mxu0 %v1095_v14  ;;  %2306 = vmatpush.msrb.mxu1 %v1316_v15  ;;  %v290_v14 = vld [vmem:[%s4178_s22 + $0x2f0] sm:$0xff]  ;;  %v511_v15 = vld [vmem:[%s4178_s22 + $0x9d8] sm:$0xff] }
  0xd4   : > { %2327 = vmatpush.msrb.mxu2 %v1511_v16  ;;  %2346 = vmatpush.msrb.mxu3 %v1732_v17  ;;  %v706_v16 = vld [vmem:[%s4178_s22 + $0xff0] sm:$0xff]  ;;  %v927_v17 = vld [vmem:[%s4178_s22 + $0x16d8] sm:$0xff] }
  0xd5   : > { %2288 = vmatpush.msrb.mxu0 %v1082_v19  ;;  %2307 = vmatpush.msrb.mxu1 %v1303_v20  ;;  %v277_v19 = vld [vmem:[%s4178_s22 + $0x288] sm:$0xff]  ;;  %v498_v20 = vld [vmem:[%s4178_s22 + $0x970] sm:$0xff] }
  0xd6   : > { %2328 = vmatpush.msrb.mxu2 %v1498_v21  ;;  %2347 = vmatpush.msrb.mxu3 %v1719_v23  ;;  %v693_v21 = vld [vmem:[%s4178_s22 + $0xf88] sm:$0xff]  ;;  %v914_v23 = vld [vmem:[%s4178_s22 + $0x1670] sm:$0xff] }
  0xd7   : > { %2289 = vmatpush.msrb.mxu0 %v1069_v25  ;;  %2308 = vmatpush.msrb.mxu1 %v1290_v26  ;;  %v264_v25 = vld [vmem:[%s4178_s22 + $0x220] sm:$0xff]  ;;  %v485_v26 = vld [vmem:[%s4178_s22 + $0x908] sm:$0xff] }
  0xd8   : > { %2329 = vmatpush.msrb.mxu2 %v1485_v27  ;;  %2348 = vmatpush.msrb.mxu3 %v1706_v29  ;;  %v680_v27 = vld [vmem:[%s4178_s22 + $0xf20] sm:$0xff]  ;;  %v901_v29 = vld [vmem:[%s4178_s22 + $0x1608] sm:$0xff] }
  0xd9   : > { %2290 = vmatpush.msrb.mxu0 %v1056_v30  ;;  %2309 = vmatpush.msrb.mxu1 %v1277_v31  ;;  %v251_v30 = vld [vmem:[%s4178_s22 + $0x1b8] sm:$0xff]  ;;  %v472_v31 = vld [vmem:[%s4178_s22 + $0x8a0] sm:$0xff] }
  0xda   : > { %2330 = vmatpush.msrb.mxu2 %v1472_v32  ;;  %2349 = vmatpush.msrb.mxu3 %v1693_v33  ;;  %v667_v32 = vld [vmem:[%s4178_s22 + $0xeb8] sm:$0xff]  ;;  %v888_v33 = vld [vmem:[%s4178_s22 + $0x15a0] sm:$0xff] }
  0xdb   : > { %2291 = vmatpush.msrb.mxu0 %v1043_v34  ;;  %2310 = vmatpush.msrb.mxu1 %v1264_v35  ;;  %v238_v34 = vld [vmem:[%s4178_s22 + $0x150] sm:$0xff]  ;;  %v459_v35 = vld [vmem:[%s4178_s22 + $0x838] sm:$0xff] }
  0xdc   : > { %2331 = vmatpush.msrb.mxu2 %v1459_v36  ;;  %2350 = vmatpush.msrb.mxu3 %v1680_v37  ;;  %v654_v36 = vld [vmem:[%s4178_s22 + $0xe50] sm:$0xff]  ;;  %v875_v37 = vld [vmem:[%s4178_s22 + $0x1538] sm:$0xff] }
  0xdd   : > { %2253 = vmatmul.f32.vlgmr.msra.gmra.mxu2 %v4317_v62  ;;  %2292 = vmatpush.msrb.mxu0 %v1030_v38  ;;  %v225_v38 = vld [vmem:[%s4178_s22 + $0xe8] sm:$0xff] }
  0xde   : > { %2311 = vmatpush.msrb.mxu1 %v1251_v39  ;;  %2332 = vmatpush.msrb.mxu2 %v1446_v40  ;;  %v446_v39 = vld [vmem:[%s4178_s22 + $0x7d0] sm:$0xff]  ;;  %v641_v40 = vld [vmem:[%s4178_s22 + $0xde8] sm:$0xff] }
  0xdf   : > { %2351 = vmatpush.msrb.mxu3 %v1667_v41  ;;  %2213 = vmatmul.f32.vlgmr.msra.gmra.mxu0 %v4323_v2  ;;  %v862_v41 = vld [vmem:[%s4178_s22 + $0x14d0] sm:$0xff] }
  0xe0   : > { %2273 = vmatmul.f32.vlgmr.msra.gmra.mxu3 %v4327_v4  ;;  %2357 = vmatpush.msra.mxu0 %v394_v42  ;;  %v212_v42 = vld [vmem:[%s4178_s22 + $0x80] sm:$0xff] }
  0xe1   : > { %2397 = vmatpush.msra.mxu2 %v810_v43  ;;  %2312 = vmatpush.msrb.mxu1 %v1238_v44  ;;  %v433_v43 = vld [vmem:[%s4178_s22 + $0x768] sm:$0xff]  ;;  %v628_v44 = vld [vmem:[%s4178_s22 + $0xd80] sm:$0xff] }
  0xe2   : > { %2352 = vmatpush.msrb.mxu3 %v1654_v45  ;;  %2233 = vmatmul.f32.vlgmr.msra.gmra.mxu1 %v4334_v8  ;;  %v849_v45 = vld [vmem:[%s4178_s22 + $0x1468] sm:$0xff] }
  0xe3   : > { %2358 = vmatpush.msra.mxu0 %v381_v46  ;;  %2377 = vmatpush.msra.mxu1 %v602_v47  ;;  %v199_v46 = vld [vmem:[%s4178_s22 + $0x18] sm:$0xff]  ;;  %v420_v47 = vld [vmem:[%s4178_s22 + $0x700] sm:$0xff] }
  0xe4   : > { %2398 = vmatpush.msra.mxu2 %v797_v48  ;;  %2417 = vmatpush.msra.mxu3 %v1018_v49  ;;  %v615_v48 = vld [vmem:[%s4178_s22 + $0xd18] sm:$0xff]  ;;  %v836_v49 = vld [vmem:[%s4178_s22 + $0x1400] sm:$0xff] }
  0xe5   : > { %2359 = vmatpush.msra.mxu0 %v368_v50  ;;  %2378 = vmatpush.msra.mxu1 %v589_v51  ;;  %v4688_v50 = vpop.f32.mrf.mxu0  ;;  %v1226_v51 = vld [vmem:[%s4178_s22 + $0x2030] sm:$0xff] }
  0xe6   : > { %2399 = vmatpush.msra.mxu2 %v784_v52  ;;  %2418 = vmatpush.msra.mxu3 %v1005_v53  ;;  %v1642_v52 = vld [vmem:[%s4178_s22 + $0x2d30] sm:$0xff]  ;;  %v407_v53 = vld [vmem:[%s4178_s22 + $0x698] sm:$0xff] }
  0xe7   : > { %2333 = vmatmul.f32.vlgmr.msrb.gmra.mxu2 %v4349_v18  ;;  %2360 = vmatpush.msra.mxu0 %v355_v54  ;;  %v823_v54 = vld [vmem:[%s4178_s22 + $0x1398] sm:$0xff] }
  0xe8   : > { %2379 = vmatpush.msra.mxu1 %v576_v55  ;;  %2400 = vmatpush.msra.mxu2 %v771_v56  ;;  %v1213_v55 = vld [vmem:[%s4178_s22 + $0x1fc8] sm:$0xff]  ;;  %v1434_v56 = vld [vmem:[%s4178_s22 + $0x26b0] sm:$0xff] }
  0xe9   : > { %2419 = vmatpush.msra.mxu3 %v992_v57  ;;  %2293 = vmatmul.f32.vlgmr.msrb.gmra.mxu0 %v4355_v22  ;;  %v4696_v57 = vpop.f32.mrf.mxu1 }
  0xea   : > { %2353 = vmatmul.f32.vlgmr.msrb.gmra.mxu3 %v4359_v24  ;;  %2361 = vmatpush.msra.mxu0 %v342_v58  ;;  %v1629_v58 = vld [vmem:[%s4178_s22 + $0x2cc8] sm:$0xff] }
  0xeb   : > { %2380 = vmatpush.msra.mxu1 %v563_v59  ;;  %2401 = vmatpush.msra.mxu2 %v758_v60  ;;  %v1850_v59 = vld [vmem:[%s4178_s22 + $0x33b0] sm:$0xff]  ;;  %v4700_v60 = vpop.f32.mrf.mxu2 }
  0xec   : > { %2420 = vmatpush.msra.mxu3 %v979_v61  ;;  %2313 = vmatmul.f32.vlgmr.msrb.gmra.mxu1 %v4366_v28  ;;  %v1200_v61 = vld [vmem:[%s4178_s22 + $0x1f60] sm:$0xff] }
  0xed   : > { %2362 = vmatpush.msra.mxu0 %v329_v63  ;;  %2381 = vmatpush.msra.mxu1 %v550_v0  ;;  %v1421_v63 = vld [vmem:[%s4178_s22 + $0x2648] sm:$0xff]  ;;  %v1616_v0 = vld [vmem:[%s4178_s22 + $0x2c60] sm:$0xff] }
  0xee   : > { %2402 = vmatpush.msra.mxu2 %v745_v1  ;;  %2421 = vmatpush.msra.mxu3 %v966_v3  ;;  %v1837_v1 = vld [vmem:[%s4178_s22 + $0x3348] sm:$0xff]  ;;  %v1187_v3 = vld [vmem:[%s4178_s22 + $0x1ef8] sm:$0xff] }
  0xef   : > { %2363 = vmatpush.msra.mxu0 %v316_v5  ;;  %2382 = vmatpush.msra.mxu1 %v537_v6  ;;  %v1408_v5 = vld [vmem:[%s4178_s22 + $0x25e0] sm:$0xff]  ;;  %v4708_v6 = vpop.f32.mrf.mxu3 }
  0xf0   : > { %2403 = vmatpush.msra.mxu2 %v732_v7  ;;  %2422 = vmatpush.msra.mxu3 %v953_v9  ;;  %v1603_v7 = vld [vmem:[%s4178_s22 + $0x2bf8] sm:$0xff]  ;;  %v1824_v9 = vld [vmem:[%s4178_s22 + $0x32e0] sm:$0xff] }
  0xf1   : > { %2364 = vmatpush.msra.mxu0 %v303_v10  ;;  %2383 = vmatpush.msra.mxu1 %v524_v11  ;;  %v1174_v10 = vld [vmem:[%s4178_s22 + $0x1e90] sm:$0xff]  ;;  %v1395_v11 = vld [vmem:[%s4178_s22 + $0x2578] sm:$0xff] }
  0xf2   : > { %2404 = vmatpush.msra.mxu2 %v719_v12  ;;  %2423 = vmatpush.msra.mxu3 %v940_v13  ;;  %v1590_v12 = vld [vmem:[%s4178_s22 + $0x2b90] sm:$0xff]  ;;  %v1811_v13 = vld [vmem:[%s4178_s22 + $0x3278] sm:$0xff] }
  0xf3   : > { %2365 = vmatpush.msra.mxu0 %v290_v14  ;;  %2384 = vmatpush.msra.mxu1 %v511_v15  ;;  %v4716_v14 = vpop.f32.mrf.mxu0  ;;  %v1161_v15 = vld [vmem:[%s4178_s22 + $0x1e28] sm:$0xff] }
  0xf4   : > { %2405 = vmatpush.msra.mxu2 %v706_v16  ;;  %2424 = vmatpush.msra.mxu3 %v927_v17  ;;  %v1382_v16 = vld [vmem:[%s4178_s22 + $0x2510] sm:$0xff]  ;;  %v1577_v17 = vld [vmem:[%s4178_s22 + $0x2b28] sm:$0xff] }
  0xf5   : > { %2366 = vmatpush.msra.mxu0 %v277_v19  ;;  %2385 = vmatpush.msra.mxu1 %v498_v20  ;;  %v1798_v19 = vld [vmem:[%s4178_s22 + $0x3210] sm:$0xff]  ;;  %v1148_v20 = vld [vmem:[%s4178_s22 + $0x1dc0] sm:$0xff] }
  0xf6   : > { %2406 = vmatpush.msra.mxu2 %v693_v21  ;;  %2425 = vmatpush.msra.mxu3 %v914_v23  ;;  %v1369_v21 = vld [vmem:[%s4178_s22 + $0x24a8] sm:$0xff]  ;;  %v4724_v23 = vpop.f32.mrf.mxu1 }
  0xf7   : > { %2367 = vmatpush.msra.mxu0 %v264_v25  ;;  %2386 = vmatpush.msra.mxu1 %v485_v26  ;;  %v1564_v25 = vld [vmem:[%s4178_s22 + $0x2ac0] sm:$0xff]  ;;  %v1785_v26 = vld [vmem:[%s4178_s22 + $0x31a8] sm:$0xff] }
  0xf8   : > { %2407 = vmatpush.msra.mxu2 %v680_v27  ;;  %2426 = vmatpush.msra.mxu3 %v901_v29  ;;  %v4728_v27 = vpop.f32.mrf.mxu2  ;;  %v1135_v29 = vld [vmem:[%s4178_s22 + $0x1d58] sm:$0xff] }
  0xf9   : > { %2368 = vmatpush.msra.mxu0 %v251_v30  ;;  %2387 = vmatpush.msra.mxu1 %v472_v31  ;;  %v1356_v30 = vld [vmem:[%s4178_s22 + $0x2440] sm:$0xff]  ;;  %v1551_v31 = vld [vmem:[%s4178_s22 + $0x2a58] sm:$0xff] }
  0xfa   : > { %2408 = vmatpush.msra.mxu2 %v667_v32  ;;  %2427 = vmatpush.msra.mxu3 %v888_v33  ;;  %v1772_v32 = vld [vmem:[%s4178_s22 + $0x3140] sm:$0xff]  ;;  %v1122_v33 = vld [vmem:[%s4178_s22 + $0x1cf0] sm:$0xff] }
  0xfb   : > { %2369 = vmatpush.msra.mxu0 %v238_v34  ;;  %2388 = vmatpush.msra.mxu1 %v459_v35  ;;  %v1343_v34 = vld [vmem:[%s4178_s22 + $0x23d8] sm:$0xff]  ;;  %v4736_v35 = vpop.f32.mrf.mxu3 }
  0xfc   : > { %2409 = vmatpush.msra.mxu2 %v654_v36  ;;  %2428 = vmatpush.msra.mxu3 %v875_v37  ;;  %v1538_v36 = vld [vmem:[%s4178_s22 + $0x29f0] sm:$0xff]  ;;  %v1759_v37 = vld [vmem:[%s4178_s22 + $0x30d8] sm:$0xff] }
  0xfd   : > { %2370 = vmatpush.msra.mxu0 %v225_v38  ;;  %2389 = vmatpush.msra.mxu1 %v446_v39  ;;  %v1109_v38 = vld [vmem:[%s4178_s22 + $0x1c88] sm:$0xff]  ;;  %v1330_v39 = vld [vmem:[%s4178_s22 + $0x2370] sm:$0xff] }
  0xfe   : > { %2410 = vmatpush.msra.mxu2 %v641_v40  ;;  %2429 = vmatpush.msra.mxu3 %v862_v41  ;;  %v1525_v41 = vld [vmem:[%s4178_s22 + $0x2988] sm:$0xff] }
  0xff   : > { %2371 = vmatpush.msra.mxu0 %v212_v42  ;;  %2390 = vmatpush.msra.mxu1 %v433_v43  ;;  %v1746_v42 = vld [vmem:[%s4178_s22 + $0x3070] sm:$0xff]  ;;  %v1096_v43 = vld [vmem:[%s4178_s22 + $0x1c20] sm:$0xff] }
 0x100   : > { %2411 = vmatpush.msra.mxu2 %v628_v44  ;;  %2430 = vmatpush.msra.mxu3 %v849_v45  ;;  %v1317_v44 = vld [vmem:[%s4178_s22 + $0x2308] sm:$0xff]  ;;  %v1512_v45 = vld [vmem:[%s4178_s22 + $0x2920] sm:$0xff] }
 0x101   : > { %2372 = vmatpush.msra.mxu0 %v199_v46  ;;  %2391 = vmatpush.msra.mxu1 %v420_v47  ;;  %v1733_v46 = vld [vmem:[%s4178_s22 + $0x3008] sm:$0xff] }
 0x102   : > { %2412 = vmatpush.msra.mxu2 %v615_v48  ;;  %2431 = vmatpush.msra.mxu3 %v836_v49  ;;  %v1083_v48 = vld [vmem:[%s4178_s22 + $0x1bb8] sm:$0xff]  ;;  %v1304_v49 = vld [vmem:[%s4178_s22 + $0x22a0] sm:$0xff] }
 0x103   : > { %2437 = vmatpush.msrb.mxu0 %v1226_v51  ;;  %2392 = vmatpush.msra.mxu1 %v407_v53  ;;  %v1499_v53 = vld [vmem:[%s4178_s22 + $0x28b8] sm:$0xff] }
 0x104   : > { %2477 = vmatpush.msrb.mxu2 %v1642_v52  ;;  %2432 = vmatpush.msra.mxu3 %v823_v54  ;;  %v1720_v54 = vld [vmem:[%s4178_s22 + $0x2fa0] sm:$0xff] }
 0x105   : > { %2438 = vmatpush.msrb.mxu0 %v1213_v55  ;;  %2457 = vmatpush.msrb.mxu1 %v1434_v56  ;;  %v1070_v55 = vld [vmem:[%s4178_s22 + $0x1b50] sm:$0xff] }
 0x106   : > { %2478 = vmatpush.msrb.mxu2 %v1629_v58  ;;  %2497 = vmatpush.msrb.mxu3 %v1850_v59  ;;  %v1291_v58 = vld [vmem:[%s4178_s22 + $0x2238] sm:$0xff]  ;;  %v1486_v59 = vld [vmem:[%s4178_s22 + $0x2850] sm:$0xff] }
 0x107   : > { %2439 = vmatpush.msrb.mxu0 %v1200_v61  ;;  %2458 = vmatpush.msrb.mxu1 %v1421_v63  ;;  %v1707_v63 = vld [vmem:[%s4178_s22 + $0x2f38] sm:$0xff] }
 0x108   : > { %2479 = vmatpush.msrb.mxu2 %v1616_v0  ;;  %2498 = vmatpush.msrb.mxu3 %v1837_v1  ;;  %v1057_v1 = vld [vmem:[%s4178_s22 + $0x1ae8] sm:$0xff] }
 0x109   : > { %2440 = vmatpush.msrb.mxu0 %v1187_v3  ;;  %2459 = vmatpush.msrb.mxu1 %v1408_v5  ;;  %v1278_v3 = vld [vmem:[%s4178_s22 + $0x21d0] sm:$0xff]  ;;  %v1473_v5 = vld [vmem:[%s4178_s22 + $0x27e8] sm:$0xff] }
 0x10a   : > { %2480 = vmatpush.msrb.mxu2 %v1603_v7  ;;  %2499 = vmatpush.msrb.mxu3 %v1824_v9  ;;  %v1694_v9 = vld [vmem:[%s4178_s22 + $0x2ed0] sm:$0xff] }
 0x10b   : > { %2441 = vmatpush.msrb.mxu0 %v1174_v10  ;;  %2460 = vmatpush.msrb.mxu1 %v1395_v11  ;;  %v1044_v11 = vld [vmem:[%s4178_s22 + $0x1a80] sm:$0xff] }
 0x10c   : > { %2481 = vmatpush.msrb.mxu2 %v1590_v12  ;;  %2500 = vmatpush.msrb.mxu3 %v1811_v13  ;;  %v1265_v12 = vld [vmem:[%s4178_s22 + $0x2168] sm:$0xff]  ;;  %v1460_v13 = vld [vmem:[%s4178_s22 + $0x2780] sm:$0xff] }
 0x10d   : > { %2442 = vmatpush.msrb.mxu0 %v1161_v15  ;;  %2461 = vmatpush.msrb.mxu1 %v1382_v16  ;;  %v1681_v15 = vld [vmem:[%s4178_s22 + $0x2e68] sm:$0xff] }
 0x10e   : > { %2482 = vmatpush.msrb.mxu2 %v1577_v17  ;;  %2501 = vmatpush.msrb.mxu3 %v1798_v19  ;;  %v1031_v17 = vld [vmem:[%s4178_s22 + $0x1a18] sm:$0xff]  ;;  %v1252_v19 = vld [vmem:[%s4178_s22 + $0x2100] sm:$0xff] }
 0x10f   : > { %2443 = vmatpush.msrb.mxu0 %v1148_v20  ;;  %2462 = vmatpush.msrb.mxu1 %v1369_v21 }
 0x110   : > { %2483 = vmatpush.msrb.mxu2 %v1564_v25  ;;  %2502 = vmatpush.msrb.mxu3 %v1785_v26  ;;  %v1447_v25 = vld [vmem:[%s4178_s22 + $0x2718] sm:$0xff]  ;;  %v1668_v26 = vld [vmem:[%s4178_s22 + $0x2e00] sm:$0xff] }
 0x111   : > { %2444 = vmatpush.msrb.mxu0 %v1135_v29  ;;  %2463 = vmatpush.msrb.mxu1 %v1356_v30  ;;  %v395_v29 = vld [vmem:[%s4178_s22 + $0x638] sm:$0xff] }
 0x112   : > { %2484 = vmatpush.msrb.mxu2 %v1551_v31  ;;  %2503 = vmatpush.msrb.mxu3 %v1772_v32  ;;  %v2054_v40 = vpop.f32.mrf.mxu0  ;;  %v811_v31 = vld [vmem:[%s4178_s22 + $0x1338] sm:$0xff] }
 0x113   : > { %2445 = vmatpush.msrb.mxu0 %v1122_v33  ;;  %2464 = vmatpush.msrb.mxu1 %v1343_v34  ;;  %v1239_v32 = vld [vmem:[%s4178_s22 + $0x2098] sm:$0xff] }
 0x114   : > { %2485 = vmatpush.msrb.mxu2 %v1538_v36  ;;  %2504 = vmatpush.msrb.mxu3 %v1759_v37  ;;  %v1655_v34 = vld [vmem:[%s4178_s22 + $0x2d98] sm:$0xff]  ;;  %v382_v37 = vld [vmem:[%s4178_s22 + $0x5d0] sm:$0xff] }
 0x115   : > { %2446 = vmatpush.msrb.mxu0 %v1109_v38  ;;  %2465 = vmatpush.msrb.mxu1 %v1330_v39  ;;  %v2074_v47 = vpop.f32.mrf.mxu1  ;;  %v603_v38 = vld [vmem:[%s4178_s22 + $0xcb8] sm:$0xff]  ;;  %v798_v39 = vld [vmem:[%s4178_s22 + $0x12d0] sm:$0xff] }
 0x116   : > { %2486 = vmatpush.msrb.mxu2 %v1525_v41  ;;  %2505 = vmatpush.msrb.mxu3 %v1746_v42  ;;  %v2075_v51 = vadd.f32 %v2074_v47, %v2054_v40  ;;  %v2094_v52 = vpop.f32.mrf.mxu2  ;;  %v1019_v40 = vld [vmem:[%s4178_s22 + $0x19b8] sm:$0xff]  ;;  %v369_v41 = vld [vmem:[%s4178_s22 + $0x568] sm:$0xff]  ;;  %v590_v42 = vld [vmem:[%s4178_s22 + $0xc50] sm:$0xff] }
 0x117   : > { %2447 = vmatpush.msrb.mxu0 %v1096_v43  ;;  %2466 = vmatpush.msrb.mxu1 %v1317_v44  ;;  %v785_v43 = vld [vmem:[%s4178_s22 + $0x1268] sm:$0xff]  ;;  %v1006_v44 = vld [vmem:[%s4178_s22 + $0x1950] sm:$0xff]  ;;  %v772_v47 = vld [vmem:[%s4178_s22 + $0x1200] sm:$0xff] }
 0x118   : > { %2487 = vmatpush.msrb.mxu2 %v1512_v45  ;;  %2506 = vmatpush.msrb.mxu3 %v1733_v46  ;;  %v2095_v56 = vadd.f32 %v2094_v52, %v2075_v51  ;;  %v356_v45 = vld [vmem:[%s4178_s22 + $0x500] sm:$0xff]  ;;  %v577_v46 = vld [vmem:[%s4178_s22 + $0xbe8] sm:$0xff]  ;;  %v759_v52 = vld [vmem:[%s4178_s22 + $0x1198] sm:$0xff] }
 0x119   : > { %2448 = vmatpush.msrb.mxu0 %v1083_v48  ;;  %2467 = vmatpush.msrb.mxu1 %v1304_v49  ;;  %v2114_v61 = vpop.f32.mrf.mxu3  ;;  %v993_v48 = vld [vmem:[%s4178_s22 + $0x18e8] sm:$0xff]  ;;  %v343_v49 = vld [vmem:[%s4178_s22 + $0x498] sm:$0xff]  ;;  %v564_v51 = vld [vmem:[%s4178_s22 + $0xb80] sm:$0xff] }
 0x11a   : > { %2488 = vmatpush.msrb.mxu2 %v1499_v53  ;;  %2507 = vmatpush.msrb.mxu3 %v1720_v54  ;;  %v2115_v0 = vadd.f32 %v2114_v61, %v2095_v56  ;;  %v980_v53 = vld [vmem:[%s4178_s22 + $0x1880] sm:$0xff]  ;;  %v330_v54 = vld [vmem:[%s4178_s22 + $0x430] sm:$0xff] }
 0x11b   : > { %2413 = vmatmul.f32.vlgmr.msra.gmra.mxu2 %v4317_v62  ;;  %2449 = vmatpush.msrb.mxu0 %v1070_v55  ;;  %v551_v55 = vld [vmem:[%s4178_s22 + $0xb18] sm:$0xff]  ;;  %v746_v56 = vld [vmem:[%s4178_s22 + $0x1130] sm:$0xff] }
 0x11c   : > { %2468 = vmatpush.msrb.mxu1 %v1291_v58  ;;  %2489 = vmatpush.msrb.mxu2 %v1486_v59  ;;  %v2134_v7 = vpop.f32.mrf.mxu0  ;;  %v967_v58 = vld [vmem:[%s4178_s22 + $0x1818] sm:$0xff]  ;;  %v317_v59 = vld [vmem:[%s4178_s22 + $0x3c8] sm:$0xff]  ;;  %v538_v61 = vld [vmem:[%s4178_s22 + $0xab0] sm:$0xff] }
 0x11d   : > { %2508 = vmatpush.msrb.mxu3 %v1707_v63  ;;  %2373 = vmatmul.f32.vlgmr.msra.gmra.mxu0 %v4323_v2  ;;  %v2135_v10 = vadd.f32 %v2134_v7, %v2115_v0  ;;  %v733_v63 = vld [vmem:[%s4178_s22 + $0x10c8] sm:$0xff]  ;;  %v954_v0 = vld [vmem:[%s4178_s22 + $0x17b0] sm:$0xff] }
 0x11e   : > { %2433 = vmatmul.f32.vlgmr.msra.gmra.mxu3 %v4327_v4  ;;  %2450 = vmatpush.msrb.mxu0 %v1057_v1  ;;  %v304_v1 = vld [vmem:[%s4178_s22 + $0x360] sm:$0xff]  ;;  %v941_v7 = vld [vmem:[%s4178_s22 + $0x1748] sm:$0xff] }
 0x11f   : > { %2469 = vmatpush.msrb.mxu1 %v1278_v3  ;;  %2490 = vmatpush.msrb.mxu2 %v1473_v5  ;;  %v2154_v16 = vpop.f32.mrf.mxu1  ;;  %v525_v3 = vld [vmem:[%s4178_s22 + $0xa48] sm:$0xff]  ;;  %v720_v5 = vld [vmem:[%s4178_s22 + $0x1060] sm:$0xff] }
 0x120   : > { %2509 = vmatpush.msrb.mxu3 %v1694_v9  ;;  %2393 = vmatmul.f32.vlgmr.msra.gmra.mxu1 %v4334_v8  ;;  %v2155_v20 = vadd.f32 %v2154_v16, %v2135_v10  ;;  %v2174_v21 = vpop.f32.mrf.mxu2  ;;  %v291_v9 = vld [vmem:[%s4178_s22 + $0x2f8] sm:$0xff]  ;;  %v512_v10 = vld [vmem:[%s4178_s22 + $0x9e0] sm:$0xff]  ;;  %v694_v16 = vld [vmem:[%s4178_s22 + $0xf90] sm:$0xff] }
 0x121   : > { %2451 = vmatpush.msrb.mxu0 %v1044_v11  ;;  %2470 = vmatpush.msrb.mxu1 %v1265_v12  ;;  %v707_v11 = vld [vmem:[%s4178_s22 + $0xff8] sm:$0xff]  ;;  %v928_v12 = vld [vmem:[%s4178_s22 + $0x16e0] sm:$0xff] }
 0x122   : > { %2491 = vmatpush.msrb.mxu2 %v1460_v13  ;;  %2510 = vmatpush.msrb.mxu3 %v1681_v15  ;;  %v2175_v30 = vadd.f32 %v2174_v21, %v2155_v20  ;;  %v278_v13 = vld [vmem:[%s4178_s22 + $0x290] sm:$0xff]  ;;  %v499_v15 = vld [vmem:[%s4178_s22 + $0x978] sm:$0xff]  ;;  %v681_v21 = vld [vmem:[%s4178_s22 + $0xf28] sm:$0xff] }
 0x123   : > { %2452 = vmatpush.msrb.mxu0 %v1031_v17  ;;  %2471 = vmatpush.msrb.mxu1 %v1252_v19  ;;  %v2194_v33 = vpop.f32.mrf.mxu3  ;;  %v915_v17 = vld [vmem:[%s4178_s22 + $0x1678] sm:$0xff]  ;;  %v265_v19 = vld [vmem:[%s4178_s22 + $0x228] sm:$0xff]  ;;  %v486_v20 = vld [vmem:[%s4178_s22 + $0x910] sm:$0xff] }
 0x124   : > { %2492 = vmatpush.msrb.mxu2 %v1447_v25  ;;  %2511 = vmatpush.msrb.mxu3 %v1668_v26  ;;  %v4776_v36 = vadd.f32 %v2194_v33, %v2175_v30  ;;  %v902_v25 = vld [vmem:[%s4178_s22 + $0x1610] sm:$0xff]  ;;  %v252_v26 = vld [vmem:[%s4178_s22 + $0x1c0] sm:$0xff] }
 0x125   : > { %2493 = vmatmul.f32.vlgmr.msrb.gmra.mxu2 %v4349_v18  ;;  %2517 = vmatpush.msra.mxu0 %v395_v29  ;;  %v473_v29 = vld [vmem:[%s4178_s22 + $0x8a8] sm:$0xff]  ;;  %v668_v30 = vld [vmem:[%s4178_s22 + $0xec0] sm:$0xff] }
 0x126   : > { %2557 = vmatpush.msra.mxu2 %v811_v31  ;;  %2472 = vmatpush.msrb.mxu1 %v1239_v32  ;;  %v889_v31 = vld [vmem:[%s4178_s22 + $0x15a8] sm:$0xff]  ;;  %v239_v32 = vld [vmem:[%s4178_s22 + $0x158] sm:$0xff]  ;;  %v460_v33 = vld [vmem:[%s4178_s22 + $0x840] sm:$0xff] }
 0x127   : > { %2512 = vmatpush.msrb.mxu3 %v1655_v34  ;;  %2453 = vmatmul.f32.vlgmr.msrb.gmra.mxu0 %v4355_v22  ;;  %v655_v34 = vld [vmem:[%s4178_s22 + $0xe58] sm:$0xff] }
 0x128   : > { %2513 = vmatmul.f32.vlgmr.msrb.gmra.mxu3 %v4359_v24  ;;  %2518 = vmatpush.msra.mxu0 %v382_v37  ;;  %v876_v37 = vld [vmem:[%s4178_s22 + $0x1540] sm:$0xff] }
 0x129   : > { %2537 = vmatpush.msra.mxu1 %v603_v38  ;;  %2558 = vmatpush.msra.mxu2 %v798_v39  ;;  %v226_v38 = vld [vmem:[%s4178_s22 + $0xf0] sm:$0xff]  ;;  %v447_v39 = vld [vmem:[%s4178_s22 + $0x7d8] sm:$0xff] }
 0x12a   : > { %2577 = vmatpush.msra.mxu3 %v1019_v40  ;;  %2473 = vmatmul.f32.vlgmr.msrb.gmra.mxu1 %v4366_v28  ;;  %v642_v40 = vld [vmem:[%s4178_s22 + $0xdf0] sm:$0xff] }
 0x12b   : > { %2519 = vmatpush.msra.mxu0 %v369_v41  ;;  %2538 = vmatpush.msra.mxu1 %v590_v42  ;;  %v863_v41 = vld [vmem:[%s4178_s22 + $0x14d8] sm:$0xff]  ;;  %v213_v42 = vld [vmem:[%s4178_s22 + $0x88] sm:$0xff] }
 0x12c   : > { %2559 = vmatpush.msra.mxu2 %v785_v43  ;;  %2578 = vmatpush.msra.mxu3 %v1006_v44  ;;  %v434_v43 = vld [vmem:[%s4178_s22 + $0x770] sm:$0xff]  ;;  %v629_v44 = vld [vmem:[%s4178_s22 + $0xd88] sm:$0xff] }
 0x12d   : > { %2520 = vmatpush.msra.mxu0 %v356_v45  ;;  %2539 = vmatpush.msra.mxu1 %v577_v46  ;;  %v850_v45 = vld [vmem:[%s4178_s22 + $0x1470] sm:$0xff]  ;;  %v200_v46 = vld [vmem:[%s4178_s22 + $0x20] sm:$0xff] }
 0x12e   : > { %2560 = vmatpush.msra.mxu2 %v772_v47  ;;  %2579 = vmatpush.msra.mxu3 %v993_v48  ;;  %v421_v47 = vld [vmem:[%s4178_s22 + $0x708] sm:$0xff]  ;;  %v616_v48 = vld [vmem:[%s4178_s22 + $0xd20] sm:$0xff] }
 0x12f   : > { %2521 = vmatpush.msra.mxu0 %v343_v49  ;;  %2540 = vmatpush.msra.mxu1 %v564_v51  ;;  %v837_v49 = vld [vmem:[%s4178_s22 + $0x1408] sm:$0xff]  ;;  %v1227_v51 = vld [vmem:[%s4178_s22 + $0x2038] sm:$0xff] }
 0x130   : > { %2561 = vmatpush.msra.mxu2 %v759_v52  ;;  %2580 = vmatpush.msra.mxu3 %v980_v53  ;;  %v1643_v52 = vld [vmem:[%s4178_s22 + $0x2d38] sm:$0xff]  ;;  %v408_v53 = vld [vmem:[%s4178_s22 + $0x6a0] sm:$0xff] }
 0x131   : > { %2522 = vmatpush.msra.mxu0 %v330_v54  ;;  %2541 = vmatpush.msra.mxu1 %v551_v55  ;;  %v824_v54 = vld [vmem:[%s4178_s22 + $0x13a0] sm:$0xff]  ;;  %v1214_v55 = vld [vmem:[%s4178_s22 + $0x1fd0] sm:$0xff] }
 0x132   : > { %2562 = vmatpush.msra.mxu2 %v746_v56  ;;  %2581 = vmatpush.msra.mxu3 %v967_v58  ;;  %v1435_v56 = vld [vmem:[%s4178_s22 + $0x26b8] sm:$0xff]  ;;  %v1630_v58 = vld [vmem:[%s4178_s22 + $0x2cd0] sm:$0xff] }
 0x133   : > { %2523 = vmatpush.msra.mxu0 %v317_v59  ;;  %2542 = vmatpush.msra.mxu1 %v538_v61  ;;  %v1851_v59 = vld [vmem:[%s4178_s22 + $0x33b8] sm:$0xff]  ;;  %v1201_v61 = vld [vmem:[%s4178_s22 + $0x1f68] sm:$0xff] }
 0x134   : > { %2563 = vmatpush.msra.mxu2 %v733_v63  ;;  %2582 = vmatpush.msra.mxu3 %v954_v0  ;;  %v1422_v63 = vld [vmem:[%s4178_s22 + $0x2650] sm:$0xff]  ;;  %v1617_v0 = vld [vmem:[%s4178_s22 + $0x2c68] sm:$0xff] }
 0x135   : > { %2524 = vmatpush.msra.mxu0 %v304_v1  ;;  %2543 = vmatpush.msra.mxu1 %v525_v3  ;;  %v1838_v1 = vld [vmem:[%s4178_s22 + $0x3350] sm:$0xff]  ;;  %v1188_v3 = vld [vmem:[%s4178_s22 + $0x1f00] sm:$0xff] }
 0x136   : > { %2564 = vmatpush.msra.mxu2 %v720_v5  ;;  %2583 = vmatpush.msra.mxu3 %v941_v7  ;;  %v1409_v5 = vld [vmem:[%s4178_s22 + $0x25e8] sm:$0xff]  ;;  %v1604_v7 = vld [vmem:[%s4178_s22 + $0x2c00] sm:$0xff] }
 0x137   : > { %2525 = vmatpush.msra.mxu0 %v291_v9  ;;  %2544 = vmatpush.msra.mxu1 %v512_v10  ;;  %v1825_v9 = vld [vmem:[%s4178_s22 + $0x32e8] sm:$0xff]  ;;  %v1175_v10 = vld [vmem:[%s4178_s22 + $0x1e98] sm:$0xff] }
 0x138   : > { %2565 = vmatpush.msra.mxu2 %v707_v11  ;;  %2584 = vmatpush.msra.mxu3 %v928_v12  ;;  %v1396_v11 = vld [vmem:[%s4178_s22 + $0x2580] sm:$0xff]  ;;  %v1591_v12 = vld [vmem:[%s4178_s22 + $0x2b98] sm:$0xff] }
 0x139   : > { %2526 = vmatpush.msra.mxu0 %v278_v13  ;;  %2545 = vmatpush.msra.mxu1 %v499_v15  ;;  %v1812_v13 = vld [vmem:[%s4178_s22 + $0x3280] sm:$0xff]  ;;  %v1162_v15 = vld [vmem:[%s4178_s22 + $0x1e30] sm:$0xff] }
 0x13a   : > { %2566 = vmatpush.msra.mxu2 %v694_v16  ;;  %2585 = vmatpush.msra.mxu3 %v915_v17  ;;  %v1383_v16 = vld [vmem:[%s4178_s22 + $0x2518] sm:$0xff]  ;;  %v1578_v17 = vld [vmem:[%s4178_s22 + $0x2b30] sm:$0xff] }
 0x13b   : > { %2527 = vmatpush.msra.mxu0 %v265_v19  ;;  %2546 = vmatpush.msra.mxu1 %v486_v20  ;;  %v1799_v19 = vld [vmem:[%s4178_s22 + $0x3218] sm:$0xff]  ;;  %v1149_v20 = vld [vmem:[%s4178_s22 + $0x1dc8] sm:$0xff] }
 0x13c   : > { %2567 = vmatpush.msra.mxu2 %v681_v21  ;;  %2586 = vmatpush.msra.mxu3 %v902_v25  ;;  %v1370_v21 = vld [vmem:[%s4178_s22 + $0x24b0] sm:$0xff]  ;;  %v1565_v25 = vld [vmem:[%s4178_s22 + $0x2ac8] sm:$0xff] }
 0x13d   : > { %2528 = vmatpush.msra.mxu0 %v252_v26  ;;  %2547 = vmatpush.msra.mxu1 %v473_v29  ;;  %v1786_v26 = vld [vmem:[%s4178_s22 + $0x31b0] sm:$0xff]  ;;  %v1136_v29 = vld [vmem:[%s4178_s22 + $0x1d60] sm:$0xff] }
 0x13e   : > { %2568 = vmatpush.msra.mxu2 %v668_v30  ;;  %2587 = vmatpush.msra.mxu3 %v889_v31  ;;  %v1357_v30 = vld [vmem:[%s4178_s22 + $0x2448] sm:$0xff]  ;;  %v1552_v31 = vld [vmem:[%s4178_s22 + $0x2a60] sm:$0xff] }
 0x13f   : > { %2529 = vmatpush.msra.mxu0 %v239_v32  ;;  %2548 = vmatpush.msra.mxu1 %v460_v33  ;;  %v1773_v32 = vld [vmem:[%s4178_s22 + $0x3148] sm:$0xff]  ;;  %v1123_v33 = vld [vmem:[%s4178_s22 + $0x1cf8] sm:$0xff] }
 0x140   : > { %2569 = vmatpush.msra.mxu2 %v655_v34  ;;  %2588 = vmatpush.msra.mxu3 %v876_v37  ;;  %v1344_v34 = vld [vmem:[%s4178_s22 + $0x23e0] sm:$0xff]  ;;  %v1539_v37 = vld [vmem:[%s4178_s22 + $0x29f8] sm:$0xff] }
 0x141   : > { %2530 = vmatpush.msra.mxu0 %v226_v38  ;;  %2549 = vmatpush.msra.mxu1 %v447_v39  ;;  %v1760_v38 = vld [vmem:[%s4178_s22 + $0x30e0] sm:$0xff]  ;;  %v1110_v39 = vld [vmem:[%s4178_s22 + $0x1c90] sm:$0xff] }
 0x142   : > { %2570 = vmatpush.msra.mxu2 %v642_v40  ;;  %2589 = vmatpush.msra.mxu3 %v863_v41  ;;  %v1331_v40 = vld [vmem:[%s4178_s22 + $0x2378] sm:$0xff]  ;;  %v1526_v41 = vld [vmem:[%s4178_s22 + $0x2990] sm:$0xff] }
 0x143   : > { %2531 = vmatpush.msra.mxu0 %v213_v42  ;;  %2550 = vmatpush.msra.mxu1 %v434_v43  ;;  %v1747_v42 = vld [vmem:[%s4178_s22 + $0x3078] sm:$0xff]  ;;  %v1097_v43 = vld [vmem:[%s4178_s22 + $0x1c28] sm:$0xff] }
 0x144   : > { %2571 = vmatpush.msra.mxu2 %v629_v44  ;;  %2590 = vmatpush.msra.mxu3 %v850_v45  ;;  %v1318_v44 = vld [vmem:[%s4178_s22 + $0x2310] sm:$0xff]  ;;  %v1513_v45 = vld [vmem:[%s4178_s22 + $0x2928] sm:$0xff] }
 0x145   : > { %2532 = vmatpush.msra.mxu0 %v200_v46  ;;  %2551 = vmatpush.msra.mxu1 %v421_v47  ;;  %v1734_v46 = vld [vmem:[%s4178_s22 + $0x3010] sm:$0xff]  ;;  %v1084_v47 = vld [vmem:[%s4178_s22 + $0x1bc0] sm:$0xff] }
 0x146   : > { %2572 = vmatpush.msra.mxu2 %v616_v48  ;;  %2591 = vmatpush.msra.mxu3 %v837_v49  ;;  %v1305_v48 = vld [vmem:[%s4178_s22 + $0x22a8] sm:$0xff]  ;;  %v1500_v49 = vld [vmem:[%s4178_s22 + $0x28c0] sm:$0xff] }
 0x147   : > { %2597 = vmatpush.msrb.mxu0 %v1227_v51  ;;  %2552 = vmatpush.msra.mxu1 %v408_v53  ;;  %v1721_v51 = vld [vmem:[%s4178_s22 + $0x2fa8] sm:$0xff]  ;;  %v1292_v53 = vld [vmem:[%s4178_s22 + $0x2240] sm:$0xff] }
 0x148   : > { %2637 = vmatpush.msrb.mxu2 %v1643_v52  ;;  %2592 = vmatpush.msra.mxu3 %v824_v54  ;;  %v1071_v52 = vld [vmem:[%s4178_s22 + $0x1b58] sm:$0xff] }
 0x149   : > { %2598 = vmatpush.msrb.mxu0 %v1214_v55  ;;  %2617 = vmatpush.msrb.mxu1 %v1435_v56  ;;  %v1487_v55 = vld [vmem:[%s4178_s22 + $0x2858] sm:$0xff]  ;;  %v1708_v56 = vld [vmem:[%s4178_s22 + $0x2f40] sm:$0xff] }
 0x14a   : > { %2638 = vmatpush.msrb.mxu2 %v1630_v58  ;;  %2657 = vmatpush.msrb.mxu3 %v1851_v59  ;;  %v1058_v58 = vld [vmem:[%s4178_s22 + $0x1af0] sm:$0xff]  ;;  %v1279_v59 = vld [vmem:[%s4178_s22 + $0x21d8] sm:$0xff] }
 0x14b   : > { %2599 = vmatpush.msrb.mxu0 %v1201_v61  ;;  %2618 = vmatpush.msrb.mxu1 %v1422_v63  ;;  %v1474_v61 = vld [vmem:[%s4178_s22 + $0x27f0] sm:$0xff]  ;;  %v1695_v63 = vld [vmem:[%s4178_s22 + $0x2ed8] sm:$0xff] }
 0x14c   : > { %2639 = vmatpush.msrb.mxu2 %v1617_v0  ;;  %2658 = vmatpush.msrb.mxu3 %v1838_v1  ;;  %v1045_v1 = vld [vmem:[%s4178_s22 + $0x1a88] sm:$0xff] }
 0x14d   : > { %2600 = vmatpush.msrb.mxu0 %v1188_v3  ;;  %2619 = vmatpush.msrb.mxu1 %v1409_v5  ;;  %v1266_v3 = vld [vmem:[%s4178_s22 + $0x2170] sm:$0xff] }
 0x14e   : > { %2640 = vmatpush.msrb.mxu2 %v1604_v7  ;;  %2659 = vmatpush.msrb.mxu3 %v1825_v9  ;;  %v1461_v9 = vld [vmem:[%s4178_s22 + $0x2788] sm:$0xff] }
 0x14f   : > { %2601 = vmatpush.msrb.mxu0 %v1175_v10  ;;  %2620 = vmatpush.msrb.mxu1 %v1396_v11  ;;  %v1682_v10 = vld [vmem:[%s4178_s22 + $0x2e70] sm:$0xff]  ;;  %v1032_v11 = vld [vmem:[%s4178_s22 + $0x1a20] sm:$0xff] }
 0x150   : > { %2641 = vmatpush.msrb.mxu2 %v1591_v12  ;;  %2660 = vmatpush.msrb.mxu3 %v1812_v13  ;;  %v1253_v13 = vld [vmem:[%s4178_s22 + $0x2108] sm:$0xff] }
 0x151   : > { %2602 = vmatpush.msrb.mxu0 %v1162_v15  ;;  %2621 = vmatpush.msrb.mxu1 %v1383_v16  ;;  %v1448_v15 = vld [vmem:[%s4178_s22 + $0x2720] sm:$0xff] }
 0x152   : > { %2642 = vmatpush.msrb.mxu2 %v1578_v17  ;;  %2661 = vmatpush.msrb.mxu3 %v1799_v19  ;;  %v1669_v17 = vld [vmem:[%s4178_s22 + $0x2e08] sm:$0xff] }
 0x153   : > { %2603 = vmatpush.msrb.mxu0 %v1149_v20  ;;  %2622 = vmatpush.msrb.mxu1 %v1370_v21  ;;  %v396_v20 = vld [vmem:[%s4178_s22 + $0x640] sm:$0xff] }
 0x154   : > { %2643 = vmatpush.msrb.mxu2 %v1565_v25  ;;  %2662 = vmatpush.msrb.mxu3 %v1786_v26  ;;  %v812_v21 = vld [vmem:[%s4178_s22 + $0x1340] sm:$0xff] }
 0x155   : > { %2604 = vmatpush.msrb.mxu0 %v1136_v29  ;;  %2623 = vmatpush.msrb.mxu1 %v1357_v30  ;;  %v1240_v25 = vld [vmem:[%s4178_s22 + $0x20a0] sm:$0xff] }
 0x156   : > { %2644 = vmatpush.msrb.mxu2 %v1552_v31  ;;  %2663 = vmatpush.msrb.mxu3 %v1773_v32  ;;  %v1656_v29 = vld [vmem:[%s4178_s22 + $0x2da0] sm:$0xff]  ;;  %v383_v31 = vld [vmem:[%s4178_s22 + $0x5d8] sm:$0xff] }
 0x157   : > { %2605 = vmatpush.msrb.mxu0 %v1123_v33  ;;  %2624 = vmatpush.msrb.mxu1 %v1344_v34  ;;  %v604_v32 = vld [vmem:[%s4178_s22 + $0xcc0] sm:$0xff]  ;;  %v799_v33 = vld [vmem:[%s4178_s22 + $0x12d8] sm:$0xff] }
 0x158   : > { %2645 = vmatpush.msrb.mxu2 %v1539_v37  ;;  %2664 = vmatpush.msrb.mxu3 %v1760_v38  ;;  %v1020_v34 = vld [vmem:[%s4178_s22 + $0x19c0] sm:$0xff]  ;;  %v370_v38 = vld [vmem:[%s4178_s22 + $0x570] sm:$0xff] }
 0x159   : > { %2606 = vmatpush.msrb.mxu0 %v1110_v39  ;;  %2625 = vmatpush.msrb.mxu1 %v1331_v40  ;;  %v591_v39 = vld [vmem:[%s4178_s22 + $0xc58] sm:$0xff] }
 0x15a   : > { %2646 = vmatpush.msrb.mxu2 %v1526_v41  ;;  %2665 = vmatpush.msrb.mxu3 %v1747_v42  ;;  %v786_v42 = vld [vmem:[%s4178_s22 + $0x1270] sm:$0xff] }
 0x15b   : > { %2607 = vmatpush.msrb.mxu0 %v1097_v43  ;;  %2626 = vmatpush.msrb.mxu1 %v1318_v44  ;;  %v1007_v43 = vld [vmem:[%s4178_s22 + $0x1958] sm:$0xff]  ;;  %v357_v44 = vld [vmem:[%s4178_s22 + $0x508] sm:$0xff] }
 0x15c   : > { %2647 = vmatpush.msrb.mxu2 %v1513_v45  ;;  %2666 = vmatpush.msrb.mxu3 %v1734_v46  ;;  %v2214_v54 = vpop.f32.mrf.mxu0  ;;  %v578_v46 = vld [vmem:[%s4178_s22 + $0xbf0] sm:$0xff] }
 0x15d   : > { %2608 = vmatpush.msrb.mxu0 %v1084_v47  ;;  %2627 = vmatpush.msrb.mxu1 %v1305_v48  ;;  %v773_v47 = vld [vmem:[%s4178_s22 + $0x1208] sm:$0xff] }
 0x15e   : > { %2648 = vmatpush.msrb.mxu2 %v1500_v49  ;;  %2667 = vmatpush.msrb.mxu3 %v1721_v51  ;;  %v994_v49 = vld [vmem:[%s4178_s22 + $0x18f0] sm:$0xff] }
 0x15f   : > { %2609 = vmatpush.msrb.mxu0 %v1071_v52  ;;  %2628 = vmatpush.msrb.mxu1 %v1292_v53  ;;  %v2234_v0 = vpop.f32.mrf.mxu1  ;;  %v344_v52 = vld [vmem:[%s4178_s22 + $0x4a0] sm:$0xff]  ;;  %v565_v53 = vld [vmem:[%s4178_s22 + $0xb88] sm:$0xff] }
 0x160   : > { %2649 = vmatpush.msrb.mxu2 %v1487_v55  ;;  %2668 = vmatpush.msrb.mxu3 %v1708_v56  ;;  %v2235_v5 = vadd.f32 %v2234_v0, %v2214_v54  ;;  %v2254_v7 = vpop.f32.mrf.mxu2  ;;  %v760_v54 = vld [vmem:[%s4178_s22 + $0x11a0] sm:$0xff]  ;;  %v981_v55 = vld [vmem:[%s4178_s22 + $0x1888] sm:$0xff]  ;;  %v331_v56 = vld [vmem:[%s4178_s22 + $0x438] sm:$0xff] }
 0x161   : > { %2610 = vmatpush.msrb.mxu0 %v1058_v58  ;;  %2629 = vmatpush.msrb.mxu1 %v1279_v59  ;;  %v552_v58 = vld [vmem:[%s4178_s22 + $0xb20] sm:$0xff]  ;;  %v747_v59 = vld [vmem:[%s4178_s22 + $0x1138] sm:$0xff] }
 0x162   : > { %2650 = vmatpush.msrb.mxu2 %v1474_v61  ;;  %2669 = vmatpush.msrb.mxu3 %v1695_v63  ;;  %v2255_v12 = vadd.f32 %v2254_v7, %v2235_v5  ;;  %v968_v61 = vld [vmem:[%s4178_s22 + $0x1820] sm:$0xff]  ;;  %v318_v63 = vld [vmem:[%s4178_s22 + $0x3d0] sm:$0xff]  ;;  %v539_v0 = vld [vmem:[%s4178_s22 + $0xab8] sm:$0xff] }
 0x163   : > { %2611 = vmatpush.msrb.mxu0 %v1045_v1  ;;  %2630 = vmatpush.msrb.mxu1 %v1266_v3  ;;  %v2274_v16 = vpop.f32.mrf.mxu3  ;;  %v734_v1 = vld [vmem:[%s4178_s22 + $0x10d0] sm:$0xff]  ;;  %v955_v3 = vld [vmem:[%s4178_s22 + $0x17b8] sm:$0xff]  ;;  %v305_v5 = vld [vmem:[%s4178_s22 + $0x368] sm:$0xff] }
 0x164   : > { %2651 = vmatpush.msrb.mxu2 %v1461_v9  ;;  %2670 = vmatpush.msrb.mxu3 %v1682_v10  ;;  %v2275_v19 = vadd.f32 %v2274_v16, %v2255_v12  ;;  %v526_v7 = vld [vmem:[%s4178_s22 + $0xa50] sm:$0xff]  ;;  %v721_v9 = vld [vmem:[%s4178_s22 + $0x1068] sm:$0xff]  ;;  %v279_v16 = vld [vmem:[%s4178_s22 + $0x298] sm:$0xff] }
 0x165   : > { %2573 = vmatmul.f32.vlgmr.msra.gmra.mxu2 %v4317_v62  ;;  %2612 = vmatpush.msrb.mxu0 %v1032_v11  ;;  %v942_v10 = vld [vmem:[%s4178_s22 + $0x1750] sm:$0xff]  ;;  %v292_v11 = vld [vmem:[%s4178_s22 + $0x300] sm:$0xff]  ;;  %v513_v12 = vld [vmem:[%s4178_s22 + $0x9e8] sm:$0xff] }
 0x166   : > { %2631 = vmatpush.msrb.mxu1 %v1253_v13  ;;  %2652 = vmatpush.msrb.mxu2 %v1448_v15  ;;  %v2294_v26 = vpop.f32.mrf.mxu0  ;;  %v708_v13 = vld [vmem:[%s4178_s22 + $0x1000] sm:$0xff]  ;;  %v929_v15 = vld [vmem:[%s4178_s22 + $0x16e8] sm:$0xff] }
 0x167   : > { %2671 = vmatpush.msrb.mxu3 %v1669_v17  ;;  %2533 = vmatmul.f32.vlgmr.msra.gmra.mxu0 %v4323_v2  ;;  %v2295_v30 = vadd.f32 %v2294_v26, %v2275_v19  ;;  %v500_v17 = vld [vmem:[%s4178_s22 + $0x980] sm:$0xff]  ;;  %v695_v19 = vld [vmem:[%s4178_s22 + $0xf98] sm:$0xff]  ;;  %v682_v26 = vld [vmem:[%s4178_s22 + $0xf30] sm:$0xff] }
 0x168   : > { %2593 = vmatmul.f32.vlgmr.msra.gmra.mxu3 %v4327_v4  ;;  %2677 = vmatpush.msra.mxu0 %v396_v20  ;;  %v916_v20 = vld [vmem:[%s4178_s22 + $0x1680] sm:$0xff] }
 0x169   : > { %2717 = vmatpush.msra.mxu2 %v812_v21  ;;  %2632 = vmatpush.msrb.mxu1 %v1240_v25  ;;  %v2314_v37 = vpop.f32.mrf.mxu1  ;;  %v266_v21 = vld [vmem:[%s4178_s22 + $0x230] sm:$0xff]  ;;  %v487_v25 = vld [vmem:[%s4178_s22 + $0x918] sm:$0xff] }
 0x16a   : > { %2672 = vmatpush.msrb.mxu3 %v1656_v29  ;;  %2553 = vmatmul.f32.vlgmr.msra.gmra.mxu1 %v4334_v8  ;;  %v2315_v40 = vadd.f32 %v2314_v37, %v2295_v30  ;;  %v2334_v41 = vpop.f32.mrf.mxu2  ;;  %v903_v29 = vld [vmem:[%s4178_s22 + $0x1618] sm:$0xff]  ;;  %v253_v30 = vld [vmem:[%s4178_s22 + $0x1c8] sm:$0xff] }
 0x16b   : > { %2678 = vmatpush.msra.mxu0 %v383_v31  ;;  %2697 = vmatpush.msra.mxu1 %v604_v32  ;;  %v474_v31 = vld [vmem:[%s4178_s22 + $0x8b0] sm:$0xff]  ;;  %v669_v32 = vld [vmem:[%s4178_s22 + $0xec8] sm:$0xff] }
 0x16c   : > { %2718 = vmatpush.msra.mxu2 %v799_v33  ;;  %2737 = vmatpush.msra.mxu3 %v1020_v34  ;;  %v2335_v45 = vadd.f32 %v2334_v41, %v2315_v40  ;;  %v890_v33 = vld [vmem:[%s4178_s22 + $0x15b0] sm:$0xff]  ;;  %v240_v34 = vld [vmem:[%s4178_s22 + $0x160] sm:$0xff]  ;;  %v461_v37 = vld [vmem:[%s4178_s22 + $0x848] sm:$0xff] }
 0x16d   : > { %2679 = vmatpush.msra.mxu0 %v370_v38  ;;  %2698 = vmatpush.msra.mxu1 %v591_v39  ;;  %v2354_v48 = vpop.f32.mrf.mxu3  ;;  %v656_v38 = vld [vmem:[%s4178_s22 + $0xe60] sm:$0xff]  ;;  %v877_v39 = vld [vmem:[%s4178_s22 + $0x1548] sm:$0xff]  ;;  %v227_v40 = vld [vmem:[%s4178_s22 + $0xf8] sm:$0xff] }
 0x16e   : > { %2719 = vmatpush.msra.mxu2 %v786_v42  ;;  %2738 = vmatpush.msra.mxu3 %v1007_v43  ;;  %v4926_v51 = vadd.f32 %v2354_v48, %v2335_v45  ;;  %v448_v41 = vld [vmem:[%s4178_s22 + $0x7e0] sm:$0xff]  ;;  %v643_v42 = vld [vmem:[%s4178_s22 + $0xdf8] sm:$0xff]  ;;  %v201_v48 = vld [vmem:[%s4178_s22 + $0x28] sm:$0xff] }
 0x16f   : > { %2653 = vmatmul.f32.vlgmr.msrb.gmra.mxu2 %v4349_v18  ;;  %2680 = vmatpush.msra.mxu0 %v357_v44  ;;  %v864_v43 = vld [vmem:[%s4178_s22 + $0x14e0] sm:$0xff]  ;;  %v214_v44 = vld [vmem:[%s4178_s22 + $0x90] sm:$0xff]  ;;  %v435_v45 = vld [vmem:[%s4178_s22 + $0x778] sm:$0xff] }
 0x170   : > { %2699 = vmatpush.msra.mxu1 %v578_v46  ;;  %2720 = vmatpush.msra.mxu2 %v773_v47  ;;  %v630_v46 = vld [vmem:[%s4178_s22 + $0xd90] sm:$0xff]  ;;  %v851_v47 = vld [vmem:[%s4178_s22 + $0x1478] sm:$0xff] }
 0x171   : > { %2739 = vmatpush.msra.mxu3 %v994_v49  ;;  %2613 = vmatmul.f32.vlgmr.msrb.gmra.mxu0 %v4355_v22  ;;  %v422_v49 = vld [vmem:[%s4178_s22 + $0x710] sm:$0xff] }
 0x172   : > { %2673 = vmatmul.f32.vlgmr.msrb.gmra.mxu3 %v4359_v24  ;;  %2681 = vmatpush.msra.mxu0 %v344_v52  ;;  %v617_v52 = vld [vmem:[%s4178_s22 + $0xd28] sm:$0xff] }
 0x173   : > { %2700 = vmatpush.msra.mxu1 %v565_v53  ;;  %2721 = vmatpush.msra.mxu2 %v760_v54  ;;  %v838_v53 = vld [vmem:[%s4178_s22 + $0x1410] sm:$0xff]  ;;  %v1228_v54 = vld [vmem:[%s4178_s22 + $0x2040] sm:$0xff] }
 0x174   : > { %2740 = vmatpush.msra.mxu3 %v981_v55  ;;  %2633 = vmatmul.f32.vlgmr.msrb.gmra.mxu1 %v4366_v28  ;;  %v1644_v55 = vld [vmem:[%s4178_s22 + $0x2d40] sm:$0xff] }
 0x175   : > { %2682 = vmatpush.msra.mxu0 %v331_v56  ;;  %2701 = vmatpush.msra.mxu1 %v552_v58  ;;  %v409_v56 = vld [vmem:[%s4178_s22 + $0x6a8] sm:$0xff] }
 0x176   : > { %2722 = vmatpush.msra.mxu2 %v747_v59  ;;  %2741 = vmatpush.msra.mxu3 %v968_v61  ;;  %v825_v58 = vld [vmem:[%s4178_s22 + $0x13a8] sm:$0xff]  ;;  %v1215_v59 = vld [vmem:[%s4178_s22 + $0x1fd8] sm:$0xff]  ;;  %v1436_v61 = vld [vmem:[%s4178_s22 + $0x26c0] sm:$0xff] }
 0x177   : > { %2683 = vmatpush.msra.mxu0 %v318_v63  ;;  %2702 = vmatpush.msra.mxu1 %v539_v0  ;;  %v1631_v63 = vld [vmem:[%s4178_s22 + $0x2cd8] sm:$0xff]  ;;  %v1852_v0 = vld [vmem:[%s4178_s22 + $0x33c0] sm:$0xff] }
 0x178   : > { %2723 = vmatpush.msra.mxu2 %v734_v1  ;;  %2742 = vmatpush.msra.mxu3 %v955_v3  ;;  %v1202_v1 = vld [vmem:[%s4178_s22 + $0x1f70] sm:$0xff]  ;;  %v1423_v3 = vld [vmem:[%s4178_s22 + $0x2658] sm:$0xff] }
 0x179   : > { %2684 = vmatpush.msra.mxu0 %v305_v5  ;;  %2703 = vmatpush.msra.mxu1 %v526_v7  ;;  %v1618_v5 = vld [vmem:[%s4178_s22 + $0x2c70] sm:$0xff]  ;;  %v1839_v7 = vld [vmem:[%s4178_s22 + $0x3358] sm:$0xff] }
 0x17a   : > { %2724 = vmatpush.msra.mxu2 %v721_v9  ;;  %2743 = vmatpush.msra.mxu3 %v942_v10  ;;  %v1189_v9 = vld [vmem:[%s4178_s22 + $0x1f08] sm:$0xff]  ;;  %v1410_v10 = vld [vmem:[%s4178_s22 + $0x25f0] sm:$0xff] }
 0x17b   : > { %2685 = vmatpush.msra.mxu0 %v292_v11  ;;  %2704 = vmatpush.msra.mxu1 %v513_v12  ;;  %v1605_v11 = vld [vmem:[%s4178_s22 + $0x2c08] sm:$0xff]  ;;  %v1826_v12 = vld [vmem:[%s4178_s22 + $0x32f0] sm:$0xff] }
 0x17c   : > { %2725 = vmatpush.msra.mxu2 %v708_v13  ;;  %2744 = vmatpush.msra.mxu3 %v929_v15  ;;  %v1176_v13 = vld [vmem:[%s4178_s22 + $0x1ea0] sm:$0xff]  ;;  %v1397_v15 = vld [vmem:[%s4178_s22 + $0x2588] sm:$0xff] }
 0x17d   : > { %2686 = vmatpush.msra.mxu0 %v279_v16  ;;  %2705 = vmatpush.msra.mxu1 %v500_v17  ;;  %v1592_v16 = vld [vmem:[%s4178_s22 + $0x2ba0] sm:$0xff]  ;;  %v1813_v17 = vld [vmem:[%s4178_s22 + $0x3288] sm:$0xff] }
 0x17e   : > { %2726 = vmatpush.msra.mxu2 %v695_v19  ;;  %2745 = vmatpush.msra.mxu3 %v916_v20  ;;  %v1163_v19 = vld [vmem:[%s4178_s22 + $0x1e38] sm:$0xff]  ;;  %v1384_v20 = vld [vmem:[%s4178_s22 + $0x2520] sm:$0xff] }
 0x17f   : > { %2687 = vmatpush.msra.mxu0 %v266_v21  ;;  %2706 = vmatpush.msra.mxu1 %v487_v25  ;;  %v1579_v21 = vld [vmem:[%s4178_s22 + $0x2b38] sm:$0xff]  ;;  %v1800_v25 = vld [vmem:[%s4178_s22 + $0x3220] sm:$0xff] }
 0x180   : > { %2727 = vmatpush.msra.mxu2 %v682_v26  ;;  %2746 = vmatpush.msra.mxu3 %v903_v29  ;;  %v1150_v26 = vld [vmem:[%s4178_s22 + $0x1dd0] sm:$0xff]  ;;  %v1371_v29 = vld [vmem:[%s4178_s22 + $0x24b8] sm:$0xff] }
 0x181   : > { %2688 = vmatpush.msra.mxu0 %v253_v30  ;;  %2707 = vmatpush.msra.mxu1 %v474_v31  ;;  %v1566_v30 = vld [vmem:[%s4178_s22 + $0x2ad0] sm:$0xff]  ;;  %v1787_v31 = vld [vmem:[%s4178_s22 + $0x31b8] sm:$0xff] }
 0x182   : > { %2728 = vmatpush.msra.mxu2 %v669_v32  ;;  %2747 = vmatpush.msra.mxu3 %v890_v33  ;;  %v1915_v32 = vadd.f32 %v4696_v57, %v4688_v50  ;;  %v1137_v33 = vld [vmem:[%s4178_s22 + $0x1d68] sm:$0xff]  ;;  %v1540_v50 = vld [vmem:[%s4178_s22 + $0x2a00] sm:$0xff] }
 0x183   : > { %2689 = vmatpush.msra.mxu0 %v240_v34  ;;  %2708 = vmatpush.msra.mxu1 %v461_v37  ;;  %v1358_v34 = vld [vmem:[%s4178_s22 + $0x2450] sm:$0xff]  ;;  %v1553_v37 = vld [vmem:[%s4178_s22 + $0x2a68] sm:$0xff] }
 0x184   : > { %2729 = vmatpush.msra.mxu2 %v656_v38  ;;  %2748 = vmatpush.msra.mxu3 %v877_v39  ;;  %v1774_v38 = vld [vmem:[%s4178_s22 + $0x3150] sm:$0xff]  ;;  %v1124_v39 = vld [vmem:[%s4178_s22 + $0x1d00] sm:$0xff]  ;;  %v1761_v57 = vld [vmem:[%s4178_s22 + $0x30e8] sm:$0xff] }
 0x185   : > { %2690 = vmatpush.msra.mxu0 %v227_v40  ;;  %2709 = vmatpush.msra.mxu1 %v448_v41  ;;  %v1345_v40 = vld [vmem:[%s4178_s22 + $0x23e8] sm:$0xff]  ;;  %v1935_v41 = vadd.f32 %v4700_v60, %v1915_v32  ;;  %v1514_v60 = vld [vmem:[%s4178_s22 + $0x2930] sm:$0xff] }
 0x186   : > { %2730 = vmatpush.msra.mxu2 %v643_v42  ;;  %2749 = vmatpush.msra.mxu3 %v864_v43  ;;  %v1111_v42 = vld [vmem:[%s4178_s22 + $0x1c98] sm:$0xff]  ;;  %v1332_v43 = vld [vmem:[%s4178_s22 + $0x2380] sm:$0xff]  ;;  %v1670_v32 = vld [vmem:[%s4178_s22 + $0x2e10] sm:$0xff] }
 0x187   : > { %2691 = vmatpush.msra.mxu0 %v214_v44  ;;  %2710 = vmatpush.msra.mxu1 %v435_v45  ;;  %v1527_v45 = vld [vmem:[%s4178_s22 + $0x2998] sm:$0xff] }
 0x188   : > { %2731 = vmatpush.msra.mxu2 %v630_v46  ;;  %2750 = vmatpush.msra.mxu3 %v851_v47  ;;  %v1748_v46 = vld [vmem:[%s4178_s22 + $0x3080] sm:$0xff]  ;;  %v1098_v47 = vld [vmem:[%s4178_s22 + $0x1c30] sm:$0xff] }
 0x189   : > { %2692 = vmatpush.msra.mxu0 %v201_v48  ;;  %2711 = vmatpush.msra.mxu1 %v422_v49  ;;  %v1319_v48 = vld [vmem:[%s4178_s22 + $0x2318] sm:$0xff] }
 0x18a   : > { %2732 = vmatpush.msra.mxu2 %v617_v52  ;;  %2751 = vmatpush.msra.mxu3 %v838_v53  ;;  %v1735_v49 = vld [vmem:[%s4178_s22 + $0x3018] sm:$0xff]  ;;  %v1955_v53 = vadd.f32 %v4708_v6, %v1935_v41  ;;  %v1293_v6 = vld [vmem:[%s4178_s22 + $0x2248] sm:$0xff] }
 0x18b   : > { %2757 = vmatpush.msrb.mxu0 %v1228_v54  ;;  %2712 = vmatpush.msra.mxu1 %v409_v56  ;;  %v1085_v54 = vld [vmem:[%s4178_s22 + $0x1bc8] sm:$0xff] }
 0x18c   : > { %2797 = vmatpush.msrb.mxu2 %v1644_v55  ;;  %2752 = vmatpush.msra.mxu3 %v825_v58  ;;  %v1306_v55 = vld [vmem:[%s4178_s22 + $0x22b0] sm:$0xff] }
 0x18d   : > { %2758 = vmatpush.msrb.mxu0 %v1215_v59  ;;  %2777 = vmatpush.msrb.mxu1 %v1436_v61  ;;  %v1501_v59 = vld [vmem:[%s4178_s22 + $0x28c8] sm:$0xff]  ;;  %v1722_v61 = vld [vmem:[%s4178_s22 + $0x2fb0] sm:$0xff] }
 0x18e   : > { %2798 = vmatpush.msrb.mxu2 %v1631_v63  ;;  %2817 = vmatpush.msrb.mxu3 %v1852_v0  ;;  %v1072_v63 = vld [vmem:[%s4178_s22 + $0x1b60] sm:$0xff] }
 0x18f   : > { %2759 = vmatpush.msrb.mxu0 %v1202_v1  ;;  %2778 = vmatpush.msrb.mxu1 %v1423_v3  ;;  %v1488_v1 = vld [vmem:[%s4178_s22 + $0x2860] sm:$0xff] }
 0x190   : > { %2799 = vmatpush.msrb.mxu2 %v1618_v5  ;;  %2818 = vmatpush.msrb.mxu3 %v1839_v7  ;;  %v1975_v5 = vadd.f32 %v4716_v14, %v1955_v53  ;;  %v1709_v7 = vld [vmem:[%s4178_s22 + $0x2f48] sm:$0xff]  ;;  %v1696_v14 = vld [vmem:[%s4178_s22 + $0x2ee0] sm:$0xff]  ;;  %v358_v53 = vld [vmem:[%s4178_s22 + $0x510] sm:$0xff] }
 0x191   : > { %2760 = vmatpush.msrb.mxu0 %v1189_v9  ;;  %2779 = vmatpush.msrb.mxu1 %v1410_v10  ;;  %v1059_v10 = vld [vmem:[%s4178_s22 + $0x1af8] sm:$0xff] }
 0x192   : > { %2800 = vmatpush.msrb.mxu2 %v1605_v11  ;;  %2819 = vmatpush.msrb.mxu3 %v1826_v12  ;;  %v1280_v11 = vld [vmem:[%s4178_s22 + $0x21e0] sm:$0xff]  ;;  %v1475_v12 = vld [vmem:[%s4178_s22 + $0x27f8] sm:$0xff] }
 0x193   : > { %2761 = vmatpush.msrb.mxu0 %v1176_v13  ;;  %2780 = vmatpush.msrb.mxu1 %v1397_v15 }
 0x194   : > { %2801 = vmatpush.msrb.mxu2 %v1592_v16  ;;  %2820 = vmatpush.msrb.mxu3 %v1813_v17  ;;  %v1995_v16 = vadd.f32 %v4724_v23, %v1975_v5  ;;  %v1046_v17 = vld [vmem:[%s4178_s22 + $0x1a90] sm:$0xff]  ;;  %v319_v5 = vld [vmem:[%s4178_s22 + $0x3d8] sm:$0xff] }
 0x195   : > { %2762 = vmatpush.msrb.mxu0 %v1163_v19  ;;  %2781 = vmatpush.msrb.mxu1 %v1384_v20  ;;  %v1267_v19 = vld [vmem:[%s4178_s22 + $0x2178] sm:$0xff]  ;;  %v1462_v20 = vld [vmem:[%s4178_s22 + $0x2790] sm:$0xff] }
 0x196   : > { %2802 = vmatpush.msrb.mxu2 %v1579_v21  ;;  %2821 = vmatpush.msrb.mxu3 %v1800_v25  ;;  %v1683_v21 = vld [vmem:[%s4178_s22 + $0x2e78] sm:$0xff]  ;;  %v1254_v23 = vld [vmem:[%s4178_s22 + $0x2110] sm:$0xff] }
 0x197   : > { %2763 = vmatpush.msrb.mxu0 %v1150_v26  ;;  %2782 = vmatpush.msrb.mxu1 %v1371_v29  ;;  %v1033_v26 = vld [vmem:[%s4178_s22 + $0x1a28] sm:$0xff] }
 0x198   : > { %2803 = vmatpush.msrb.mxu2 %v1566_v30  ;;  %2822 = vmatpush.msrb.mxu3 %v1787_v31  ;;  %v1449_v31 = vld [vmem:[%s4178_s22 + $0x2728] sm:$0xff] }
 0x199   : > { %2764 = vmatpush.msrb.mxu0 %v1137_v33  ;;  %2783 = vmatpush.msrb.mxu1 %v1358_v34  ;;  %v2015_v33 = vadd.f32 %v4728_v27, %v1995_v16  ;;  %v397_v34 = vld [vmem:[%s4178_s22 + $0x648] sm:$0xff]  ;;  %v384_v27 = vld [vmem:[%s4178_s22 + $0x5e0] sm:$0xff]  ;;  %v514_v16 = vld [vmem:[%s4178_s22 + $0x9f0] sm:$0xff] }
 0x19a   : > { %2804 = vmatpush.msrb.mxu2 %v1553_v37  ;;  %2823 = vmatpush.msrb.mxu3 %v1774_v38  ;;  %v2374_v44 = vpop.f32.mrf.mxu0  ;;  %v813_v38 = vld [vmem:[%s4178_s22 + $0x1348] sm:$0xff] }
 0x19b   : > { %2765 = vmatpush.msrb.mxu0 %v1124_v39  ;;  %2784 = vmatpush.msrb.mxu1 %v1345_v40  ;;  %v1241_v39 = vld [vmem:[%s4178_s22 + $0x20a8] sm:$0xff] }
 0x19c   : > { %2805 = vmatpush.msrb.mxu2 %v1540_v50  ;;  %2824 = vmatpush.msrb.mxu3 %v1761_v57  ;;  %v3970_v50 = vrot.slane %v4776_v36, 7  ;;  %v1657_v57 = vld [vmem:[%s4178_s22 + $0x2da8] sm:$0xff] }
 0x19d   : > { %2766 = vmatpush.msrb.mxu0 %v1111_v42  ;;  %2785 = vmatpush.msrb.mxu1 %v1332_v43  ;;  %v2394_v52 = vpop.f32.mrf.mxu1  ;;  %v2035_v42 = vadd.f32 %v4736_v35, %v2015_v33  ;;  %v3971_v43 = vrot.slane %v4926_v51, 6  ;;  %v605_v36 = vld [vmem:[%s4178_s22 + $0xcc8] sm:$0xff]  ;;  %v371_v35 = vld [vmem:[%s4178_s22 + $0x578] sm:$0xff]  ;;  %v592_v51 = vld [vmem:[%s4178_s22 + $0xc60] sm:$0xff] }
 0x19e   : > { %2806 = vmatpush.msrb.mxu2 %v1527_v45  ;;  %2825 = vmatpush.msrb.mxu3 %v1748_v46  ;;  %v2395_v56 = vadd.f32 %v2394_v52, %v2374_v44  ;;  %v2414_v58 = vpop.f32.mrf.mxu2  ;;  %v800_v44 = vld [vmem:[%s4178_s22 + $0x12e0] sm:$0xff]  ;;  %v1021_v46 = vld [vmem:[%s4178_s22 + $0x19c8] sm:$0xff]  ;;  %v475_v33 = vld [vmem:[%s4178_s22 + $0x8b8] sm:$0xff] }
 0x19f   : > { %2767 = vmatpush.msrb.mxu0 %v1098_v47  ;;  %2786 = vmatpush.msrb.mxu1 %v1319_v48  ;;  %v3982_v47 = vsel %vm3981_vm1, %v2035_v42, %v3970_v50  ;;  %v878_v50 = vld [vmem:[%s4178_s22 + $0x1550] sm:$0xff]  ;;  %v865_v42 = vld [vmem:[%s4178_s22 + $0x14e8] sm:$0xff] }
 0x1a0   : > { %2807 = vmatpush.msrb.mxu2 %v1514_v60  ;;  %2826 = vmatpush.msrb.mxu3 %v1735_v49  ;;  %v2415_v0 = vadd.f32 %v2414_v58, %v2395_v56  ;;  %v787_v60 = vld [vmem:[%s4178_s22 + $0x1278] sm:$0xff]  ;;  %v1008_v49 = vld [vmem:[%s4178_s22 + $0x1960] sm:$0xff]  ;;  %v345_v58 = vld [vmem:[%s4178_s22 + $0x4a8] sm:$0xff] }
 0x1a1   : > { %2768 = vmatpush.msrb.mxu0 %v1085_v54  ;;  %2787 = vmatpush.msrb.mxu1 %v1306_v55  ;;  %v2434_v3 = vpop.f32.mrf.mxu3  ;;  %v579_v54 = vld [vmem:[%s4178_s22 + $0xbf8] sm:$0xff]  ;;  %v774_v55 = vld [vmem:[%s4178_s22 + $0x1210] sm:$0xff] }
 0x1a2   : > { %2808 = vmatpush.msrb.mxu2 %v1501_v59  ;;  %2827 = vmatpush.msrb.mxu3 %v1722_v61  ;;  %v2435_v9 = vadd.f32 %v2434_v3, %v2415_v0  ;;  %v995_v56 = vld [vmem:[%s4178_s22 + $0x18f8] sm:$0xff]  ;;  %v566_v59 = vld [vmem:[%s4178_s22 + $0xb90] sm:$0xff]  ;;  %v761_v61 = vld [vmem:[%s4178_s22 + $0x11a8] sm:$0xff] }
 0x1a3   : > { %2733 = vmatmul.f32.vlgmr.msra.gmra.mxu2 %v4317_v62  ;;  %2769 = vmatpush.msrb.mxu0 %v1072_v63  ;;  %v982_v63 = vld [vmem:[%s4178_s22 + $0x1890] sm:$0xff]  ;;  %v332_v0 = vld [vmem:[%s4178_s22 + $0x440] sm:$0xff]  ;;  %v969_v3 = vld [vmem:[%s4178_s22 + $0x1828] sm:$0xff] }
 0x1a4   : > { %2788 = vmatpush.msrb.mxu1 %v1293_v6  ;;  %2809 = vmatpush.msrb.mxu2 %v1488_v1  ;;  %v2454_v13 = vpop.f32.mrf.mxu0  ;;  %v553_v6 = vld [vmem:[%s4178_s22 + $0xb28] sm:$0xff]  ;;  %v748_v1 = vld [vmem:[%s4178_s22 + $0x1140] sm:$0xff] }
 0x1a5   : > { %2828 = vmatpush.msrb.mxu3 %v1709_v7  ;;  %2693 = vmatmul.f32.vlgmr.msra.gmra.mxu0 %v4323_v2  ;;  %v2455_v15 = vadd.f32 %v2454_v13, %v2435_v9  ;;  %v540_v7 = vld [vmem:[%s4178_s22 + $0xac0] sm:$0xff]  ;;  %v735_v9 = vld [vmem:[%s4178_s22 + $0x10d8] sm:$0xff]  ;;  %v722_v13 = vld [vmem:[%s4178_s22 + $0x1070] sm:$0xff] }
 0x1a6   : > { %2753 = vmatmul.f32.vlgmr.msra.gmra.mxu3 %v4327_v4  ;;  %2770 = vmatpush.msrb.mxu0 %v1059_v10  ;;  %v956_v10 = vld [vmem:[%s4178_s22 + $0x17c0] sm:$0xff] }
 0x1a7   : > { %2789 = vmatpush.msrb.mxu1 %v1280_v11  ;;  %2810 = vmatpush.msrb.mxu2 %v1475_v12  ;;  %v2474_v25 = vpop.f32.mrf.mxu1  ;;  %v306_v11 = vld [vmem:[%s4178_s22 + $0x370] sm:$0xff]  ;;  %v527_v12 = vld [vmem:[%s4178_s22 + $0xa58] sm:$0xff] }
 0x1a8   : > { %2829 = vmatpush.msrb.mxu3 %v1696_v14  ;;  %2713 = vmatmul.f32.vlgmr.msra.gmra.mxu1 %v4334_v8  ;;  %v2475_v29 = vadd.f32 %v2474_v25, %v2455_v15  ;;  %v2494_v30 = vpop.f32.mrf.mxu2  ;;  %v943_v14 = vld [vmem:[%s4178_s22 + $0x1758] sm:$0xff]  ;;  %v293_v15 = vld [vmem:[%s4178_s22 + $0x308] sm:$0xff]  ;;  %v696_v25 = vld [vmem:[%s4178_s22 + $0xfa0] sm:$0xff] }
 0x1a9   : > { %2771 = vmatpush.msrb.mxu0 %v1046_v17  ;;  %2790 = vmatpush.msrb.mxu1 %v1267_v19  ;;  %v709_v17 = vld [vmem:[%s4178_s22 + $0x1008] sm:$0xff]  ;;  %v930_v19 = vld [vmem:[%s4178_s22 + $0x16f0] sm:$0xff] }
 0x1aa   : > { %2811 = vmatpush.msrb.mxu2 %v1462_v20  ;;  %2830 = vmatpush.msrb.mxu3 %v1683_v21  ;;  %v2495_v37 = vadd.f32 %v2494_v30, %v2475_v29  ;;  %v280_v20 = vld [vmem:[%s4178_s22 + $0x2a0] sm:$0xff]  ;;  %v501_v21 = vld [vmem:[%s4178_s22 + $0x988] sm:$0xff]  ;;  %v683_v30 = vld [vmem:[%s4178_s22 + $0xf38] sm:$0xff] }
 0x1ab   : > { %2772 = vmatpush.msrb.mxu0 %v1033_v26  ;;  %2791 = vmatpush.msrb.mxu1 %v1254_v23  ;;  %v2514_v40 = vpop.f32.mrf.mxu3  ;;  %v917_v26 = vld [vmem:[%s4178_s22 + $0x1688] sm:$0xff]  ;;  %v267_v23 = vld [vmem:[%s4178_s22 + $0x238] sm:$0xff]  ;;  %v488_v29 = vld [vmem:[%s4178_s22 + $0x920] sm:$0xff] }
 0x1ac   : > { %2812 = vmatpush.msrb.mxu2 %v1449_v31  ;;  %2831 = vmatpush.msrb.mxu3 %v1670_v32  ;;  %v2515_v41 = vadd.f32 %v2514_v40, %v2495_v37  ;;  %v904_v31 = vld [vmem:[%s4178_s22 + $0x1620] sm:$0xff]  ;;  %v254_v32 = vld [vmem:[%s4178_s22 + $0x1d0] sm:$0xff]  ;;  %v891_v37 = vld [vmem:[%s4178_s22 + $0x15b8] sm:$0xff] }
 0x1ad   : > { %2813 = vmatmul.f32.vlgmr.msrb.gmra.mxu2 %v4349_v18  ;;  %2837 = vmatpush.msra.mxu0 %v397_v34  ;;  %v670_v34 = vld [vmem:[%s4178_s22 + $0xed0] sm:$0xff]  ;;  %v657_v40 = vld [vmem:[%s4178_s22 + $0xe68] sm:$0xff] }
 0x1ae   : > { %2877 = vmatpush.msra.mxu2 %v813_v38  ;;  %2792 = vmatpush.msrb.mxu1 %v1241_v39  ;;  %v3972_v45 = vrot.slane %v2515_v41, 5  ;;  %v241_v38 = vld [vmem:[%s4178_s22 + $0x168] sm:$0xff]  ;;  %v462_v39 = vld [vmem:[%s4178_s22 + $0x850] sm:$0xff] }
 0x1af   : > { %2832 = vmatpush.msrb.mxu3 %v1657_v57  ;;  %2773 = vmatmul.f32.vlgmr.msrb.gmra.mxu0 %v4355_v22  ;;  %v228_v57 = vld [vmem:[%s4178_s22 + $0x100] sm:$0xff]  ;;  %v449_v41 = vld [vmem:[%s4178_s22 + $0x7e8] sm:$0xff] }
 0x1b0   : > { %2833 = vmatmul.f32.vlgmr.msrb.gmra.mxu3 %v4359_v24  ;;  %2838 = vmatpush.msra.mxu0 %v384_v27  ;;  %v3984_v48 = vsel %vm3983_vm2, %v3971_v43, %v3972_v45  ;;  %v644_v27 = vld [vmem:[%s4178_s22 + $0xe00] sm:$0xff]  ;;  %v215_v43 = vld [vmem:[%s4178_s22 + $0x98] sm:$0xff] }
 0x1b1   : > { %2857 = vmatpush.msra.mxu1 %v605_v36  ;;  %2878 = vmatpush.msra.mxu2 %v800_v44  ;;  %v5076_v52 = vsel %vm3985_vm3, %v3982_v47, %v3984_v48  ;;  %v436_v36 = vld [vmem:[%s4178_s22 + $0x780] sm:$0xff]  ;;  %v631_v44 = vld [vmem:[%s4178_s22 + $0xd98] sm:$0xff]  ;;  %v1229_v48 = vld [vmem:[%s4178_s22 + $0x2048] sm:$0xff] }
 0x1b2   : > { %2897 = vmatpush.msra.mxu3 %v1021_v46  ;;  %2793 = vmatmul.f32.vlgmr.msrb.gmra.mxu1 %v4366_v28  ;;  %v852_v45 = vld [vmem:[%s4178_s22 + $0x1480] sm:$0xff]  ;;  %v202_v46 = vld [vmem:[%s4178_s22 + $0x30] sm:$0xff]  ;;  %v423_v47 = vld [vmem:[%s4178_s22 + $0x718] sm:$0xff] }
 0x1b3   : > { %2839 = vmatpush.msra.mxu0 %v371_v35  ;;  %2858 = vmatpush.msra.mxu1 %v592_v51  ;;  %v618_v35 = vld [vmem:[%s4178_s22 + $0xd30] sm:$0xff]  ;;  %v839_v51 = vld [vmem:[%s4178_s22 + $0x1418] sm:$0xff] }
 0x1b4   : > { %2879 = vmatpush.msra.mxu2 %v787_v60  ;;  %2898 = vmatpush.msra.mxu3 %v1008_v49  ;;  %v1645_v60 = vld [vmem:[%s4178_s22 + $0x2d48] sm:$0xff]  ;;  %v410_v49 = vld [vmem:[%s4178_s22 + $0x6b0] sm:$0xff] }
 0x1b5   : > { %2840 = vmatpush.msra.mxu0 %v358_v53  ;;  %2859 = vmatpush.msra.mxu1 %v579_v54  ;;  %v826_v53 = vld [vmem:[%s4178_s22 + $0x13b0] sm:$0xff]  ;;  %v1216_v54 = vld [vmem:[%s4178_s22 + $0x1fe0] sm:$0xff] }
 0x1b6   : > { %2880 = vmatpush.msra.mxu2 %v774_v55  ;;  %2899 = vmatpush.msra.mxu3 %v995_v56  ;;  %v1437_v55 = vld [vmem:[%s4178_s22 + $0x26c8] sm:$0xff]  ;;  %v1632_v56 = vld [vmem:[%s4178_s22 + $0x2ce0] sm:$0xff] }
 0x1b7   : > { %2841 = vmatpush.msra.mxu0 %v345_v58  ;;  %2860 = vmatpush.msra.mxu1 %v566_v59  ;;  %v1853_v58 = vld [vmem:[%s4178_s22 + $0x33c8] sm:$0xff]  ;;  %v1203_v59 = vld [vmem:[%s4178_s22 + $0x1f78] sm:$0xff] }
 0x1b8   : > { %2881 = vmatpush.msra.mxu2 %v761_v61  ;;  %2900 = vmatpush.msra.mxu3 %v982_v63  ;;  %v1424_v61 = vld [vmem:[%s4178_s22 + $0x2660] sm:$0xff]  ;;  %v1619_v63 = vld [vmem:[%s4178_s22 + $0x2c78] sm:$0xff] }
 0x1b9   : > { %2842 = vmatpush.msra.mxu0 %v332_v0  ;;  %2861 = vmatpush.msra.mxu1 %v553_v6  ;;  %v1840_v0 = vld [vmem:[%s4178_s22 + $0x3360] sm:$0xff]  ;;  %v1190_v6 = vld [vmem:[%s4178_s22 + $0x1f10] sm:$0xff] }
 0x1ba   : > { %2882 = vmatpush.msra.mxu2 %v748_v1  ;;  %2901 = vmatpush.msra.mxu3 %v969_v3  ;;  %v1411_v1 = vld [vmem:[%s4178_s22 + $0x25f8] sm:$0xff]  ;;  %v1606_v3 = vld [vmem:[%s4178_s22 + $0x2c10] sm:$0xff] }
 0x1bb   : > { %2843 = vmatpush.msra.mxu0 %v319_v5  ;;  %2862 = vmatpush.msra.mxu1 %v540_v7  ;;  %v1827_v5 = vld [vmem:[%s4178_s22 + $0x32f8] sm:$0xff]  ;;  %v1177_v7 = vld [vmem:[%s4178_s22 + $0x1ea8] sm:$0xff] }
 0x1bc   : > { %2883 = vmatpush.msra.mxu2 %v735_v9  ;;  %2902 = vmatpush.msra.mxu3 %v956_v10  ;;  %v1398_v9 = vld [vmem:[%s4178_s22 + $0x2590] sm:$0xff]  ;;  %v1593_v10 = vld [vmem:[%s4178_s22 + $0x2ba8] sm:$0xff] }
 0x1bd   : > { %2844 = vmatpush.msra.mxu0 %v306_v11  ;;  %2863 = vmatpush.msra.mxu1 %v527_v12  ;;  %v1814_v11 = vld [vmem:[%s4178_s22 + $0x3290] sm:$0xff]  ;;  %v1164_v12 = vld [vmem:[%s4178_s22 + $0x1e40] sm:$0xff] }
 0x1be   : > { %2884 = vmatpush.msra.mxu2 %v722_v13  ;;  %2903 = vmatpush.msra.mxu3 %v943_v14  ;;  %v1385_v13 = vld [vmem:[%s4178_s22 + $0x2528] sm:$0xff]  ;;  %v1580_v14 = vld [vmem:[%s4178_s22 + $0x2b40] sm:$0xff] }
 0x1bf   : > { %2845 = vmatpush.msra.mxu0 %v293_v15  ;;  %2864 = vmatpush.msra.mxu1 %v514_v16  ;;  %v1801_v15 = vld [vmem:[%s4178_s22 + $0x3228] sm:$0xff]  ;;  %v1151_v16 = vld [vmem:[%s4178_s22 + $0x1dd8] sm:$0xff] }
 0x1c0   : > { %2885 = vmatpush.msra.mxu2 %v709_v17  ;;  %2904 = vmatpush.msra.mxu3 %v930_v19  ;;  %v1372_v17 = vld [vmem:[%s4178_s22 + $0x24c0] sm:$0xff]  ;;  %v1567_v19 = vld [vmem:[%s4178_s22 + $0x2ad8] sm:$0xff] }
 0x1c1   : > { %2846 = vmatpush.msra.mxu0 %v280_v20  ;;  %2865 = vmatpush.msra.mxu1 %v501_v21  ;;  %v1788_v20 = vld [vmem:[%s4178_s22 + $0x31c0] sm:$0xff]  ;;  %v1138_v21 = vld [vmem:[%s4178_s22 + $0x1d70] sm:$0xff] }
 0x1c2   : > { %2886 = vmatpush.msra.mxu2 %v696_v25  ;;  %2905 = vmatpush.msra.mxu3 %v917_v26  ;;  %v1359_v25 = vld [vmem:[%s4178_s22 + $0x2458] sm:$0xff]  ;;  %v1554_v26 = vld [vmem:[%s4178_s22 + $0x2a70] sm:$0xff] }
 0x1c3   : > { %2847 = vmatpush.msra.mxu0 %v267_v23  ;;  %2866 = vmatpush.msra.mxu1 %v488_v29  ;;  %v1775_v23 = vld [vmem:[%s4178_s22 + $0x3158] sm:$0xff]  ;;  %v1125_v29 = vld [vmem:[%s4178_s22 + $0x1d08] sm:$0xff] }
 0x1c4   : > { %2887 = vmatpush.msra.mxu2 %v683_v30  ;;  %2906 = vmatpush.msra.mxu3 %v904_v31  ;;  %v1346_v30 = vld [vmem:[%s4178_s22 + $0x23f0] sm:$0xff]  ;;  %v1541_v31 = vld [vmem:[%s4178_s22 + $0x2a08] sm:$0xff] }
 0x1c5   : > { %2848 = vmatpush.msra.mxu0 %v254_v32  ;;  %2867 = vmatpush.msra.mxu1 %v475_v33  ;;  %v1762_v32 = vld [vmem:[%s4178_s22 + $0x30f0] sm:$0xff]  ;;  %v1112_v33 = vld [vmem:[%s4178_s22 + $0x1ca0] sm:$0xff] }
 0x1c6   : > { %2888 = vmatpush.msra.mxu2 %v670_v34  ;;  %2907 = vmatpush.msra.mxu3 %v891_v37  ;;  %v1333_v34 = vld [vmem:[%s4178_s22 + $0x2388] sm:$0xff]  ;;  %v1528_v37 = vld [vmem:[%s4178_s22 + $0x29a0] sm:$0xff] }
 0x1c7   : > { %2849 = vmatpush.msra.mxu0 %v241_v38  ;;  %2868 = vmatpush.msra.mxu1 %v462_v39  ;;  %v1749_v38 = vld [vmem:[%s4178_s22 + $0x3088] sm:$0xff]  ;;  %v1099_v39 = vld [vmem:[%s4178_s22 + $0x1c38] sm:$0xff] }
 0x1c8   : > { %2889 = vmatpush.msra.mxu2 %v657_v40  ;;  %2908 = vmatpush.msra.mxu3 %v878_v50  ;;  %v1320_v40 = vld [vmem:[%s4178_s22 + $0x2320] sm:$0xff]  ;;  %v1515_v50 = vld [vmem:[%s4178_s22 + $0x2938] sm:$0xff] }
 0x1c9   : > { %2850 = vmatpush.msra.mxu0 %v228_v57  ;;  %2869 = vmatpush.msra.mxu1 %v449_v41  ;;  %v1736_v57 = vld [vmem:[%s4178_s22 + $0x3020] sm:$0xff]  ;;  %v1086_v41 = vld [vmem:[%s4178_s22 + $0x1bd0] sm:$0xff] }
 0x1ca   : > { %2890 = vmatpush.msra.mxu2 %v644_v27  ;;  %2909 = vmatpush.msra.mxu3 %v865_v42  ;;  %v1307_v27 = vld [vmem:[%s4178_s22 + $0x22b8] sm:$0xff]  ;;  %v1502_v42 = vld [vmem:[%s4178_s22 + $0x28d0] sm:$0xff] }
 0x1cb   : > { %2851 = vmatpush.msra.mxu0 %v215_v43  ;;  %2870 = vmatpush.msra.mxu1 %v436_v36  ;;  %v1723_v43 = vld [vmem:[%s4178_s22 + $0x2fb8] sm:$0xff]  ;;  %v1073_v36 = vld [vmem:[%s4178_s22 + $0x1b68] sm:$0xff] }
 0x1cc   : > { %2891 = vmatpush.msra.mxu2 %v631_v44  ;;  %2910 = vmatpush.msra.mxu3 %v852_v45  ;;  %v1294_v44 = vld [vmem:[%s4178_s22 + $0x2250] sm:$0xff]  ;;  %v1489_v45 = vld [vmem:[%s4178_s22 + $0x2868] sm:$0xff] }
 0x1cd   : > { %2852 = vmatpush.msra.mxu0 %v202_v46  ;;  %2871 = vmatpush.msra.mxu1 %v423_v47  ;;  %v1710_v46 = vld [vmem:[%s4178_s22 + $0x2f50] sm:$0xff]  ;;  %v1060_v47 = vld [vmem:[%s4178_s22 + $0x1b00] sm:$0xff] }
 0x1ce   : > { %2892 = vmatpush.msra.mxu2 %v618_v35  ;;  %2911 = vmatpush.msra.mxu3 %v839_v51  ;;  %v1281_v35 = vld [vmem:[%s4178_s22 + $0x21e8] sm:$0xff]  ;;  %v1476_v51 = vld [vmem:[%s4178_s22 + $0x2800] sm:$0xff] }
 0x1cf   : > { %2917 = vmatpush.msrb.mxu0 %v1229_v48  ;;  %2872 = vmatpush.msra.mxu1 %v410_v49  ;;  %v1697_v48 = vld [vmem:[%s4178_s22 + $0x2ee8] sm:$0xff]  ;;  %v1268_v49 = vld [vmem:[%s4178_s22 + $0x2180] sm:$0xff] }
 0x1d0   : > { %2957 = vmatpush.msrb.mxu2 %v1645_v60  ;;  %2912 = vmatpush.msra.mxu3 %v826_v53  ;;  %v1047_v60 = vld [vmem:[%s4178_s22 + $0x1a98] sm:$0xff] }
 0x1d1   : > { %2918 = vmatpush.msrb.mxu0 %v1216_v54  ;;  %2937 = vmatpush.msrb.mxu1 %v1437_v55  ;;  %v1463_v53 = vld [vmem:[%s4178_s22 + $0x2798] sm:$0xff]  ;;  %v1684_v54 = vld [vmem:[%s4178_s22 + $0x2e80] sm:$0xff]  ;;  %v1034_v55 = vld [vmem:[%s4178_s22 + $0x1a30] sm:$0xff] }
 0x1d2   : > { %2958 = vmatpush.msrb.mxu2 %v1632_v56  ;;  %2977 = vmatpush.msrb.mxu3 %v1853_v58  ;;  %v1255_v56 = vld [vmem:[%s4178_s22 + $0x2118] sm:$0xff]  ;;  %v1450_v58 = vld [vmem:[%s4178_s22 + $0x2730] sm:$0xff] }
 0x1d3   : > { %2919 = vmatpush.msrb.mxu0 %v1203_v59  ;;  %2938 = vmatpush.msrb.mxu1 %v1424_v61  ;;  %v1671_v59 = vld [vmem:[%s4178_s22 + $0x2e18] sm:$0xff]  ;;  %v398_v61 = vld [vmem:[%s4178_s22 + $0x650] sm:$0xff] }
 0x1d4   : > { %2959 = vmatpush.msrb.mxu2 %v1619_v63  ;;  %2978 = vmatpush.msrb.mxu3 %v1840_v0  ;;  %v814_v63 = vld [vmem:[%s4178_s22 + $0x1350] sm:$0xff] }
 0x1d5   : > { %2920 = vmatpush.msrb.mxu0 %v1190_v6  ;;  %2939 = vmatpush.msrb.mxu1 %v1411_v1  ;;  %v1242_v0 = vld [vmem:[%s4178_s22 + $0x20b0] sm:$0xff]  ;;  %v385_v1 = vld [vmem:[%s4178_s22 + $0x5e8] sm:$0xff] }
 0x1d6   : > { %2960 = vmatpush.msrb.mxu2 %v1606_v3  ;;  %2979 = vmatpush.msrb.mxu3 %v1827_v5  ;;  %v1658_v6 = vld [vmem:[%s4178_s22 + $0x2db0] sm:$0xff]  ;;  %v801_v5 = vld [vmem:[%s4178_s22 + $0x12e8] sm:$0xff] }
 0x1d7   : > { %2921 = vmatpush.msrb.mxu0 %v1177_v7  ;;  %2940 = vmatpush.msrb.mxu1 %v1398_v9  ;;  %v606_v3 = vld [vmem:[%s4178_s22 + $0xcd0] sm:$0xff]  ;;  %v372_v9 = vld [vmem:[%s4178_s22 + $0x580] sm:$0xff] }
 0x1d8   : > { %2961 = vmatpush.msrb.mxu2 %v1593_v10  ;;  %2980 = vmatpush.msrb.mxu3 %v1814_v11  ;;  %v1022_v7 = vld [vmem:[%s4178_s22 + $0x19d0] sm:$0xff]  ;;  %v593_v10 = vld [vmem:[%s4178_s22 + $0xc68] sm:$0xff]  ;;  %v788_v11 = vld [vmem:[%s4178_s22 + $0x1280] sm:$0xff] }
 0x1d9   : > { %2922 = vmatpush.msrb.mxu0 %v1164_v12  ;;  %2941 = vmatpush.msrb.mxu1 %v1385_v13  ;;  %v1009_v12 = vld [vmem:[%s4178_s22 + $0x1968] sm:$0xff]  ;;  %v359_v13 = vld [vmem:[%s4178_s22 + $0x518] sm:$0xff] }
 0x1da   : > { %2962 = vmatpush.msrb.mxu2 %v1580_v14  ;;  %2981 = vmatpush.msrb.mxu3 %v1801_v15  ;;  %v580_v14 = vld [vmem:[%s4178_s22 + $0xc00] sm:$0xff]  ;;  %v775_v15 = vld [vmem:[%s4178_s22 + $0x1218] sm:$0xff] }
 0x1db   : > { %2923 = vmatpush.msrb.mxu0 %v1151_v16  ;;  %2942 = vmatpush.msrb.mxu1 %v1372_v17  ;;  %v996_v16 = vld [vmem:[%s4178_s22 + $0x1900] sm:$0xff]  ;;  %v346_v17 = vld [vmem:[%s4178_s22 + $0x4b0] sm:$0xff] }
 0x1dc   : > { %2963 = vmatpush.msrb.mxu2 %v1567_v19  ;;  %2982 = vmatpush.msrb.mxu3 %v1788_v20  ;;  %v567_v19 = vld [vmem:[%s4178_s22 + $0xb98] sm:$0xff]  ;;  %v762_v20 = vld [vmem:[%s4178_s22 + $0x11b0] sm:$0xff] }
 0x1dd   : > { %2924 = vmatpush.msrb.mxu0 %v1138_v21  ;;  %2943 = vmatpush.msrb.mxu1 %v1359_v25  ;;  %v983_v21 = vld [vmem:[%s4178_s22 + $0x1898] sm:$0xff]  ;;  %v333_v25 = vld [vmem:[%s4178_s22 + $0x448] sm:$0xff] }
 0x1de   : > { %2964 = vmatpush.msrb.mxu2 %v1554_v26  ;;  %2983 = vmatpush.msrb.mxu3 %v1775_v23  ;;  %v554_v26 = vld [vmem:[%s4178_s22 + $0xb30] sm:$0xff]  ;;  %v749_v23 = vld [vmem:[%s4178_s22 + $0x1148] sm:$0xff] }
 0x1df   : > { %2925 = vmatpush.msrb.mxu0 %v1125_v29  ;;  %2944 = vmatpush.msrb.mxu1 %v1346_v30  ;;  %v970_v29 = vld [vmem:[%s4178_s22 + $0x1830] sm:$0xff]  ;;  %v320_v30 = vld [vmem:[%s4178_s22 + $0x3e0] sm:$0xff] }
 0x1e0   : > { %2965 = vmatpush.msrb.mxu2 %v1541_v31  ;;  %2984 = vmatpush.msrb.mxu3 %v1762_v32  ;;  %v541_v31 = vld [vmem:[%s4178_s22 + $0xac8] sm:$0xff]  ;;  %v736_v32 = vld [vmem:[%s4178_s22 + $0x10e0] sm:$0xff] }
 0x1e1   : > { %2926 = vmatpush.msrb.mxu0 %v1112_v33  ;;  %2945 = vmatpush.msrb.mxu1 %v1333_v34  ;;  %v957_v33 = vld [vmem:[%s4178_s22 + $0x17c8] sm:$0xff]  ;;  %v307_v34 = vld [vmem:[%s4178_s22 + $0x378] sm:$0xff] }
 0x1e2   : > { %2966 = vmatpush.msrb.mxu2 %v1528_v37  ;;  %2985 = vmatpush.msrb.mxu3 %v1749_v38  ;;  %v528_v37 = vld [vmem:[%s4178_s22 + $0xa60] sm:$0xff]  ;;  %v723_v38 = vld [vmem:[%s4178_s22 + $0x1078] sm:$0xff] }
 0x1e3   : > { %2927 = vmatpush.msrb.mxu0 %v1099_v39  ;;  %2946 = vmatpush.msrb.mxu1 %v1320_v40  ;;  %v944_v39 = vld [vmem:[%s4178_s22 + $0x1760] sm:$0xff]  ;;  %v294_v40 = vld [vmem:[%s4178_s22 + $0x310] sm:$0xff] }
 0x1e4   : > { %2967 = vmatpush.msrb.mxu2 %v1515_v50  ;;  %2986 = vmatpush.msrb.mxu3 %v1736_v57  ;;  %v515_v50 = vld [vmem:[%s4178_s22 + $0x9f8] sm:$0xff]  ;;  %v710_v57 = vld [vmem:[%s4178_s22 + $0x1010] sm:$0xff] }
 0x1e5   : > { %2928 = vmatpush.msrb.mxu0 %v1086_v41  ;;  %2947 = vmatpush.msrb.mxu1 %v1307_v27  ;;  %v931_v41 = vld [vmem:[%s4178_s22 + $0x16f8] sm:$0xff]  ;;  %v281_v27 = vld [vmem:[%s4178_s22 + $0x2a8] sm:$0xff] }
 0x1e6   : > { %2968 = vmatpush.msrb.mxu2 %v1502_v42  ;;  %2987 = vmatpush.msrb.mxu3 %v1723_v43  ;;  %v502_v42 = vld [vmem:[%s4178_s22 + $0x990] sm:$0xff]  ;;  %v697_v43 = vld [vmem:[%s4178_s22 + $0xfa8] sm:$0xff] }
 0x1e7   : > { %2929 = vmatpush.msrb.mxu0 %v1073_v36  ;;  %2948 = vmatpush.msrb.mxu1 %v1294_v44  ;;  %v918_v36 = vld [vmem:[%s4178_s22 + $0x1690] sm:$0xff]  ;;  %v268_v44 = vld [vmem:[%s4178_s22 + $0x240] sm:$0xff] }
 0x1e8   : > { %2969 = vmatpush.msrb.mxu2 %v1489_v45  ;;  %2988 = vmatpush.msrb.mxu3 %v1710_v46  ;;  %v489_v45 = vld [vmem:[%s4178_s22 + $0x928] sm:$0xff]  ;;  %v684_v46 = vld [vmem:[%s4178_s22 + $0xf40] sm:$0xff] }
 0x1e9   : > { %2930 = vmatpush.msrb.mxu0 %v1060_v47  ;;  %2949 = vmatpush.msrb.mxu1 %v1281_v35  ;;  %v905_v47 = vld [vmem:[%s4178_s22 + $0x1628] sm:$0xff]  ;;  %v255_v35 = vld [vmem:[%s4178_s22 + $0x1d8] sm:$0xff] }
 0x1ea   : > { %2970 = vmatpush.msrb.mxu2 %v1476_v51  ;;  %2989 = vmatpush.msrb.mxu3 %v1697_v48  ;;  %v476_v51 = vld [vmem:[%s4178_s22 + $0x8c0] sm:$0xff]  ;;  %v671_v48 = vld [vmem:[%s4178_s22 + $0xed8] sm:$0xff] }
 0x1eb   : > { %2931 = vmatpush.msrb.mxu0 %v1047_v60  ;;  %2950 = vmatpush.msrb.mxu1 %v1268_v49  ;;  %v892_v60 = vld [vmem:[%s4178_s22 + $0x15c0] sm:$0xff]  ;;  %v242_v49 = vld [vmem:[%s4178_s22 + $0x170] sm:$0xff] }
 0x1ec   : > { %2971 = vmatpush.msrb.mxu2 %v1463_v53  ;;  %2990 = vmatpush.msrb.mxu3 %v1684_v54  ;;  %v463_v53 = vld [vmem:[%s4178_s22 + $0x858] sm:$0xff]  ;;  %v658_v54 = vld [vmem:[%s4178_s22 + $0xe70] sm:$0xff] }
 0x1ed   : > { %2893 = vmatmul.f32.vlgmr.msra.gmra.mxu2 %v4317_v62  ;;  %2932 = vmatpush.msrb.mxu0 %v1034_v55  ;;  %v879_v55 = vld [vmem:[%s4178_s22 + $0x1558] sm:$0xff] }
 0x1ee   : > { %2951 = vmatpush.msrb.mxu1 %v1255_v56  ;;  %2972 = vmatpush.msrb.mxu2 %v1450_v58  ;;  %v229_v56 = vld [vmem:[%s4178_s22 + $0x108] sm:$0xff]  ;;  %v450_v58 = vld [vmem:[%s4178_s22 + $0x7f0] sm:$0xff] }
 0x1ef   : > { %2991 = vmatpush.msrb.mxu3 %v1671_v59  ;;  %2853 = vmatmul.f32.vlgmr.msra.gmra.mxu0 %v4323_v2  ;;  %v645_v59 = vld [vmem:[%s4178_s22 + $0xe08] sm:$0xff] }
 0x1f0   : > { %2913 = vmatmul.f32.vlgmr.msra.gmra.mxu3 %v4327_v4  ;;  %2997 = vmatpush.msra.mxu0 %v398_v61  ;;  %v866_v61 = vld [vmem:[%s4178_s22 + $0x14f0] sm:$0xff] }
 0x1f1   : > { %3037 = vmatpush.msra.mxu2 %v814_v63  ;;  %2952 = vmatpush.msrb.mxu1 %v1242_v0  ;;  %v216_v63 = vld [vmem:[%s4178_s22 + $0xa0] sm:$0xff]  ;;  %v437_v0 = vld [vmem:[%s4178_s22 + $0x788] sm:$0xff] }
 0x1f2   : > { %2992 = vmatpush.msrb.mxu3 %v1658_v6  ;;  %2873 = vmatmul.f32.vlgmr.msra.gmra.mxu1 %v4334_v8  ;;  %v632_v6 = vld [vmem:[%s4178_s22 + $0xda0] sm:$0xff] }
 0x1f3   : > { %2998 = vmatpush.msra.mxu0 %v385_v1  ;;  %3017 = vmatpush.msra.mxu1 %v606_v3  ;;  %v853_v1 = vld [vmem:[%s4178_s22 + $0x1488] sm:$0xff]  ;;  %v203_v3 = vld [vmem:[%s4178_s22 + $0x38] sm:$0xff] }
 0x1f4   : > { %3038 = vmatpush.msra.mxu2 %v801_v5  ;;  %3057 = vmatpush.msra.mxu3 %v1022_v7  ;;  %v424_v5 = vld [vmem:[%s4178_s22 + $0x720] sm:$0xff]  ;;  %v619_v7 = vld [vmem:[%s4178_s22 + $0xd38] sm:$0xff] }
 0x1f5   : > { %2999 = vmatpush.msra.mxu0 %v372_v9  ;;  %3018 = vmatpush.msra.mxu1 %v593_v10  ;;  %v840_v9 = vld [vmem:[%s4178_s22 + $0x1420] sm:$0xff]  ;;  %v1230_v10 = vld [vmem:[%s4178_s22 + $0x2050] sm:$0xff] }
 0x1f6   : > { %3039 = vmatpush.msra.mxu2 %v788_v11  ;;  %3058 = vmatpush.msra.mxu3 %v1009_v12  ;;  %v1646_v11 = vld [vmem:[%s4178_s22 + $0x2d50] sm:$0xff]  ;;  %v411_v12 = vld [vmem:[%s4178_s22 + $0x6b8] sm:$0xff] }
 0x1f7   : > { %2973 = vmatmul.f32.vlgmr.msrb.gmra.mxu2 %v4349_v18  ;;  %3000 = vmatpush.msra.mxu0 %v359_v13  ;;  %v827_v13 = vld [vmem:[%s4178_s22 + $0x13b8] sm:$0xff] }
 0x1f8   : > { %3019 = vmatpush.msra.mxu1 %v580_v14  ;;  %3040 = vmatpush.msra.mxu2 %v775_v15  ;;  %v1217_v14 = vld [vmem:[%s4178_s22 + $0x1fe8] sm:$0xff]  ;;  %v1438_v15 = vld [vmem:[%s4178_s22 + $0x26d0] sm:$0xff] }
 0x1f9   : > { %3059 = vmatpush.msra.mxu3 %v996_v16  ;;  %2933 = vmatmul.f32.vlgmr.msrb.gmra.mxu0 %v4355_v22  ;;  %v1633_v16 = vld [vmem:[%s4178_s22 + $0x2ce8] sm:$0xff] }
 0x1fa   : > { %2993 = vmatmul.f32.vlgmr.msrb.gmra.mxu3 %v4359_v24  ;;  %3001 = vmatpush.msra.mxu0 %v346_v17  ;;  %v1854_v17 = vld [vmem:[%s4178_s22 + $0x33d0] sm:$0xff] }
 0x1fb   : > { %3020 = vmatpush.msra.mxu1 %v567_v19  ;;  %3041 = vmatpush.msra.mxu2 %v762_v20  ;;  %v1204_v19 = vld [vmem:[%s4178_s22 + $0x1f80] sm:$0xff]  ;;  %v1425_v20 = vld [vmem:[%s4178_s22 + $0x2668] sm:$0xff] }
 0x1fc   : > { %3060 = vmatpush.msra.mxu3 %v983_v21  ;;  %2953 = vmatmul.f32.vlgmr.msrb.gmra.mxu1 %v4366_v28  ;;  %v1620_v21 = vld [vmem:[%s4178_s22 + $0x2c80] sm:$0xff] }
 0x1fd   : > { %3002 = vmatpush.msra.mxu0 %v333_v25  ;;  %3021 = vmatpush.msra.mxu1 %v554_v26  ;;  %v1841_v25 = vld [vmem:[%s4178_s22 + $0x3368] sm:$0xff]  ;;  %v1191_v26 = vld [vmem:[%s4178_s22 + $0x1f18] sm:$0xff] }
 0x1fe   : > { %3042 = vmatpush.msra.mxu2 %v749_v23  ;;  %3061 = vmatpush.msra.mxu3 %v970_v29  ;;  %v1412_v23 = vld [vmem:[%s4178_s22 + $0x2600] sm:$0xff]  ;;  %v1607_v29 = vld [vmem:[%s4178_s22 + $0x2c18] sm:$0xff] }
 0x1ff   : > { %3003 = vmatpush.msra.mxu0 %v320_v30  ;;  %3022 = vmatpush.msra.mxu1 %v541_v31  ;;  %v1828_v30 = vld [vmem:[%s4178_s22 + $0x3300] sm:$0xff]  ;;  %v1178_v31 = vld [vmem:[%s4178_s22 + $0x1eb0] sm:$0xff] }
 0x200   : > { %3043 = vmatpush.msra.mxu2 %v736_v32  ;;  %3062 = vmatpush.msra.mxu3 %v957_v33  ;;  %v1399_v32 = vld [vmem:[%s4178_s22 + $0x2598] sm:$0xff]  ;;  %v1594_v33 = vld [vmem:[%s4178_s22 + $0x2bb0] sm:$0xff] }
 0x201   : > { %3004 = vmatpush.msra.mxu0 %v307_v34  ;;  %3023 = vmatpush.msra.mxu1 %v528_v37  ;;  %v1815_v34 = vld [vmem:[%s4178_s22 + $0x3298] sm:$0xff]  ;;  %v1165_v37 = vld [vmem:[%s4178_s22 + $0x1e48] sm:$0xff] }
 0x202   : > { %3044 = vmatpush.msra.mxu2 %v723_v38  ;;  %3063 = vmatpush.msra.mxu3 %v944_v39  ;;  %v1386_v38 = vld [vmem:[%s4178_s22 + $0x2530] sm:$0xff]  ;;  %v1581_v39 = vld [vmem:[%s4178_s22 + $0x2b48] sm:$0xff] }
 0x203   : > { %3005 = vmatpush.msra.mxu0 %v294_v40  ;;  %3024 = vmatpush.msra.mxu1 %v515_v50  ;;  %v1802_v40 = vld [vmem:[%s4178_s22 + $0x3230] sm:$0xff]  ;;  %v1152_v50 = vld [vmem:[%s4178_s22 + $0x1de0] sm:$0xff] }
 0x204   : > { %3045 = vmatpush.msra.mxu2 %v710_v57  ;;  %3064 = vmatpush.msra.mxu3 %v931_v41  ;;  %v1373_v57 = vld [vmem:[%s4178_s22 + $0x24c8] sm:$0xff]  ;;  %v1568_v41 = vld [vmem:[%s4178_s22 + $0x2ae0] sm:$0xff] }
 0x205   : > { %3006 = vmatpush.msra.mxu0 %v281_v27  ;;  %3025 = vmatpush.msra.mxu1 %v502_v42  ;;  %v1789_v27 = vld [vmem:[%s4178_s22 + $0x31c8] sm:$0xff]  ;;  %v1139_v42 = vld [vmem:[%s4178_s22 + $0x1d78] sm:$0xff] }
 0x206   : > { %3046 = vmatpush.msra.mxu2 %v697_v43  ;;  %3065 = vmatpush.msra.mxu3 %v918_v36  ;;  %v1360_v43 = vld [vmem:[%s4178_s22 + $0x2460] sm:$0xff]  ;;  %v1555_v36 = vld [vmem:[%s4178_s22 + $0x2a78] sm:$0xff] }
 0x207   : > { %3007 = vmatpush.msra.mxu0 %v268_v44  ;;  %3026 = vmatpush.msra.mxu1 %v489_v45  ;;  %v1776_v44 = vld [vmem:[%s4178_s22 + $0x3160] sm:$0xff]  ;;  %v1126_v45 = vld [vmem:[%s4178_s22 + $0x1d10] sm:$0xff] }
 0x208   : > { %3047 = vmatpush.msra.mxu2 %v684_v46  ;;  %3066 = vmatpush.msra.mxu3 %v905_v47  ;;  %v1347_v46 = vld [vmem:[%s4178_s22 + $0x23f8] sm:$0xff]  ;;  %v1542_v47 = vld [vmem:[%s4178_s22 + $0x2a10] sm:$0xff] }
 0x209   : > { %3008 = vmatpush.msra.mxu0 %v255_v35  ;;  %3027 = vmatpush.msra.mxu1 %v476_v51  ;;  %v1763_v35 = vld [vmem:[%s4178_s22 + $0x30f8] sm:$0xff]  ;;  %v1113_v51 = vld [vmem:[%s4178_s22 + $0x1ca8] sm:$0xff] }
 0x20a   : > { %3048 = vmatpush.msra.mxu2 %v671_v48  ;;  %3067 = vmatpush.msra.mxu3 %v892_v60  ;;  %v1334_v48 = vld [vmem:[%s4178_s22 + $0x2390] sm:$0xff]  ;;  %v1529_v60 = vld [vmem:[%s4178_s22 + $0x29a8] sm:$0xff] }
 0x20b   : > { %3009 = vmatpush.msra.mxu0 %v242_v49  ;;  %3028 = vmatpush.msra.mxu1 %v463_v53  ;;  %v1750_v49 = vld [vmem:[%s4178_s22 + $0x3090] sm:$0xff]  ;;  %v1100_v53 = vld [vmem:[%s4178_s22 + $0x1c40] sm:$0xff] }
 0x20c   : > { %3049 = vmatpush.msra.mxu2 %v658_v54  ;;  %3068 = vmatpush.msra.mxu3 %v879_v55  ;;  %v1321_v54 = vld [vmem:[%s4178_s22 + $0x2328] sm:$0xff]  ;;  %v1516_v55 = vld [vmem:[%s4178_s22 + $0x2940] sm:$0xff] }
 0x20d   : > { %3010 = vmatpush.msra.mxu0 %v229_v56  ;;  %3029 = vmatpush.msra.mxu1 %v450_v58  ;;  %v1737_v56 = vld [vmem:[%s4178_s22 + $0x3028] sm:$0xff]  ;;  %v1087_v58 = vld [vmem:[%s4178_s22 + $0x1bd8] sm:$0xff] }
 0x20e   : > { %3050 = vmatpush.msra.mxu2 %v645_v59  ;;  %3069 = vmatpush.msra.mxu3 %v866_v61  ;;  %v1308_v59 = vld [vmem:[%s4178_s22 + $0x22c0] sm:$0xff]  ;;  %v1503_v61 = vld [vmem:[%s4178_s22 + $0x28d8] sm:$0xff] }
 0x20f   : > { %3011 = vmatpush.msra.mxu0 %v216_v63  ;;  %3030 = vmatpush.msra.mxu1 %v437_v0  ;;  %v1724_v63 = vld [vmem:[%s4178_s22 + $0x2fc0] sm:$0xff]  ;;  %v1074_v0 = vld [vmem:[%s4178_s22 + $0x1b70] sm:$0xff] }
 0x210   : > { %3051 = vmatpush.msra.mxu2 %v632_v6  ;;  %3070 = vmatpush.msra.mxu3 %v853_v1  ;;  %v1295_v6 = vld [vmem:[%s4178_s22 + $0x2258] sm:$0xff]  ;;  %v1490_v1 = vld [vmem:[%s4178_s22 + $0x2870] sm:$0xff] }
 0x211   : > { %3012 = vmatpush.msra.mxu0 %v203_v3  ;;  %3031 = vmatpush.msra.mxu1 %v424_v5  ;;  %v1711_v3 = vld [vmem:[%s4178_s22 + $0x2f58] sm:$0xff]  ;;  %v1061_v5 = vld [vmem:[%s4178_s22 + $0x1b08] sm:$0xff] }
 0x212   : > { %3052 = vmatpush.msra.mxu2 %v619_v7  ;;  %3071 = vmatpush.msra.mxu3 %v840_v9  ;;  %v1282_v7 = vld [vmem:[%s4178_s22 + $0x21f0] sm:$0xff]  ;;  %v1477_v9 = vld [vmem:[%s4178_s22 + $0x2808] sm:$0xff] }
 0x213   : > { %3077 = vmatpush.msrb.mxu0 %v1230_v10  ;;  %3032 = vmatpush.msra.mxu1 %v411_v12  ;;  %v1698_v10 = vld [vmem:[%s4178_s22 + $0x2ef0] sm:$0xff]  ;;  %v1269_v12 = vld [vmem:[%s4178_s22 + $0x2188] sm:$0xff] }
 0x214   : > { %3117 = vmatpush.msrb.mxu2 %v1646_v11  ;;  %3072 = vmatpush.msra.mxu3 %v827_v13  ;;  %v1048_v11 = vld [vmem:[%s4178_s22 + $0x1aa0] sm:$0xff] }
 0x215   : > { %3078 = vmatpush.msrb.mxu0 %v1217_v14  ;;  %3097 = vmatpush.msrb.mxu1 %v1438_v15  ;;  %v1464_v13 = vld [vmem:[%s4178_s22 + $0x27a0] sm:$0xff]  ;;  %v1685_v14 = vld [vmem:[%s4178_s22 + $0x2e88] sm:$0xff]  ;;  %v1035_v15 = vld [vmem:[%s4178_s22 + $0x1a38] sm:$0xff] }
 0x216   : > { %3118 = vmatpush.msrb.mxu2 %v1633_v16  ;;  %3137 = vmatpush.msrb.mxu3 %v1854_v17  ;;  %v1256_v16 = vld [vmem:[%s4178_s22 + $0x2120] sm:$0xff]  ;;  %v1451_v17 = vld [vmem:[%s4178_s22 + $0x2738] sm:$0xff] }
 0x217   : > { %3079 = vmatpush.msrb.mxu0 %v1204_v19  ;;  %3098 = vmatpush.msrb.mxu1 %v1425_v20  ;;  %v1672_v19 = vld [vmem:[%s4178_s22 + $0x2e20] sm:$0xff]  ;;  %v399_v20 = vld [vmem:[%s4178_s22 + $0x658] sm:$0xff] }
 0x218   : > { %3119 = vmatpush.msrb.mxu2 %v1620_v21  ;;  %3138 = vmatpush.msrb.mxu3 %v1841_v25  ;;  %v815_v21 = vld [vmem:[%s4178_s22 + $0x1358] sm:$0xff] }
 0x219   : > { %3080 = vmatpush.msrb.mxu0 %v1191_v26  ;;  %3099 = vmatpush.msrb.mxu1 %v1412_v23  ;;  %v1243_v25 = vld [vmem:[%s4178_s22 + $0x20b8] sm:$0xff]  ;;  %v386_v23 = vld [vmem:[%s4178_s22 + $0x5f0] sm:$0xff] }
 0x21a   : > { %3120 = vmatpush.msrb.mxu2 %v1607_v29  ;;  %3139 = vmatpush.msrb.mxu3 %v1828_v30  ;;  %v1659_v26 = vld [vmem:[%s4178_s22 + $0x2db8] sm:$0xff]  ;;  %v802_v30 = vld [vmem:[%s4178_s22 + $0x12f0] sm:$0xff] }
 0x21b   : > { %3081 = vmatpush.msrb.mxu0 %v1178_v31  ;;  %3100 = vmatpush.msrb.mxu1 %v1399_v32  ;;  %v607_v29 = vld [vmem:[%s4178_s22 + $0xcd8] sm:$0xff]  ;;  %v373_v32 = vld [vmem:[%s4178_s22 + $0x588] sm:$0xff] }
 0x21c   : > { %3121 = vmatpush.msrb.mxu2 %v1594_v33  ;;  %3140 = vmatpush.msrb.mxu3 %v1815_v34  ;;  %v1023_v31 = vld [vmem:[%s4178_s22 + $0x19d8] sm:$0xff]  ;;  %v594_v33 = vld [vmem:[%s4178_s22 + $0xc70] sm:$0xff]  ;;  %v789_v34 = vld [vmem:[%s4178_s22 + $0x1288] sm:$0xff] }
 0x21d   : > { %3082 = vmatpush.msrb.mxu0 %v1165_v37  ;;  %3101 = vmatpush.msrb.mxu1 %v1386_v38  ;;  %v1010_v37 = vld [vmem:[%s4178_s22 + $0x1970] sm:$0xff]  ;;  %v360_v38 = vld [vmem:[%s4178_s22 + $0x520] sm:$0xff] }
 0x21e   : > { %3122 = vmatpush.msrb.mxu2 %v1581_v39  ;;  %3141 = vmatpush.msrb.mxu3 %v1802_v40  ;;  %v581_v39 = vld [vmem:[%s4178_s22 + $0xc08] sm:$0xff]  ;;  %v776_v40 = vld [vmem:[%s4178_s22 + $0x1220] sm:$0xff] }
 0x21f   : > { %3083 = vmatpush.msrb.mxu0 %v1152_v50  ;;  %3102 = vmatpush.msrb.mxu1 %v1373_v57  ;;  %v997_v50 = vld [vmem:[%s4178_s22 + $0x1908] sm:$0xff]  ;;  %v347_v57 = vld [vmem:[%s4178_s22 + $0x4b8] sm:$0xff] }
 0x220   : > { %3123 = vmatpush.msrb.mxu2 %v1568_v41  ;;  %3142 = vmatpush.msrb.mxu3 %v1789_v27  ;;  %v568_v41 = vld [vmem:[%s4178_s22 + $0xba0] sm:$0xff]  ;;  %v763_v27 = vld [vmem:[%s4178_s22 + $0x11b8] sm:$0xff] }
 0x221   : > { %3084 = vmatpush.msrb.mxu0 %v1139_v42  ;;  %3103 = vmatpush.msrb.mxu1 %v1360_v43  ;;  %v984_v42 = vld [vmem:[%s4178_s22 + $0x18a0] sm:$0xff]  ;;  %v334_v43 = vld [vmem:[%s4178_s22 + $0x450] sm:$0xff] }
 0x222   : > { %3124 = vmatpush.msrb.mxu2 %v1555_v36  ;;  %3143 = vmatpush.msrb.mxu3 %v1776_v44  ;;  %v555_v36 = vld [vmem:[%s4178_s22 + $0xb38] sm:$0xff]  ;;  %v750_v44 = vld [vmem:[%s4178_s22 + $0x1150] sm:$0xff] }
 0x223   : > { %3085 = vmatpush.msrb.mxu0 %v1126_v45  ;;  %3104 = vmatpush.msrb.mxu1 %v1347_v46  ;;  %v971_v45 = vld [vmem:[%s4178_s22 + $0x1838] sm:$0xff]  ;;  %v321_v46 = vld [vmem:[%s4178_s22 + $0x3e8] sm:$0xff] }
 0x224   : > { %3125 = vmatpush.msrb.mxu2 %v1542_v47  ;;  %3144 = vmatpush.msrb.mxu3 %v1763_v35  ;;  %v542_v47 = vld [vmem:[%s4178_s22 + $0xad0] sm:$0xff]  ;;  %v737_v35 = vld [vmem:[%s4178_s22 + $0x10e8] sm:$0xff] }
 0x225   : > { %3086 = vmatpush.msrb.mxu0 %v1113_v51  ;;  %3105 = vmatpush.msrb.mxu1 %v1334_v48  ;;  %v958_v51 = vld [vmem:[%s4178_s22 + $0x17d0] sm:$0xff]  ;;  %v308_v48 = vld [vmem:[%s4178_s22 + $0x380] sm:$0xff] }
 0x226   : > { %3126 = vmatpush.msrb.mxu2 %v1529_v60  ;;  %3145 = vmatpush.msrb.mxu3 %v1750_v49  ;;  %v529_v60 = vld [vmem:[%s4178_s22 + $0xa68] sm:$0xff]  ;;  %v724_v49 = vld [vmem:[%s4178_s22 + $0x1080] sm:$0xff] }
 0x227   : > { %3087 = vmatpush.msrb.mxu0 %v1100_v53  ;;  %3106 = vmatpush.msrb.mxu1 %v1321_v54  ;;  %v945_v53 = vld [vmem:[%s4178_s22 + $0x1768] sm:$0xff]  ;;  %v295_v54 = vld [vmem:[%s4178_s22 + $0x318] sm:$0xff] }
 0x228   : > { %3127 = vmatpush.msrb.mxu2 %v1516_v55  ;;  %3146 = vmatpush.msrb.mxu3 %v1737_v56  ;;  %v516_v55 = vld [vmem:[%s4178_s22 + $0xa00] sm:$0xff]  ;;  %v711_v56 = vld [vmem:[%s4178_s22 + $0x1018] sm:$0xff] }
 0x229   : > { %3088 = vmatpush.msrb.mxu0 %v1087_v58  ;;  %3107 = vmatpush.msrb.mxu1 %v1308_v59  ;;  %v932_v58 = vld [vmem:[%s4178_s22 + $0x1700] sm:$0xff]  ;;  %v282_v59 = vld [vmem:[%s4178_s22 + $0x2b0] sm:$0xff] }
 0x22a   : > { %3128 = vmatpush.msrb.mxu2 %v1503_v61  ;;  %3147 = vmatpush.msrb.mxu3 %v1724_v63  ;;  %v503_v61 = vld [vmem:[%s4178_s22 + $0x998] sm:$0xff]  ;;  %v698_v63 = vld [vmem:[%s4178_s22 + $0xfb0] sm:$0xff] }
 0x22b   : > { %3053 = vmatmul.f32.vlgmr.msra.gmra.mxu2 %v4317_v62  ;;  %3089 = vmatpush.msrb.mxu0 %v1074_v0  ;;  %v919_v0 = vld [vmem:[%s4178_s22 + $0x1698] sm:$0xff] }
 0x22c   : > { %3108 = vmatpush.msrb.mxu1 %v1295_v6  ;;  %3129 = vmatpush.msrb.mxu2 %v1490_v1  ;;  %v269_v6 = vld [vmem:[%s4178_s22 + $0x248] sm:$0xff]  ;;  %v490_v1 = vld [vmem:[%s4178_s22 + $0x930] sm:$0xff] }
 0x22d   : > { %3148 = vmatpush.msrb.mxu3 %v1711_v3  ;;  %3013 = vmatmul.f32.vlgmr.msra.gmra.mxu0 %v4323_v2  ;;  %v685_v3 = vld [vmem:[%s4178_s22 + $0xf48] sm:$0xff] }
 0x22e   : > { %3073 = vmatmul.f32.vlgmr.msra.gmra.mxu3 %v4327_v4  ;;  %3090 = vmatpush.msrb.mxu0 %v1061_v5  ;;  %v906_v5 = vld [vmem:[%s4178_s22 + $0x1630] sm:$0xff] }
 0x22f   : > { %3109 = vmatpush.msrb.mxu1 %v1282_v7  ;;  %3130 = vmatpush.msrb.mxu2 %v1477_v9  ;;  %v256_v7 = vld [vmem:[%s4178_s22 + $0x1e0] sm:$0xff]  ;;  %v477_v9 = vld [vmem:[%s4178_s22 + $0x8c8] sm:$0xff] }
 0x230   : > { %3149 = vmatpush.msrb.mxu3 %v1698_v10  ;;  %3033 = vmatmul.f32.vlgmr.msra.gmra.mxu1 %v4334_v8  ;;  %v672_v10 = vld [vmem:[%s4178_s22 + $0xee0] sm:$0xff] }
 0x231   : > { %3091 = vmatpush.msrb.mxu0 %v1048_v11  ;;  %3110 = vmatpush.msrb.mxu1 %v1269_v12  ;;  %v893_v11 = vld [vmem:[%s4178_s22 + $0x15c8] sm:$0xff]  ;;  %v243_v12 = vld [vmem:[%s4178_s22 + $0x178] sm:$0xff] }
 0x232   : > { %3131 = vmatpush.msrb.mxu2 %v1464_v13  ;;  %3150 = vmatpush.msrb.mxu3 %v1685_v14  ;;  %v464_v13 = vld [vmem:[%s4178_s22 + $0x860] sm:$0xff]  ;;  %v659_v14 = vld [vmem:[%s4178_s22 + $0xe78] sm:$0xff] }
 0x233   : > { %3092 = vmatpush.msrb.mxu0 %v1035_v15  ;;  %3111 = vmatpush.msrb.mxu1 %v1256_v16  ;;  %v880_v15 = vld [vmem:[%s4178_s22 + $0x1560] sm:$0xff]  ;;  %v230_v16 = vld [vmem:[%s4178_s22 + $0x110] sm:$0xff] }
 0x234   : > { %3132 = vmatpush.msrb.mxu2 %v1451_v17  ;;  %3151 = vmatpush.msrb.mxu3 %v1672_v19  ;;  %v451_v17 = vld [vmem:[%s4178_s22 + $0x7f8] sm:$0xff]  ;;  %v646_v19 = vld [vmem:[%s4178_s22 + $0xe10] sm:$0xff] }
 0x235   : > { %3133 = vmatmul.f32.vlgmr.msrb.gmra.mxu2 %v4349_v18  ;;  %3157 = vmatpush.msra.mxu0 %v399_v20  ;;  %v867_v20 = vld [vmem:[%s4178_s22 + $0x14f8] sm:$0xff] }
 0x236   : > { %3197 = vmatpush.msra.mxu2 %v815_v21  ;;  %3112 = vmatpush.msrb.mxu1 %v1243_v25  ;;  %v217_v21 = vld [vmem:[%s4178_s22 + $0xa8] sm:$0xff]  ;;  %v438_v25 = vld [vmem:[%s4178_s22 + $0x790] sm:$0xff] }
 0x237   : > { %3152 = vmatpush.msrb.mxu3 %v1659_v26  ;;  %3093 = vmatmul.f32.vlgmr.msrb.gmra.mxu0 %v4355_v22  ;;  %v633_v26 = vld [vmem:[%s4178_s22 + $0xda8] sm:$0xff] }
 0x238   : > { %3153 = vmatmul.f32.vlgmr.msrb.gmra.mxu3 %v4359_v24  ;;  %3158 = vmatpush.msra.mxu0 %v386_v23  ;;  %v854_v23 = vld [vmem:[%s4178_s22 + $0x1490] sm:$0xff] }
 0x239   : > { %3177 = vmatpush.msra.mxu1 %v607_v29  ;;  %3198 = vmatpush.msra.mxu2 %v802_v30  ;;  %v204_v29 = vld [vmem:[%s4178_s22 + $0x40] sm:$0xff]  ;;  %v425_v30 = vld [vmem:[%s4178_s22 + $0x728] sm:$0xff] }
 0x23a   : > { %3217 = vmatpush.msra.mxu3 %v1023_v31  ;;  %3113 = vmatmul.f32.vlgmr.msrb.gmra.mxu1 %v4366_v28  ;;  %v620_v31 = vld [vmem:[%s4178_s22 + $0xd40] sm:$0xff] }
 0x23b   : > { %3159 = vmatpush.msra.mxu0 %v373_v32  ;;  %3178 = vmatpush.msra.mxu1 %v594_v33  ;;  %v841_v32 = vld [vmem:[%s4178_s22 + $0x1428] sm:$0xff]  ;;  %v1231_v33 = vld [vmem:[%s4178_s22 + $0x2058] sm:$0xff] }
 0x23c   : > { %3199 = vmatpush.msra.mxu2 %v789_v34  ;;  %3218 = vmatpush.msra.mxu3 %v1010_v37  ;;  %v1647_v34 = vld [vmem:[%s4178_s22 + $0x2d58] sm:$0xff]  ;;  %v412_v37 = vld [vmem:[%s4178_s22 + $0x6c0] sm:$0xff] }
 0x23d   : > { %3160 = vmatpush.msra.mxu0 %v360_v38  ;;  %3179 = vmatpush.msra.mxu1 %v581_v39  ;;  %v828_v38 = vld [vmem:[%s4178_s22 + $0x13c0] sm:$0xff]  ;;  %v1218_v39 = vld [vmem:[%s4178_s22 + $0x1ff0] sm:$0xff] }
 0x23e   : > { %3200 = vmatpush.msra.mxu2 %v776_v40  ;;  %3219 = vmatpush.msra.mxu3 %v997_v50  ;;  %v1439_v40 = vld [vmem:[%s4178_s22 + $0x26d8] sm:$0xff]  ;;  %v1634_v50 = vld [vmem:[%s4178_s22 + $0x2cf0] sm:$0xff] }
 0x23f   : > { %3161 = vmatpush.msra.mxu0 %v347_v57  ;;  %3180 = vmatpush.msra.mxu1 %v568_v41  ;;  %v1855_v57 = vld [vmem:[%s4178_s22 + $0x33d8] sm:$0xff]  ;;  %v1205_v41 = vld [vmem:[%s4178_s22 + $0x1f88] sm:$0xff] }
 0x240   : > { %3201 = vmatpush.msra.mxu2 %v763_v27  ;;  %3220 = vmatpush.msra.mxu3 %v984_v42  ;;  %v1426_v27 = vld [vmem:[%s4178_s22 + $0x2670] sm:$0xff]  ;;  %v1621_v42 = vld [vmem:[%s4178_s22 + $0x2c88] sm:$0xff] }
 0x241   : > { %3162 = vmatpush.msra.mxu0 %v334_v43  ;;  %3181 = vmatpush.msra.mxu1 %v555_v36  ;;  %v1842_v43 = vld [vmem:[%s4178_s22 + $0x3370] sm:$0xff]  ;;  %v1192_v36 = vld [vmem:[%s4178_s22 + $0x1f20] sm:$0xff] }
 0x242   : > { %3202 = vmatpush.msra.mxu2 %v750_v44  ;;  %3221 = vmatpush.msra.mxu3 %v971_v45  ;;  %v1413_v44 = vld [vmem:[%s4178_s22 + $0x2608] sm:$0xff]  ;;  %v1608_v45 = vld [vmem:[%s4178_s22 + $0x2c20] sm:$0xff] }
 0x243   : > { %3163 = vmatpush.msra.mxu0 %v321_v46  ;;  %3182 = vmatpush.msra.mxu1 %v542_v47  ;;  %v1829_v46 = vld [vmem:[%s4178_s22 + $0x3308] sm:$0xff]  ;;  %v1179_v47 = vld [vmem:[%s4178_s22 + $0x1eb8] sm:$0xff] }
 0x244   : > { %3203 = vmatpush.msra.mxu2 %v737_v35  ;;  %3222 = vmatpush.msra.mxu3 %v958_v51  ;;  %v1400_v35 = vld [vmem:[%s4178_s22 + $0x25a0] sm:$0xff]  ;;  %v1595_v51 = vld [vmem:[%s4178_s22 + $0x2bb8] sm:$0xff] }
 0x245   : > { %3164 = vmatpush.msra.mxu0 %v308_v48  ;;  %3183 = vmatpush.msra.mxu1 %v529_v60  ;;  %v1816_v48 = vld [vmem:[%s4178_s22 + $0x32a0] sm:$0xff]  ;;  %v1166_v60 = vld [vmem:[%s4178_s22 + $0x1e50] sm:$0xff] }
 0x246   : > { %3204 = vmatpush.msra.mxu2 %v724_v49  ;;  %3223 = vmatpush.msra.mxu3 %v945_v53  ;;  %v1387_v49 = vld [vmem:[%s4178_s22 + $0x2538] sm:$0xff]  ;;  %v1582_v53 = vld [vmem:[%s4178_s22 + $0x2b50] sm:$0xff] }
 0x247   : > { %3165 = vmatpush.msra.mxu0 %v295_v54  ;;  %3184 = vmatpush.msra.mxu1 %v516_v55  ;;  %v1803_v54 = vld [vmem:[%s4178_s22 + $0x3238] sm:$0xff]  ;;  %v1153_v55 = vld [vmem:[%s4178_s22 + $0x1de8] sm:$0xff] }
 0x248   : > { %3205 = vmatpush.msra.mxu2 %v711_v56  ;;  %3224 = vmatpush.msra.mxu3 %v932_v58  ;;  %v1374_v56 = vld [vmem:[%s4178_s22 + $0x24d0] sm:$0xff]  ;;  %v1569_v58 = vld [vmem:[%s4178_s22 + $0x2ae8] sm:$0xff] }
 0x249   : > { %3166 = vmatpush.msra.mxu0 %v282_v59  ;;  %3185 = vmatpush.msra.mxu1 %v503_v61  ;;  %v1790_v59 = vld [vmem:[%s4178_s22 + $0x31d0] sm:$0xff]  ;;  %v1140_v61 = vld [vmem:[%s4178_s22 + $0x1d80] sm:$0xff] }
 0x24a   : > { %3206 = vmatpush.msra.mxu2 %v698_v63  ;;  %3225 = vmatpush.msra.mxu3 %v919_v0  ;;  %v1361_v63 = vld [vmem:[%s4178_s22 + $0x2468] sm:$0xff]  ;;  %v1556_v0 = vld [vmem:[%s4178_s22 + $0x2a80] sm:$0xff] }
 0x24b   : > { %3167 = vmatpush.msra.mxu0 %v269_v6  ;;  %3186 = vmatpush.msra.mxu1 %v490_v1  ;;  %v1777_v6 = vld [vmem:[%s4178_s22 + $0x3168] sm:$0xff]  ;;  %v1127_v1 = vld [vmem:[%s4178_s22 + $0x1d18] sm:$0xff] }
 0x24c   : > { %3207 = vmatpush.msra.mxu2 %v685_v3  ;;  %3226 = vmatpush.msra.mxu3 %v906_v5  ;;  %v1348_v3 = vld [vmem:[%s4178_s22 + $0x2400] sm:$0xff]  ;;  %v1543_v5 = vld [vmem:[%s4178_s22 + $0x2a18] sm:$0xff] }
 0x24d   : > { %3168 = vmatpush.msra.mxu0 %v256_v7  ;;  %3187 = vmatpush.msra.mxu1 %v477_v9  ;;  %v1764_v7 = vld [vmem:[%s4178_s22 + $0x3100] sm:$0xff]  ;;  %v1114_v9 = vld [vmem:[%s4178_s22 + $0x1cb0] sm:$0xff] }
 0x24e   : > { %3208 = vmatpush.msra.mxu2 %v672_v10  ;;  %3227 = vmatpush.msra.mxu3 %v893_v11  ;;  %v1335_v10 = vld [vmem:[%s4178_s22 + $0x2398] sm:$0xff]  ;;  %v1530_v11 = vld [vmem:[%s4178_s22 + $0x29b0] sm:$0xff] }
 0x24f   : > { %3169 = vmatpush.msra.mxu0 %v243_v12  ;;  %3188 = vmatpush.msra.mxu1 %v464_v13  ;;  %v1751_v12 = vld [vmem:[%s4178_s22 + $0x3098] sm:$0xff]  ;;  %v1101_v13 = vld [vmem:[%s4178_s22 + $0x1c48] sm:$0xff] }
 0x250   : > { %3209 = vmatpush.msra.mxu2 %v659_v14  ;;  %3228 = vmatpush.msra.mxu3 %v880_v15  ;;  %v1322_v14 = vld [vmem:[%s4178_s22 + $0x2330] sm:$0xff]  ;;  %v1517_v15 = vld [vmem:[%s4178_s22 + $0x2948] sm:$0xff] }
 0x251   : > { %3170 = vmatpush.msra.mxu0 %v230_v16  ;;  %3189 = vmatpush.msra.mxu1 %v451_v17  ;;  %v1738_v16 = vld [vmem:[%s4178_s22 + $0x3030] sm:$0xff]  ;;  %v1088_v17 = vld [vmem:[%s4178_s22 + $0x1be0] sm:$0xff] }
 0x252   : > { %3210 = vmatpush.msra.mxu2 %v646_v19  ;;  %3229 = vmatpush.msra.mxu3 %v867_v20  ;;  %v1309_v19 = vld [vmem:[%s4178_s22 + $0x22c8] sm:$0xff]  ;;  %v1504_v20 = vld [vmem:[%s4178_s22 + $0x28e0] sm:$0xff] }
 0x253   : > { %3171 = vmatpush.msra.mxu0 %v217_v21  ;;  %3190 = vmatpush.msra.mxu1 %v438_v25  ;;  %v1725_v21 = vld [vmem:[%s4178_s22 + $0x2fc8] sm:$0xff]  ;;  %v1075_v25 = vld [vmem:[%s4178_s22 + $0x1b78] sm:$0xff] }
 0x254   : > { %3211 = vmatpush.msra.mxu2 %v633_v26  ;;  %3230 = vmatpush.msra.mxu3 %v854_v23  ;;  %v1296_v26 = vld [vmem:[%s4178_s22 + $0x2260] sm:$0xff]  ;;  %v1491_v23 = vld [vmem:[%s4178_s22 + $0x2878] sm:$0xff] }
 0x255   : > { %3172 = vmatpush.msra.mxu0 %v204_v29  ;;  %3191 = vmatpush.msra.mxu1 %v425_v30  ;;  %v1712_v29 = vld [vmem:[%s4178_s22 + $0x2f60] sm:$0xff]  ;;  %v1062_v30 = vld [vmem:[%s4178_s22 + $0x1b10] sm:$0xff] }
 0x256   : > { %3212 = vmatpush.msra.mxu2 %v620_v31  ;;  %3231 = vmatpush.msra.mxu3 %v841_v32  ;;  %v1283_v31 = vld [vmem:[%s4178_s22 + $0x21f8] sm:$0xff]  ;;  %v1478_v32 = vld [vmem:[%s4178_s22 + $0x2810] sm:$0xff] }
 0x257   : > { %3237 = vmatpush.msrb.mxu0 %v1231_v33  ;;  %3192 = vmatpush.msra.mxu1 %v412_v37  ;;  %v1699_v33 = vld [vmem:[%s4178_s22 + $0x2ef8] sm:$0xff]  ;;  %v1270_v37 = vld [vmem:[%s4178_s22 + $0x2190] sm:$0xff] }
 0x258   : > { %3277 = vmatpush.msrb.mxu2 %v1647_v34  ;;  %3232 = vmatpush.msra.mxu3 %v828_v38  ;;  %v1049_v34 = vld [vmem:[%s4178_s22 + $0x1aa8] sm:$0xff] }
 0x259   : > { %3238 = vmatpush.msrb.mxu0 %v1218_v39  ;;  %3257 = vmatpush.msrb.mxu1 %v1439_v40  ;;  %v1465_v38 = vld [vmem:[%s4178_s22 + $0x27a8] sm:$0xff]  ;;  %v1686_v39 = vld [vmem:[%s4178_s22 + $0x2e90] sm:$0xff]  ;;  %v1036_v40 = vld [vmem:[%s4178_s22 + $0x1a40] sm:$0xff] }
 0x25a   : > { %3278 = vmatpush.msrb.mxu2 %v1634_v50  ;;  %3297 = vmatpush.msrb.mxu3 %v1855_v57  ;;  %v1257_v50 = vld [vmem:[%s4178_s22 + $0x2128] sm:$0xff]  ;;  %v1452_v57 = vld [vmem:[%s4178_s22 + $0x2740] sm:$0xff] }
 0x25b   : > { %3239 = vmatpush.msrb.mxu0 %v1205_v41  ;;  %3258 = vmatpush.msrb.mxu1 %v1426_v27  ;;  %v5466_v41 = vpop.f32.mrf.mxu0  ;;  %v1673_v27 = vld [vmem:[%s4178_s22 + $0x2e28] sm:$0xff] }
 0x25c   : > { %3279 = vmatpush.msrb.mxu2 %v1621_v42  ;;  %3298 = vmatpush.msrb.mxu3 %v1842_v43  ;;  %v400_v42 = vld [vmem:[%s4178_s22 + $0x660] sm:$0xff] }
 0x25d   : > { %3240 = vmatpush.msrb.mxu0 %v1192_v36  ;;  %3259 = vmatpush.msrb.mxu1 %v1413_v44  ;;  %v816_v43 = vld [vmem:[%s4178_s22 + $0x1360] sm:$0xff]  ;;  %v5473_v44 = vpop.f32.mrf.mxu1 }
 0x25e   : > { %3280 = vmatpush.msrb.mxu2 %v1608_v45  ;;  %3299 = vmatpush.msrb.mxu3 %v1829_v46  ;;  %v1244_v36 = vld [vmem:[%s4178_s22 + $0x20c0] sm:$0xff]  ;;  %v5477_v46 = vpop.f32.mrf.mxu2 }
 0x25f   : > { %3241 = vmatpush.msrb.mxu0 %v1179_v47  ;;  %3260 = vmatpush.msrb.mxu1 %v1400_v35  ;;  %v1660_v45 = vld [vmem:[%s4178_s22 + $0x2dc0] sm:$0xff]  ;;  %v387_v47 = vld [vmem:[%s4178_s22 + $0x5f8] sm:$0xff] }
 0x260   : > { %3281 = vmatpush.msrb.mxu2 %v1595_v51  ;;  %3300 = vmatpush.msrb.mxu3 %v1816_v48  ;;  %v608_v35 = vld [vmem:[%s4178_s22 + $0xce0] sm:$0xff]  ;;  %v803_v51 = vld [vmem:[%s4178_s22 + $0x12f8] sm:$0xff] }
 0x261   : > { %3242 = vmatpush.msrb.mxu0 %v1166_v60  ;;  %3261 = vmatpush.msrb.mxu1 %v1387_v49  ;;  %v1024_v48 = vld [vmem:[%s4178_s22 + $0x19e0] sm:$0xff]  ;;  %v374_v60 = vld [vmem:[%s4178_s22 + $0x590] sm:$0xff]  ;;  %v595_v49 = vld [vmem:[%s4178_s22 + $0xc78] sm:$0xff] }
 0x262   : > { %3282 = vmatpush.msrb.mxu2 %v1582_v53  ;;  %3301 = vmatpush.msrb.mxu3 %v1803_v54  ;;  %v5487_v53 = vpop.f32.mrf.mxu3  ;;  %v790_v54 = vld [vmem:[%s4178_s22 + $0x1290] sm:$0xff] }
 0x263   : > { %3243 = vmatpush.msrb.mxu0 %v1153_v55  ;;  %3262 = vmatpush.msrb.mxu1 %v1374_v56  ;;  %v1011_v55 = vld [vmem:[%s4178_s22 + $0x1978] sm:$0xff]  ;;  %v361_v56 = vld [vmem:[%s4178_s22 + $0x528] sm:$0xff] }
 0x264   : > { %3283 = vmatpush.msrb.mxu2 %v1569_v58  ;;  %3302 = vmatpush.msrb.mxu3 %v1790_v59  ;;  %v582_v58 = vld [vmem:[%s4178_s22 + $0xc10] sm:$0xff]  ;;  %v777_v59 = vld [vmem:[%s4178_s22 + $0x1228] sm:$0xff] }
 0x265   : > { %3244 = vmatpush.msrb.mxu0 %v1140_v61  ;;  %3263 = vmatpush.msrb.mxu1 %v1361_v63  ;;  %v5494_v61 = vpop.f32.mrf.mxu0  ;;  %v998_v63 = vld [vmem:[%s4178_s22 + $0x1910] sm:$0xff] }
 0x266   : > { %3284 = vmatpush.msrb.mxu2 %v1556_v0  ;;  %3303 = vmatpush.msrb.mxu3 %v1777_v6  ;;  %v348_v0 = vld [vmem:[%s4178_s22 + $0x4c0] sm:$0xff]  ;;  %v569_v6 = vld [vmem:[%s4178_s22 + $0xba8] sm:$0xff] }
 0x267   : > { %3245 = vmatpush.msrb.mxu0 %v1127_v1  ;;  %3264 = vmatpush.msrb.mxu1 %v1348_v3  ;;  %v764_v1 = vld [vmem:[%s4178_s22 + $0x11c0] sm:$0xff]  ;;  %v5501_v3 = vpop.f32.mrf.mxu1 }
 0x268   : > { %3285 = vmatpush.msrb.mxu2 %v1543_v5  ;;  %3304 = vmatpush.msrb.mxu3 %v1764_v7  ;;  %v985_v5 = vld [vmem:[%s4178_s22 + $0x18a8] sm:$0xff]  ;;  %v5505_v7 = vpop.f32.mrf.mxu2 }
 0x269   : > { %3246 = vmatpush.msrb.mxu0 %v1114_v9  ;;  %3265 = vmatpush.msrb.mxu1 %v1335_v10  ;;  %v335_v9 = vld [vmem:[%s4178_s22 + $0x458] sm:$0xff]  ;;  %v556_v10 = vld [vmem:[%s4178_s22 + $0xb40] sm:$0xff] }
 0x26a   : > { %3286 = vmatpush.msrb.mxu2 %v1530_v11  ;;  %3305 = vmatpush.msrb.mxu3 %v1751_v12  ;;  %v751_v11 = vld [vmem:[%s4178_s22 + $0x1158] sm:$0xff]  ;;  %v972_v12 = vld [vmem:[%s4178_s22 + $0x1840] sm:$0xff] }
 0x26b   : > { %3247 = vmatpush.msrb.mxu0 %v1101_v13  ;;  %3266 = vmatpush.msrb.mxu1 %v1322_v14  ;;  %v322_v13 = vld [vmem:[%s4178_s22 + $0x3f0] sm:$0xff]  ;;  %v543_v14 = vld [vmem:[%s4178_s22 + $0xad8] sm:$0xff] }
 0x26c   : > { %3287 = vmatpush.msrb.mxu2 %v1517_v15  ;;  %3306 = vmatpush.msrb.mxu3 %v1738_v16  ;;  %v5515_v15 = vpop.f32.mrf.mxu3  ;;  %v738_v16 = vld [vmem:[%s4178_s22 + $0x10f0] sm:$0xff] }
 0x26d   : > { %3248 = vmatpush.msrb.mxu0 %v1088_v17  ;;  %3267 = vmatpush.msrb.mxu1 %v1309_v19  ;;  %v959_v17 = vld [vmem:[%s4178_s22 + $0x17d8] sm:$0xff]  ;;  %v5519_v19 = vpop.f32.mrf.mxu0 }
 0x26e   : > { %3288 = vmatpush.msrb.mxu2 %v1504_v20  ;;  %3307 = vmatpush.msrb.mxu3 %v1725_v21  ;;  %v309_v20 = vld [vmem:[%s4178_s22 + $0x388] sm:$0xff]  ;;  %v530_v21 = vld [vmem:[%s4178_s22 + $0xa70] sm:$0xff] }
 0x26f   : > { %3249 = vmatpush.msrb.mxu0 %v1075_v25  ;;  %3268 = vmatpush.msrb.mxu1 %v1296_v26  ;;  %v725_v25 = vld [vmem:[%s4178_s22 + $0x1088] sm:$0xff]  ;;  %v946_v26 = vld [vmem:[%s4178_s22 + $0x1770] sm:$0xff] }
 0x270   : > { %3289 = vmatpush.msrb.mxu2 %v1491_v23  ;;  %3308 = vmatpush.msrb.mxu3 %v1712_v29  ;;  %v296_v23 = vld [vmem:[%s4178_s22 + $0x320] sm:$0xff]  ;;  %v517_v29 = vld [vmem:[%s4178_s22 + $0xa08] sm:$0xff] }
 0x271   : > { %3250 = vmatpush.msrb.mxu0 %v1062_v30  ;;  %3269 = vmatpush.msrb.mxu1 %v1283_v31  ;;  %v5527_v30 = vpop.f32.mrf.mxu1  ;;  %v712_v31 = vld [vmem:[%s4178_s22 + $0x1020] sm:$0xff] }
 0x272   : > { %3290 = vmatpush.msrb.mxu2 %v1478_v32  ;;  %3309 = vmatpush.msrb.mxu3 %v1699_v33  ;;  %v933_v32 = vld [vmem:[%s4178_s22 + $0x1708] sm:$0xff]  ;;  %v5531_v33 = vpop.f32.mrf.mxu2 }
 0x273   : > { %3251 = vmatpush.msrb.mxu0 %v1049_v34  ;;  %3270 = vmatpush.msrb.mxu1 %v1270_v37  ;;  %v283_v34 = vld [vmem:[%s4178_s22 + $0x2b8] sm:$0xff]  ;;  %v504_v37 = vld [vmem:[%s4178_s22 + $0x9a0] sm:$0xff] }
 0x274   : > { %3291 = vmatpush.msrb.mxu2 %v1465_v38  ;;  %3310 = vmatpush.msrb.mxu3 %v1686_v39  ;;  %v699_v38 = vld [vmem:[%s4178_s22 + $0xfb8] sm:$0xff]  ;;  %v920_v39 = vld [vmem:[%s4178_s22 + $0x16a0] sm:$0xff] }
 0x275   : > { %3213 = vmatmul.f32.vlgmr.msra.gmra.mxu2 %v4317_v62  ;;  %3252 = vmatpush.msrb.mxu0 %v1036_v40  ;;  %v270_v40 = vld [vmem:[%s4178_s22 + $0x250] sm:$0xff] }
 0x276   : > { %3271 = vmatpush.msrb.mxu1 %v1257_v50  ;;  %3292 = vmatpush.msrb.mxu2 %v1452_v57  ;;  %v491_v50 = vld [vmem:[%s4178_s22 + $0x938] sm:$0xff]  ;;  %v5539_v57 = vpop.f32.mrf.mxu3 }
 0x277   : > { %3311 = vmatpush.msrb.mxu3 %v1673_v27  ;;  %3173 = vmatmul.f32.vlgmr.msra.gmra.mxu0 %v4323_v2  ;;  %v686_v27 = vld [vmem:[%s4178_s22 + $0xf50] sm:$0xff] }
 0x278   : > { %3233 = vmatmul.f32.vlgmr.msra.gmra.mxu3 %v4327_v4  ;;  %3317 = vmatpush.msra.mxu0 %v400_v42  ;;  %v907_v42 = vld [vmem:[%s4178_s22 + $0x1638] sm:$0xff] }
 0x279   : > { %3357 = vmatpush.msra.mxu2 %v816_v43  ;;  %3272 = vmatpush.msrb.mxu1 %v1244_v36  ;;  %v257_v43 = vld [vmem:[%s4178_s22 + $0x1e8] sm:$0xff]  ;;  %v478_v36 = vld [vmem:[%s4178_s22 + $0x8d0] sm:$0xff] }
 0x27a   : > { %3312 = vmatpush.msrb.mxu3 %v1660_v45  ;;  %3193 = vmatmul.f32.vlgmr.msra.gmra.mxu1 %v4334_v8  ;;  %v673_v45 = vld [vmem:[%s4178_s22 + $0xee8] sm:$0xff] }
 0x27b   : > { %3318 = vmatpush.msra.mxu0 %v387_v47  ;;  %3337 = vmatpush.msra.mxu1 %v608_v35  ;;  %v894_v47 = vld [vmem:[%s4178_s22 + $0x15d0] sm:$0xff]  ;;  %v5547_v35 = vpop.f32.mrf.mxu0 }
 0x27c   : > { %3358 = vmatpush.msra.mxu2 %v803_v51  ;;  %3377 = vmatpush.msra.mxu3 %v1024_v48  ;;  %v244_v51 = vld [vmem:[%s4178_s22 + $0x180] sm:$0xff]  ;;  %v465_v48 = vld [vmem:[%s4178_s22 + $0x868] sm:$0xff] }
 0x27d   : > { %3319 = vmatpush.msra.mxu0 %v374_v60  ;;  %3338 = vmatpush.msra.mxu1 %v595_v49  ;;  %v660_v60 = vld [vmem:[%s4178_s22 + $0xe80] sm:$0xff]  ;;  %v881_v49 = vld [vmem:[%s4178_s22 + $0x1568] sm:$0xff] }
 0x27e   : > { %3359 = vmatpush.msra.mxu2 %v790_v54  ;;  %3378 = vmatpush.msra.mxu3 %v1011_v55  ;;  %v231_v54 = vld [vmem:[%s4178_s22 + $0x118] sm:$0xff]  ;;  %v452_v55 = vld [vmem:[%s4178_s22 + $0x800] sm:$0xff] }
 0x27f   : > { %3293 = vmatmul.f32.vlgmr.msrb.gmra.mxu2 %v4349_v18  ;;  %3320 = vmatpush.msra.mxu0 %v361_v56  ;;  %v5555_v56 = vpop.f32.mrf.mxu1 }
 0x280   : > { %3339 = vmatpush.msra.mxu1 %v582_v58  ;;  %3360 = vmatpush.msra.mxu2 %v777_v59  ;;  %v647_v58 = vld [vmem:[%s4178_s22 + $0xe18] sm:$0xff]  ;;  %v868_v59 = vld [vmem:[%s4178_s22 + $0x1500] sm:$0xff] }
 0x281   : > { %3379 = vmatpush.msra.mxu3 %v998_v63  ;;  %3253 = vmatmul.f32.vlgmr.msrb.gmra.mxu0 %v4355_v22  ;;  %v5559_v63 = vpop.f32.mrf.mxu2 }
 0x282   : > { %3313 = vmatmul.f32.vlgmr.msrb.gmra.mxu3 %v4359_v24  ;;  %3321 = vmatpush.msra.mxu0 %v348_v0  ;;  %v218_v0 = vld [vmem:[%s4178_s22 + $0xb0] sm:$0xff] }
 0x283   : > { %3340 = vmatpush.msra.mxu1 %v569_v6  ;;  %3361 = vmatpush.msra.mxu2 %v764_v1  ;;  %v439_v6 = vld [vmem:[%s4178_s22 + $0x798] sm:$0xff]  ;;  %v634_v1 = vld [vmem:[%s4178_s22 + $0xdb0] sm:$0xff] }
 0x284   : > { %3380 = vmatpush.msra.mxu3 %v985_v5  ;;  %3273 = vmatmul.f32.vlgmr.msrb.gmra.mxu1 %v4366_v28  ;;  %v855_v5 = vld [vmem:[%s4178_s22 + $0x1498] sm:$0xff] }
 0x285   : > { %3322 = vmatpush.msra.mxu0 %v335_v9  ;;  %3341 = vmatpush.msra.mxu1 %v556_v10  ;;  %v205_v9 = vld [vmem:[%s4178_s22 + $0x48] sm:$0xff]  ;;  %v426_v10 = vld [vmem:[%s4178_s22 + $0x730] sm:$0xff] }
 0x286   : > { %3362 = vmatpush.msra.mxu2 %v751_v11  ;;  %3381 = vmatpush.msra.mxu3 %v972_v12  ;;  %v5567_v11 = vpop.f32.mrf.mxu3  ;;  %v621_v12 = vld [vmem:[%s4178_s22 + $0xd48] sm:$0xff] }
 0x287   : > { %3323 = vmatpush.msra.mxu0 %v322_v13  ;;  %3342 = vmatpush.msra.mxu1 %v543_v14  ;;  %v842_v13 = vld [vmem:[%s4178_s22 + $0x1430] sm:$0xff]  ;;  %v2854_v14 = vpop.f32.mrf.mxu0 }
 0x288   : > { %3363 = vmatpush.msra.mxu2 %v738_v16  ;;  %3382 = vmatpush.msra.mxu3 %v959_v17  ;;  %v1232_v16 = vld [vmem:[%s4178_s22 + $0x2060] sm:$0xff] }
 0x289   : > { %3324 = vmatpush.msra.mxu0 %v309_v20  ;;  %3343 = vmatpush.msra.mxu1 %v530_v21  ;;  %v1648_v17 = vld [vmem:[%s4178_s22 + $0x2d60] sm:$0xff]  ;;  %v413_v20 = vld [vmem:[%s4178_s22 + $0x6c8] sm:$0xff] }
 0x28a   : > { %3364 = vmatpush.msra.mxu2 %v725_v25  ;;  %3383 = vmatpush.msra.mxu3 %v946_v26  ;;  %v829_v21 = vld [vmem:[%s4178_s22 + $0x13c8] sm:$0xff]  ;;  %v1219_v25 = vld [vmem:[%s4178_s22 + $0x1ff8] sm:$0xff]  ;;  %v1440_v26 = vld [vmem:[%s4178_s22 + $0x26e0] sm:$0xff] }
 0x28b   : > { %3325 = vmatpush.msra.mxu0 %v296_v23  ;;  %3344 = vmatpush.msra.mxu1 %v517_v29  ;;  %v2874_v23 = vpop.f32.mrf.mxu1  ;;  %v1635_v29 = vld [vmem:[%s4178_s22 + $0x2cf8] sm:$0xff] }
 0x28c   : > { %3365 = vmatpush.msra.mxu2 %v712_v31  ;;  %3384 = vmatpush.msra.mxu3 %v933_v32  ;;  %v1856_v31 = vld [vmem:[%s4178_s22 + $0x33e0] sm:$0xff]  ;;  %v2894_v32 = vpop.f32.mrf.mxu2 }
 0x28d   : > { %3326 = vmatpush.msra.mxu0 %v283_v34  ;;  %3345 = vmatpush.msra.mxu1 %v504_v37  ;;  %v1206_v34 = vld [vmem:[%s4178_s22 + $0x1f90] sm:$0xff]  ;;  %v1427_v37 = vld [vmem:[%s4178_s22 + $0x2678] sm:$0xff] }
 0x28e   : > { %3366 = vmatpush.msra.mxu2 %v699_v38  ;;  %3385 = vmatpush.msra.mxu3 %v920_v39  ;;  %v1622_v38 = vld [vmem:[%s4178_s22 + $0x2c90] sm:$0xff]  ;;  %v1843_v39 = vld [vmem:[%s4178_s22 + $0x3378] sm:$0xff] }
 0x28f   : > { %3327 = vmatpush.msra.mxu0 %v270_v40  ;;  %3346 = vmatpush.msra.mxu1 %v491_v50  ;;  %v1193_v40 = vld [vmem:[%s4178_s22 + $0x1f28] sm:$0xff]  ;;  %v1414_v50 = vld [vmem:[%s4178_s22 + $0x2610] sm:$0xff] }
 0x290   : > { %3367 = vmatpush.msra.mxu2 %v686_v27  ;;  %3386 = vmatpush.msra.mxu3 %v907_v42  ;;  %v2914_v27 = vpop.f32.mrf.mxu3  ;;  %v1609_v42 = vld [vmem:[%s4178_s22 + $0x2c28] sm:$0xff] }
 0x291   : > { %3328 = vmatpush.msra.mxu0 %v257_v43  ;;  %3347 = vmatpush.msra.mxu1 %v478_v36  ;;  %v1830_v43 = vld [vmem:[%s4178_s22 + $0x3310] sm:$0xff]  ;;  %v2715_v36 = vadd.f32 %v5527_v30, %v5519_v19  ;;  %v1167_v19 = vld [vmem:[%s4178_s22 + $0x1e58] sm:$0xff]  ;;  %v1388_v30 = vld [vmem:[%s4178_s22 + $0x2540] sm:$0xff] }
 0x292   : > { %3368 = vmatpush.msra.mxu2 %v673_v45  ;;  %3387 = vmatpush.msra.mxu3 %v894_v47  ;;  %v1180_v45 = vld [vmem:[%s4178_s22 + $0x1ec0] sm:$0xff]  ;;  %v1401_v47 = vld [vmem:[%s4178_s22 + $0x25a8] sm:$0xff] }
 0x293   : > { %3329 = vmatpush.msra.mxu0 %v244_v51  ;;  %3348 = vmatpush.msra.mxu1 %v465_v48  ;;  %v1596_v51 = vld [vmem:[%s4178_s22 + $0x2bc0] sm:$0xff]  ;;  %v1817_v48 = vld [vmem:[%s4178_s22 + $0x32a8] sm:$0xff] }
 0x294   : > { %3369 = vmatpush.msra.mxu2 %v660_v60  ;;  %3388 = vmatpush.msra.mxu3 %v881_v49  ;;  %v2555_v60 = vadd.f32 %v5473_v44, %v5466_v41  ;;  %v2875_v49 = vadd.f32 %v2874_v23, %v2854_v14  ;;  %v1375_v41 = vld [vmem:[%s4178_s22 + $0x24d8] sm:$0xff]  ;;  %v5602_v44 = vpop.f32.mrf.mxu1  ;;  %v1778_v14 = vld [vmem:[%s4178_s22 + $0x3170] sm:$0xff] }
 0x295   : > { %3330 = vmatpush.msra.mxu0 %v231_v54  ;;  %3349 = vmatpush.msra.mxu1 %v452_v55  ;;  %v2934_v54 = vpop.f32.mrf.mxu0  ;;  %v1583_v55 = vld [vmem:[%s4178_s22 + $0x2b58] sm:$0xff] }
 0x296   : > { %3370 = vmatpush.msra.mxu2 %v647_v58  ;;  %3389 = vmatpush.msra.mxu3 %v868_v59  ;;  %v1804_v58 = vld [vmem:[%s4178_s22 + $0x3240] sm:$0xff]  ;;  %v2735_v59 = vadd.f32 %v5531_v33, %v2715_v36  ;;  %v1141_v33 = vld [vmem:[%s4178_s22 + $0x1d88] sm:$0xff] }
 0x297   : > { %3331 = vmatpush.msra.mxu0 %v218_v0  ;;  %3350 = vmatpush.msra.mxu1 %v439_v6  ;;  %v1154_v0 = vld [vmem:[%s4178_s22 + $0x1df0] sm:$0xff] }
 0x298   : > { %3371 = vmatpush.msra.mxu2 %v634_v1  ;;  %3390 = vmatpush.msra.mxu3 %v855_v5  ;;  %v1570_v6 = vld [vmem:[%s4178_s22 + $0x2af0] sm:$0xff]  ;;  %v1791_v1 = vld [vmem:[%s4178_s22 + $0x31d8] sm:$0xff]  ;;  %v2575_v5 = vadd.f32 %v5477_v46, %v2555_v60  ;;  %v1128_v46 = vld [vmem:[%s4178_s22 + $0x1d20] sm:$0xff] }
 0x299   : > { %3332 = vmatpush.msra.mxu0 %v205_v9  ;;  %3351 = vmatpush.msra.mxu1 %v426_v10  ;;  %v2895_v9 = vadd.f32 %v2894_v32, %v2875_v49  ;;  %v5607_v10 = vpop.f32.mrf.mxu2  ;;  %v1531_v32 = vld [vmem:[%s4178_s22 + $0x29b8] sm:$0xff]  ;;  %v1297_v49 = vld [vmem:[%s4178_s22 + $0x2268] sm:$0xff] }
 0x29a   : > { %3372 = vmatpush.msra.mxu2 %v621_v12  ;;  %3391 = vmatpush.msra.mxu3 %v842_v13  ;;  %v1362_v12 = vld [vmem:[%s4178_s22 + $0x2470] sm:$0xff]  ;;  %v1557_v13 = vld [vmem:[%s4178_s22 + $0x2a88] sm:$0xff] }
 0x29b   : > { %3397 = vmatpush.msrb.mxu0 %v1232_v16  ;;  %3352 = vmatpush.msra.mxu1 %v413_v20  ;;  %v2755_v16 = vadd.f32 %v5539_v57, %v2735_v59  ;;  %v5616_v20 = vpop.f32.mrf.mxu3  ;;  %v2915_v23 = vadd.f32 %v2914_v27, %v2895_v9  ;;  %v1115_v57 = vld [vmem:[%s4178_s22 + $0x1cb8] sm:$0xff] }
 0x29c   : > { %3437 = vmatpush.msrb.mxu2 %v1648_v17  ;;  %3392 = vmatpush.msra.mxu3 %v829_v21  ;;  %v1349_v17 = vld [vmem:[%s4178_s22 + $0x2408] sm:$0xff]  ;;  %v1544_v21 = vld [vmem:[%s4178_s22 + $0x2a20] sm:$0xff]  ;;  %v1063_v59 = vld [vmem:[%s4178_s22 + $0x1b18] sm:$0xff] }
 0x29d   : > { %3398 = vmatpush.msrb.mxu0 %v1219_v25  ;;  %3417 = vmatpush.msrb.mxu1 %v1440_v26  ;;  %v1765_v25 = vld [vmem:[%s4178_s22 + $0x3108] sm:$0xff]  ;;  %v2595_v26 = vadd.f32 %v5487_v53, %v2575_v5  ;;  %v1323_v53 = vld [vmem:[%s4178_s22 + $0x2338] sm:$0xff] }
 0x29e   : > { %3438 = vmatpush.msrb.mxu2 %v1635_v29  ;;  %3457 = vmatpush.msrb.mxu3 %v1856_v31  ;;  %v1336_v29 = vld [vmem:[%s4178_s22 + $0x23a0] sm:$0xff] }
 0x29f   : > { %3399 = vmatpush.msrb.mxu0 %v1206_v34  ;;  %3418 = vmatpush.msrb.mxu1 %v1427_v37  ;;  %v1752_v34 = vld [vmem:[%s4178_s22 + $0x30a0] sm:$0xff]  ;;  %v2775_v37 = vadd.f32 %v5547_v35, %v2755_v16  ;;  %v2615_v27 = vadd.f32 %v5494_v61, %v2595_v26  ;;  %v1310_v35 = vld [vmem:[%s4178_s22 + $0x22d0] sm:$0xff] }
 0x2a0   : > { %3439 = vmatpush.msrb.mxu2 %v1622_v38  ;;  %3458 = vmatpush.msrb.mxu3 %v1843_v39  ;;  %v1102_v38 = vld [vmem:[%s4178_s22 + $0x1c50] sm:$0xff]  ;;  %v1076_v61 = vld [vmem:[%s4178_s22 + $0x1b80] sm:$0xff] }
 0x2a1   : > { %3400 = vmatpush.msrb.mxu0 %v1193_v40  ;;  %3419 = vmatpush.msrb.mxu1 %v1414_v50  ;;  %v1518_v39 = vld [vmem:[%s4178_s22 + $0x2950] sm:$0xff]  ;;  %v1739_v40 = vld [vmem:[%s4178_s22 + $0x3038] sm:$0xff] }
 0x2a2   : > { %3440 = vmatpush.msrb.mxu2 %v1609_v42  ;;  %3459 = vmatpush.msrb.mxu3 %v1830_v43  ;;  %v2935_v42 = vadd.f32 %v2934_v54, %v2915_v23  ;;  %v1089_v43 = vld [vmem:[%s4178_s22 + $0x1be8] sm:$0xff]  ;;  %v1492_v54 = vld [vmem:[%s4178_s22 + $0x2880] sm:$0xff] }
 0x2a3   : > { %3401 = vmatpush.msrb.mxu0 %v1180_v45  ;;  %3420 = vmatpush.msrb.mxu1 %v1401_v47  ;;  %v1505_v47 = vld [vmem:[%s4178_s22 + $0x28e8] sm:$0xff] }
 0x2a4   : > { %3441 = vmatpush.msrb.mxu2 %v1596_v51  ;;  %3460 = vmatpush.msrb.mxu3 %v1817_v48  ;;  %v1726_v51 = vld [vmem:[%s4178_s22 + $0x2fd0] sm:$0xff]  ;;  %v2795_v48 = vadd.f32 %v5555_v56, %v2775_v37  ;;  %v1713_v56 = vld [vmem:[%s4178_s22 + $0x2f68] sm:$0xff] }
 0x2a5   : > { %3402 = vmatpush.msrb.mxu0 %v1167_v19  ;;  %3421 = vmatpush.msrb.mxu1 %v1388_v30  ;;  %v2635_v30 = vadd.f32 %v5501_v3, %v2615_v27  ;;  %v1479_v3 = vld [vmem:[%s4178_s22 + $0x2818] sm:$0xff]  ;;  %v1661_v37 = vld [vmem:[%s4178_s22 + $0x2dc8] sm:$0xff] }
 0x2a6   : > { %3442 = vmatpush.msrb.mxu2 %v1583_v55  ;;  %3461 = vmatpush.msrb.mxu3 %v1804_v58  ;;  %v2955_v55 = vadd.f32 %v5602_v44, %v2935_v42  ;;  %v1025_v27 = vld [vmem:[%s4178_s22 + $0x19e8] sm:$0xff] }
 0x2a7   : > { %3403 = vmatpush.msrb.mxu0 %v1154_v0  ;;  %3422 = vmatpush.msrb.mxu1 %v1375_v41  ;;  %v2815_v0 = vadd.f32 %v5559_v63, %v2795_v48  ;;  %v1284_v41 = vld [vmem:[%s4178_s22 + $0x2200] sm:$0xff]  ;;  %v2655_v5 = vadd.f32 %v5505_v7, %v2635_v30  ;;  %v1050_v63 = vld [vmem:[%s4178_s22 + $0x1ab0] sm:$0xff]  ;;  %v1037_v7 = vld [vmem:[%s4178_s22 + $0x1a48] sm:$0xff] }
 0x2a8   : > { %3443 = vmatpush.msrb.mxu2 %v1570_v6  ;;  %3462 = vmatpush.msrb.mxu3 %v1791_v1  ;;  %v1700_v6 = vld [vmem:[%s4178_s22 + $0x2f00] sm:$0xff]  ;;  %v2975_v9 = vadd.f32 %v5607_v10, %v2955_v55  ;;  %v1258_v10 = vld [vmem:[%s4178_s22 + $0x2130] sm:$0xff]  ;;  %v349_v55 = vld [vmem:[%s4178_s22 + $0x4c8] sm:$0xff] }
 0x2a9   : > { %3404 = vmatpush.msrb.mxu0 %v1141_v33  ;;  %3423 = vmatpush.msrb.mxu1 %v1362_v12  ;;  %v1271_v33 = vld [vmem:[%s4178_s22 + $0x2198] sm:$0xff]  ;;  %v1466_v12 = vld [vmem:[%s4178_s22 + $0x27b0] sm:$0xff]  ;;  %v2835_v16 = vadd.f32 %v5567_v11, %v2815_v0  ;;  %v2675_v26 = vadd.f32 %v5515_v15, %v2655_v5  ;;  %v401_v11 = vld [vmem:[%s4178_s22 + $0x668] sm:$0xff] }
 0x2aa   : > { %3444 = vmatpush.msrb.mxu2 %v1557_v13  ;;  %3463 = vmatpush.msrb.mxu3 %v1778_v14  ;;  %v3014_v31 = vpop.f32.mrf.mxu0  ;;  %v1687_v13 = vld [vmem:[%s4178_s22 + $0x2e98] sm:$0xff]  ;;  %v2995_v23 = vadd.f32 %v5616_v20, %v2975_v9  ;;  %v388_v15 = vld [vmem:[%s4178_s22 + $0x600] sm:$0xff]  ;;  %v557_v0 = vld [vmem:[%s4178_s22 + $0xb48] sm:$0xff] }
 0x2ab   : > { %3405 = vmatpush.msrb.mxu0 %v1128_v46  ;;  %3424 = vmatpush.msrb.mxu1 %v1349_v17  ;;  %v3973_v20 = vrot.slane %v2675_v26, 4  ;;  %v960_v5 = vld [vmem:[%s4178_s22 + $0x17e0] sm:$0xff]  ;;  %v310_v9 = vld [vmem:[%s4178_s22 + $0x390] sm:$0xff] }
 0x2ac   : > { %3445 = vmatpush.msrb.mxu2 %v1544_v21  ;;  %3464 = vmatpush.msrb.mxu3 %v1765_v25  ;;  %v1453_v21 = vld [vmem:[%s4178_s22 + $0x2748] sm:$0xff]  ;;  %v1674_v25 = vld [vmem:[%s4178_s22 + $0x2e30] sm:$0xff]  ;;  %v492_v26 = vld [vmem:[%s4178_s22 + $0x940] sm:$0xff] }
 0x2ad   : > { %3406 = vmatpush.msrb.mxu0 %v1115_v57  ;;  %3425 = vmatpush.msrb.mxu1 %v1336_v29  ;;  %v3034_v50 = vpop.f32.mrf.mxu1  ;;  %v817_v29 = vld [vmem:[%s4178_s22 + $0x1368] sm:$0xff] }
 0x2ae   : > { %3446 = vmatpush.msrb.mxu2 %v1531_v32  ;;  %3465 = vmatpush.msrb.mxu3 %v1752_v34  ;;  %v3035_v36 = vadd.f32 %v3034_v50, %v3014_v31  ;;  %v3054_v45 = vpop.f32.mrf.mxu2  ;;  %v1245_v31 = vld [vmem:[%s4178_s22 + $0x20c8] sm:$0xff]  ;;  %v3974_v34 = vrot.slane %v2835_v16, 3 }
 0x2af   : > { %3407 = vmatpush.msrb.mxu0 %v1102_v38  ;;  %3426 = vmatpush.msrb.mxu1 %v1323_v53  ;;  %v3975_v53 = vrot.slane %v2995_v23, 2  ;;  %v713_v16 = vld [vmem:[%s4178_s22 + $0x1028] sm:$0xff]  ;;  %v687_v23 = vld [vmem:[%s4178_s22 + $0xf58] sm:$0xff] }
 0x2b0   : > { %3447 = vmatpush.msrb.mxu2 %v1518_v39  ;;  %3466 = vmatpush.msrb.mxu3 %v1739_v40  ;;  %v3055_v60 = vadd.f32 %v3054_v45, %v3035_v36  ;;  %v609_v39 = vld [vmem:[%s4178_s22 + $0xce8] sm:$0xff]  ;;  %v804_v40 = vld [vmem:[%s4178_s22 + $0x1300] sm:$0xff]  ;;  %v3988_v42 = vsel %vm3987_vm4, %v3973_v20, %v3974_v34 }
 0x2b1   : > { %3408 = vmatpush.msrb.mxu0 %v1089_v43  ;;  %3427 = vmatpush.msrb.mxu1 %v1310_v35  ;;  %v3074_v19 = vpop.f32.mrf.mxu3  ;;  %v375_v43 = vld [vmem:[%s4178_s22 + $0x598] sm:$0xff]  ;;  %v596_v35 = vld [vmem:[%s4178_s22 + $0xc80] sm:$0xff]  ;;  %v245_v34 = vld [vmem:[%s4178_s22 + $0x188] sm:$0xff] }
 0x2b2   : > { %3448 = vmatpush.msrb.mxu2 %v1505_v47  ;;  %3467 = vmatpush.msrb.mxu3 %v1726_v51  ;;  %v3075_v58 = vadd.f32 %v3074_v19, %v3055_v60  ;;  %v193_v45 = vld [vmem:[#allocation2] sm:$0xff]  ;;  %v791_v47 = vld [vmem:[%s4178_s22 + $0x1298] sm:$0xff] }
 0x2b3   : > { %3373 = vmatmul.f32.vlgmr.msra.gmra.mxu2 %v4317_v62  ;;  %3409 = vmatpush.msrb.mxu0 %v1076_v61  ;;  %v1012_v51 = vld [vmem:[%s4178_s22 + $0x1980] sm:$0xff]  ;;  %v362_v61 = vld [vmem:[%s4178_s22 + $0x530] sm:$0xff]  ;;  %v583_v60 = vld [vmem:[%s4178_s22 + $0xc18] sm:$0xff] }
 0x2b4   : > { %3428 = vmatpush.msrb.mxu1 %v1297_v49  ;;  %3449 = vmatpush.msrb.mxu2 %v1492_v54  ;;  %v3094_v44 = vpop.f32.mrf.mxu0  ;;  %v778_v54 = vld [vmem:[%s4178_s22 + $0x1230] sm:$0xff]  ;;  %v999_v19 = vld [vmem:[%s4178_s22 + $0x1918] sm:$0xff]  ;;  %v232_v20 = vld [vmem:[%s4178_s22 + $0x120] sm:$0xff] }
 0x2b5   : > { %3468 = vmatpush.msrb.mxu3 %v1713_v56  ;;  %3333 = vmatmul.f32.vlgmr.msra.gmra.mxu0 %v4323_v2  ;;  %v3095_v1 = vadd.f32 %v3094_v44, %v3075_v58  ;;  %v570_v56 = vld [vmem:[%s4178_s22 + $0xbb0] sm:$0xff]  ;;  %v765_v58 = vld [vmem:[%s4178_s22 + $0x11c8] sm:$0xff]  ;;  %v323_v44 = vld [vmem:[%s4178_s22 + $0x3f8] sm:$0xff] }
 0x2b6   : > { %3393 = vmatmul.f32.vlgmr.msra.gmra.mxu3 %v4327_v4  ;;  %3410 = vmatpush.msrb.mxu0 %v1063_v59  ;;  %v986_v59 = vld [vmem:[%s4178_s22 + $0x18b0] sm:$0xff] }
 0x2b7   : > { %3429 = vmatpush.msrb.mxu1 %v1284_v41  ;;  %3450 = vmatpush.msrb.mxu2 %v1479_v3  ;;  %v3114_v14 = vpop.f32.mrf.mxu1  ;;  %v752_v41 = vld [vmem:[%s4178_s22 + $0x1160] sm:$0xff]  ;;  %v973_v3 = vld [vmem:[%s4178_s22 + $0x1848] sm:$0xff] }
 0x2b8   : > { %3469 = vmatpush.msrb.mxu3 %v1700_v6  ;;  %3353 = vmatmul.f32.vlgmr.msra.gmra.mxu1 %v4334_v8  ;;  %v3115_v46 = vadd.f32 %v3114_v14, %v3095_v1  ;;  %v3134_v17 = vpop.f32.mrf.mxu2  ;;  %v544_v6 = vld [vmem:[%s4178_s22 + $0xae0] sm:$0xff]  ;;  %v739_v1 = vld [vmem:[%s4178_s22 + $0x10f8] sm:$0xff]  ;;  %v518_v14 = vld [vmem:[%s4178_s22 + $0xa10] sm:$0xff] }
 0x2b9   : > { %3411 = vmatpush.msrb.mxu0 %v1050_v63  ;;  %3430 = vmatpush.msrb.mxu1 %v1271_v33  ;;  %v531_v63 = vld [vmem:[%s4178_s22 + $0xa78] sm:$0xff]  ;;  %v726_v33 = vld [vmem:[%s4178_s22 + $0x1090] sm:$0xff] }
 0x2ba   : > { %3451 = vmatpush.msrb.mxu2 %v1466_v12  ;;  %3470 = vmatpush.msrb.mxu3 %v1687_v13  ;;  %v3135_v57 = vadd.f32 %v3134_v17, %v3115_v46  ;;  %v947_v12 = vld [vmem:[%s4178_s22 + $0x1778] sm:$0xff]  ;;  %v297_v13 = vld [vmem:[%s4178_s22 + $0x328] sm:$0xff]  ;;  %v700_v17 = vld [vmem:[%s4178_s22 + $0xfc0] sm:$0xff] }
 0x2bb   : > { %3412 = vmatpush.msrb.mxu0 %v1037_v7  ;;  %3431 = vmatpush.msrb.mxu1 %v1258_v10  ;;  %v3154_v32 = vpop.f32.mrf.mxu3  ;;  %v934_v7 = vld [vmem:[%s4178_s22 + $0x1710] sm:$0xff]  ;;  %v284_v10 = vld [vmem:[%s4178_s22 + $0x2c0] sm:$0xff]  ;;  %v505_v46 = vld [vmem:[%s4178_s22 + $0x9a8] sm:$0xff] }
 0x2bc   : > { %3452 = vmatpush.msrb.mxu2 %v1453_v21  ;;  %3471 = vmatpush.msrb.mxu3 %v1674_v25  ;;  %v3155_v38 = vadd.f32 %v3154_v32, %v3135_v57  ;;  %v921_v21 = vld [vmem:[%s4178_s22 + $0x16a8] sm:$0xff]  ;;  %v271_v25 = vld [vmem:[%s4178_s22 + $0x258] sm:$0xff]  ;;  %v258_v57 = vld [vmem:[%s4178_s22 + $0x1f0] sm:$0xff] }
 0x2bd   : > { %3453 = vmatmul.f32.vlgmr.msrb.gmra.mxu2 %v4349_v18  ;;  %3477 = vmatpush.msra.mxu0 %v401_v11  ;;  %v908_v11 = vld [vmem:[%s4178_s22 + $0x1640] sm:$0xff]  ;;  %v895_v32 = vld [vmem:[%s4178_s22 + $0x15d8] sm:$0xff] }
 0x2be   : > { %3517 = vmatpush.msra.mxu2 %v817_v29  ;;  %3432 = vmatpush.msrb.mxu1 %v1245_v31  ;;  %v3976_v50 = vrot.slane %v3155_v38, 1  ;;  %v479_v29 = vld [vmem:[%s4178_s22 + $0x8d8] sm:$0xff]  ;;  %v674_v31 = vld [vmem:[%s4178_s22 + $0xef0] sm:$0xff]  ;;  %v661_v38 = vld [vmem:[%s4178_s22 + $0xe88] sm:$0xff] }
 0x2bf   : > { %3472 = vmatpush.msrb.mxu3 %v1661_v37  ;;  %3413 = vmatmul.f32.vlgmr.msrb.gmra.mxu0 %v4355_v22  ;;  %v466_v37 = vld [vmem:[%s4178_s22 + $0x870] sm:$0xff] }
 0x2c0   : > { %3473 = vmatmul.f32.vlgmr.msrb.gmra.mxu3 %v4359_v24  ;;  %3478 = vmatpush.msra.mxu0 %v388_v15  ;;  %v3990_v36 = vsel %vm3989_vm5, %v3975_v53, %v3976_v50  ;;  %v882_v15 = vld [vmem:[%s4178_s22 + $0x1570] sm:$0xff]  ;;  %v453_v53 = vld [vmem:[%s4178_s22 + $0x808] sm:$0xff]  ;;  %v219_v50 = vld [vmem:[%s4178_s22 + $0xb8] sm:$0xff] }
 0x2c1   : > { %3497 = vmatpush.msra.mxu1 %v609_v39  ;;  %3518 = vmatpush.msra.mxu2 %v804_v40  ;;  %v3992_v48 = vsel %vm3991_vm6, %v3988_v42, %v3990_v36  ;;  %v648_v39 = vld [vmem:[%s4178_s22 + $0xe20] sm:$0xff]  ;;  %v869_v40 = vld [vmem:[%s4178_s22 + $0x1508] sm:$0xff]  ;;  %v635_v42 = vld [vmem:[%s4178_s22 + $0xdb8] sm:$0xff] }
 0x2c2   : > { %3537 = vmatpush.msra.mxu3 %v1025_v27  ;;  %3433 = vmatmul.f32.vlgmr.msrb.gmra.mxu1 %v4366_v28  ;;  %v3994_v49 = vsel %vm3993_vm7, %v5076_v52, %v3992_v48  ;;  %v336_v52 = vld [vmem:[%s4178_s22 + $0x460] sm:$0xff]  ;;  %v427_v36 = vld [vmem:[%s4178_s22 + $0x738] sm:$0xff]  ;;  %v1649_v48 = vld [vmem:[%s4178_s22 + $0x2d68] sm:$0xff] }
 0x2c3   : > { %3479 = vmatpush.msra.mxu0 %v375_v43  ;;  %3498 = vmatpush.msra.mxu1 %v596_v35  ;;  %v4003_v30 = vadd.f32 %v3994_v49, %v193_v45  ;;  %v440_v27 = vld [vmem:[%s4178_s22 + $0x7a0] sm:$0xff]  ;;  %v206_v35 = vld [vmem:[%s4178_s22 + $0x50] sm:$0xff] }
 0x2c4   : > { %3519 = vmatpush.msra.mxu2 %v791_v47  ;;  %3538 = vmatpush.msra.mxu3 %v1012_v51  ;;  %v856_v43 = vld [vmem:[%s4178_s22 + $0x14a0] sm:$0xff]  ;;  %v622_v45 = vld [vmem:[%s4178_s22 + $0xd50] sm:$0xff]  ;;  %v843_v47 = vld [vmem:[%s4178_s22 + $0x1438] sm:$0xff] }
 0x2c5   : > { %3480 = vmatpush.msra.mxu0 %v362_v61  ;;  %3499 = vmatpush.msra.mxu1 %v583_v60  ;;  %4005 = vst [vmem:[#allocation2] sm:$0xff] %v4003_v30  ;;  %v1233_v51 = vld [vmem:[%s4178_s22 + $0x2068] sm:$0xff]  ;;  %v414_v61 = vld [vmem:[%s4178_s22 + $0x6d0] sm:$0xff]  ;;  %v1220_v49 = vld [vmem:[%s4178_s22 + $0x2000] sm:$0xff] }
 0x2c6   : > { %3520 = vmatpush.msra.mxu2 %v778_v54  ;;  %3539 = vmatpush.msra.mxu3 %v999_v19  ;;  %v830_v60 = vld [vmem:[%s4178_s22 + $0x13d0] sm:$0xff]  ;;  %v1441_v54 = vld [vmem:[%s4178_s22 + $0x26e8] sm:$0xff]  ;;  %v1636_v19 = vld [vmem:[%s4178_s22 + $0x2d00] sm:$0xff] }
 0x2c7   : > { %3481 = vmatpush.msra.mxu0 %v349_v55  ;;  %3500 = vmatpush.msra.mxu1 %v570_v56  ;;  %v1857_v30 = vld [vmem:[%s4178_s22 + $0x33e8] sm:$0xff]  ;;  %v1207_v55 = vld [vmem:[%s4178_s22 + $0x1f98] sm:$0xff]  ;;  %v1428_v56 = vld [vmem:[%s4178_s22 + $0x2680] sm:$0xff] }
 0x2c8   : > { %3521 = vmatpush.msra.mxu2 %v765_v58  ;;  %3540 = vmatpush.msra.mxu3 %v986_v59  ;;  %v1623_v58 = vld [vmem:[%s4178_s22 + $0x2c98] sm:$0xff]  ;;  %v1844_v59 = vld [vmem:[%s4178_s22 + $0x3380] sm:$0xff] }
 0x2c9   : > { %3482 = vmatpush.msra.mxu0 %v336_v52  ;;  %3501 = vmatpush.msra.mxu1 %v557_v0  ;;  %v1194_v52 = vld [vmem:[%s4178_s22 + $0x1f30] sm:$0xff]  ;;  %v1415_v0 = vld [vmem:[%s4178_s22 + $0x2618] sm:$0xff] }
 0x2ca   : > { %3522 = vmatpush.msra.mxu2 %v752_v41  ;;  %3541 = vmatpush.msra.mxu3 %v973_v3  ;;  %v1610_v41 = vld [vmem:[%s4178_s22 + $0x2c30] sm:$0xff]  ;;  %v1831_v3 = vld [vmem:[%s4178_s22 + $0x3318] sm:$0xff] }
 0x2cb   : > { %3483 = vmatpush.msra.mxu0 %v323_v44  ;;  %3502 = vmatpush.msra.mxu1 %v544_v6  ;;  %v1181_v44 = vld [vmem:[%s4178_s22 + $0x1ec8] sm:$0xff]  ;;  %v1402_v6 = vld [vmem:[%s4178_s22 + $0x25b0] sm:$0xff] }
 0x2cc   : > { %3523 = vmatpush.msra.mxu2 %v739_v1  ;;  %3542 = vmatpush.msra.mxu3 %v960_v5  ;;  %v1597_v1 = vld [vmem:[%s4178_s22 + $0x2bc8] sm:$0xff]  ;;  %v1818_v5 = vld [vmem:[%s4178_s22 + $0x32b0] sm:$0xff] }
 0x2cd   : > { %3484 = vmatpush.msra.mxu0 %v310_v9  ;;  %3503 = vmatpush.msra.mxu1 %v531_v63  ;;  %v1168_v9 = vld [vmem:[%s4178_s22 + $0x1e60] sm:$0xff]  ;;  %v1389_v63 = vld [vmem:[%s4178_s22 + $0x2548] sm:$0xff] }
 0x2ce   : > { %3524 = vmatpush.msra.mxu2 %v726_v33  ;;  %3543 = vmatpush.msra.mxu3 %v947_v12  ;;  %v1584_v33 = vld [vmem:[%s4178_s22 + $0x2b60] sm:$0xff]  ;;  %v1805_v12 = vld [vmem:[%s4178_s22 + $0x3248] sm:$0xff] }
 0x2cf   : > { %3485 = vmatpush.msra.mxu0 %v297_v13  ;;  %3504 = vmatpush.msra.mxu1 %v518_v14  ;;  %v1155_v13 = vld [vmem:[%s4178_s22 + $0x1df8] sm:$0xff]  ;;  %v1376_v14 = vld [vmem:[%s4178_s22 + $0x24e0] sm:$0xff] }
 0x2d0   : > { %3525 = vmatpush.msra.mxu2 %v713_v16  ;;  %3544 = vmatpush.msra.mxu3 %v934_v7  ;;  %v1571_v16 = vld [vmem:[%s4178_s22 + $0x2af8] sm:$0xff]  ;;  %v1792_v7 = vld [vmem:[%s4178_s22 + $0x31e0] sm:$0xff] }
 0x2d1   : > { %3486 = vmatpush.msra.mxu0 %v284_v10  ;;  %3505 = vmatpush.msra.mxu1 %v505_v46  ;;  %v1142_v10 = vld [vmem:[%s4178_s22 + $0x1d90] sm:$0xff]  ;;  %v1363_v46 = vld [vmem:[%s4178_s22 + $0x2478] sm:$0xff] }
 0x2d2   : > { %3526 = vmatpush.msra.mxu2 %v700_v17  ;;  %3545 = vmatpush.msra.mxu3 %v921_v21  ;;  %v1558_v17 = vld [vmem:[%s4178_s22 + $0x2a90] sm:$0xff]  ;;  %v1779_v21 = vld [vmem:[%s4178_s22 + $0x3178] sm:$0xff] }
 0x2d3   : > { %3487 = vmatpush.msra.mxu0 %v271_v25  ;;  %3506 = vmatpush.msra.mxu1 %v492_v26  ;;  %v1129_v25 = vld [vmem:[%s4178_s22 + $0x1d28] sm:$0xff]  ;;  %v1350_v26 = vld [vmem:[%s4178_s22 + $0x2410] sm:$0xff] }
 0x2d4   : > { %3527 = vmatpush.msra.mxu2 %v687_v23  ;;  %3546 = vmatpush.msra.mxu3 %v908_v11  ;;  %v1545_v23 = vld [vmem:[%s4178_s22 + $0x2a28] sm:$0xff]  ;;  %v1766_v11 = vld [vmem:[%s4178_s22 + $0x3110] sm:$0xff] }
 0x2d5   : > { %3488 = vmatpush.msra.mxu0 %v258_v57  ;;  %3507 = vmatpush.msra.mxu1 %v479_v29  ;;  %v1116_v57 = vld [vmem:[%s4178_s22 + $0x1cc0] sm:$0xff]  ;;  %v1337_v29 = vld [vmem:[%s4178_s22 + $0x23a8] sm:$0xff] }
 0x2d6   : > { %3528 = vmatpush.msra.mxu2 %v674_v31  ;;  %3547 = vmatpush.msra.mxu3 %v895_v32  ;;  %v1532_v31 = vld [vmem:[%s4178_s22 + $0x29c0] sm:$0xff]  ;;  %v1753_v32 = vld [vmem:[%s4178_s22 + $0x30a8] sm:$0xff] }
 0x2d7   : > { %3489 = vmatpush.msra.mxu0 %v245_v34  ;;  %3508 = vmatpush.msra.mxu1 %v466_v37  ;;  %v1103_v34 = vld [vmem:[%s4178_s22 + $0x1c58] sm:$0xff]  ;;  %v1324_v37 = vld [vmem:[%s4178_s22 + $0x2340] sm:$0xff] }
 0x2d8   : > { %3529 = vmatpush.msra.mxu2 %v661_v38  ;;  %3548 = vmatpush.msra.mxu3 %v882_v15  ;;  %v1519_v38 = vld [vmem:[%s4178_s22 + $0x2958] sm:$0xff]  ;;  %v1740_v15 = vld [vmem:[%s4178_s22 + $0x3040] sm:$0xff] }
 0x2d9   : > { %3490 = vmatpush.msra.mxu0 %v232_v20  ;;  %3509 = vmatpush.msra.mxu1 %v453_v53  ;;  %v1090_v20 = vld [vmem:[%s4178_s22 + $0x1bf0] sm:$0xff]  ;;  %v1311_v53 = vld [vmem:[%s4178_s22 + $0x22d8] sm:$0xff] }
 0x2da   : > { %3530 = vmatpush.msra.mxu2 %v648_v39  ;;  %3549 = vmatpush.msra.mxu3 %v869_v40  ;;  %v1506_v39 = vld [vmem:[%s4178_s22 + $0x28f0] sm:$0xff]  ;;  %v1727_v40 = vld [vmem:[%s4178_s22 + $0x2fd8] sm:$0xff] }
 0x2db   : > { %3491 = vmatpush.msra.mxu0 %v219_v50  ;;  %3510 = vmatpush.msra.mxu1 %v440_v27  ;;  %v1077_v50 = vld [vmem:[%s4178_s22 + $0x1b88] sm:$0xff] }
 0x2dc   : > { %3531 = vmatpush.msra.mxu2 %v635_v42  ;;  %3550 = vmatpush.msra.mxu3 %v856_v43  ;;  %v1298_v42 = vld [vmem:[%s4178_s22 + $0x2270] sm:$0xff]  ;;  %v1493_v43 = vld [vmem:[%s4178_s22 + $0x2888] sm:$0xff] }
 0x2dd   : > { %3492 = vmatpush.msra.mxu0 %v206_v35  ;;  %3511 = vmatpush.msra.mxu1 %v427_v36  ;;  %v1714_v35 = vld [vmem:[%s4178_s22 + $0x2f70] sm:$0xff]  ;;  %v1064_v36 = vld [vmem:[%s4178_s22 + $0x1b20] sm:$0xff] }
 0x2de   : > { %3532 = vmatpush.msra.mxu2 %v622_v45  ;;  %3551 = vmatpush.msra.mxu3 %v843_v47  ;;  %v1285_v47 = vld [vmem:[%s4178_s22 + $0x2208] sm:$0xff] }
 0x2df   : > { %3557 = vmatpush.msrb.mxu0 %v1233_v51  ;;  %3512 = vmatpush.msra.mxu1 %v414_v61  ;;  %v1480_v51 = vld [vmem:[%s4178_s22 + $0x2820] sm:$0xff] }
 0x2e0   : > { %3597 = vmatpush.msrb.mxu2 %v1649_v48  ;;  %3552 = vmatpush.msra.mxu3 %v830_v60  ;;  %v1701_v60 = vld [vmem:[%s4178_s22 + $0x2f08] sm:$0xff] }
 0x2e1   : > { %3558 = vmatpush.msrb.mxu0 %v1220_v49  ;;  %3577 = vmatpush.msrb.mxu1 %v1441_v54  ;;  %v1051_v49 = vld [vmem:[%s4178_s22 + $0x1ab8] sm:$0xff]  ;;  %v1272_v54 = vld [vmem:[%s4178_s22 + $0x21a0] sm:$0xff] }
 0x2e2   : > { %3598 = vmatpush.msrb.mxu2 %v1636_v19  ;;  %3617 = vmatpush.msrb.mxu3 %v1857_v30  ;;  %v1467_v30 = vld [vmem:[%s4178_s22 + $0x27b8] sm:$0xff] }
 0x2e3   : > { %3559 = vmatpush.msrb.mxu0 %v1207_v55  ;;  %3578 = vmatpush.msrb.mxu1 %v1428_v56  ;;  %v1688_v55 = vld [vmem:[%s4178_s22 + $0x2ea0] sm:$0xff] }
 0x2e4   : > { %3599 = vmatpush.msrb.mxu2 %v1623_v58  ;;  %3618 = vmatpush.msrb.mxu3 %v1844_v59  ;;  %v1038_v58 = vld [vmem:[%s4178_s22 + $0x1a50] sm:$0xff]  ;;  %v1259_v59 = vld [vmem:[%s4178_s22 + $0x2138] sm:$0xff] }
 0x2e5   : > { %3560 = vmatpush.msrb.mxu0 %v1194_v52  ;;  %3579 = vmatpush.msrb.mxu1 %v1415_v0  ;;  %v1454_v0 = vld [vmem:[%s4178_s22 + $0x2750] sm:$0xff] }
 0x2e6   : > { %3600 = vmatpush.msrb.mxu2 %v1610_v41  ;;  %3619 = vmatpush.msrb.mxu3 %v1831_v3  ;;  %v1675_v41 = vld [vmem:[%s4178_s22 + $0x2e38] sm:$0xff]  ;;  %v402_v3 = vld [vmem:[%s4178_s22 + $0x670] sm:$0xff] }
 0x2e7   : > { %3561 = vmatpush.msrb.mxu0 %v1181_v44  ;;  %3580 = vmatpush.msrb.mxu1 %v1402_v6  ;;  %v818_v6 = vld [vmem:[%s4178_s22 + $0x1370] sm:$0xff] }
 0x2e8   : > { %3601 = vmatpush.msrb.mxu2 %v1597_v1  ;;  %3620 = vmatpush.msrb.mxu3 %v1818_v5  ;;  %v1246_v1 = vld [vmem:[%s4178_s22 + $0x20d0] sm:$0xff] }
 0x2e9   : > { %3562 = vmatpush.msrb.mxu0 %v1168_v9  ;;  %3581 = vmatpush.msrb.mxu1 %v1389_v63  ;;  %v1662_v9 = vld [vmem:[%s4178_s22 + $0x2dd0] sm:$0xff]  ;;  %v389_v63 = vld [vmem:[%s4178_s22 + $0x608] sm:$0xff] }
 0x2ea   : > { %3602 = vmatpush.msrb.mxu2 %v1584_v33  ;;  %3621 = vmatpush.msrb.mxu3 %v1805_v12  ;;  %v610_v12 = vld [vmem:[%s4178_s22 + $0xcf0] sm:$0xff] }
 0x2eb   : > { %3563 = vmatpush.msrb.mxu0 %v1155_v13  ;;  %3582 = vmatpush.msrb.mxu1 %v1376_v14  ;;  %v805_v13 = vld [vmem:[%s4178_s22 + $0x1308] sm:$0xff] }
 0x2ec   : > { %3603 = vmatpush.msrb.mxu2 %v1571_v16  ;;  %3622 = vmatpush.msrb.mxu3 %v1792_v7  ;;  %v1026_v7 = vld [vmem:[%s4178_s22 + $0x19f0] sm:$0xff] }
 0x2ed   : > { %3564 = vmatpush.msrb.mxu0 %v1142_v10  ;;  %3583 = vmatpush.msrb.mxu1 %v1363_v46  ;;  %v376_v10 = vld [vmem:[%s4178_s22 + $0x5a0] sm:$0xff]  ;;  %v597_v46 = vld [vmem:[%s4178_s22 + $0xc88] sm:$0xff] }
 0x2ee   : > { %3604 = vmatpush.msrb.mxu2 %v1558_v17  ;;  %3623 = vmatpush.msrb.mxu3 %v1779_v21  ;;  %v792_v21 = vld [vmem:[%s4178_s22 + $0x12a0] sm:$0xff] }
 0x2ef   : > { %3565 = vmatpush.msrb.mxu0 %v1129_v25  ;;  %3584 = vmatpush.msrb.mxu1 %v1350_v26  ;;  %v1013_v25 = vld [vmem:[%s4178_s22 + $0x1988] sm:$0xff] }
 0x2f0   : > { %3605 = vmatpush.msrb.mxu2 %v1545_v23  ;;  %3624 = vmatpush.msrb.mxu3 %v1766_v11  ;;  %v363_v23 = vld [vmem:[%s4178_s22 + $0x538] sm:$0xff]  ;;  %v584_v11 = vld [vmem:[%s4178_s22 + $0xc20] sm:$0xff] }
 0x2f1   : > { %3566 = vmatpush.msrb.mxu0 %v1116_v57  ;;  %3585 = vmatpush.msrb.mxu1 %v1337_v29  ;;  %v779_v29 = vld [vmem:[%s4178_s22 + $0x1238] sm:$0xff] }
 0x2f2   : > { %3606 = vmatpush.msrb.mxu2 %v1532_v31  ;;  %3625 = vmatpush.msrb.mxu3 %v1753_v32  ;;  %v1000_v31 = vld [vmem:[%s4178_s22 + $0x1920] sm:$0xff]  ;;  %v350_v32 = vld [vmem:[%s4178_s22 + $0x4d0] sm:$0xff] }
 0x2f3   : > { %3567 = vmatpush.msrb.mxu0 %v1103_v34  ;;  %3586 = vmatpush.msrb.mxu1 %v1324_v37  ;;  %v571_v34 = vld [vmem:[%s4178_s22 + $0xbb8] sm:$0xff]  ;;  %v766_v37 = vld [vmem:[%s4178_s22 + $0x11d0] sm:$0xff] }
 0x2f4   : > { %3607 = vmatpush.msrb.mxu2 %v1519_v38  ;;  %3626 = vmatpush.msrb.mxu3 %v1740_v15  ;;  %v3174_v27 = vpop.f32.mrf.mxu0  ;;  %v987_v38 = vld [vmem:[%s4178_s22 + $0x18b8] sm:$0xff]  ;;  %v337_v15 = vld [vmem:[%s4178_s22 + $0x468] sm:$0xff] }
 0x2f5   : > { %3568 = vmatpush.msrb.mxu0 %v1090_v20  ;;  %3587 = vmatpush.msrb.mxu1 %v1311_v53  ;;  %v558_v20 = vld [vmem:[%s4178_s22 + $0xb50] sm:$0xff]  ;;  %v753_v53 = vld [vmem:[%s4178_s22 + $0x1168] sm:$0xff] }
 0x2f6   : > { %3608 = vmatpush.msrb.mxu2 %v1506_v39  ;;  %3627 = vmatpush.msrb.mxu3 %v1727_v40  ;;  %v974_v39 = vld [vmem:[%s4178_s22 + $0x1850] sm:$0xff]  ;;  %v324_v40 = vld [vmem:[%s4178_s22 + $0x400] sm:$0xff] }
 0x2f7   : > { %3533 = vmatmul.f32.vlgmr.msra.gmra.mxu2 %v4317_v62  ;;  %3569 = vmatpush.msrb.mxu0 %v1077_v50  ;;  %v3194_v45 = vpop.f32.mrf.mxu1  ;;  %v545_v50 = vld [vmem:[%s4178_s22 + $0xae8] sm:$0xff] }
 0x2f8   : > { %3588 = vmatpush.msrb.mxu1 %v1298_v42  ;;  %3609 = vmatpush.msrb.mxu2 %v1493_v43  ;;  %v3195_v48 = vadd.f32 %v3194_v45, %v3174_v27  ;;  %v3214_v61 = vpop.f32.mrf.mxu2  ;;  %v740_v27 = vld [vmem:[%s4178_s22 + $0x1100] sm:$0xff]  ;;  %v961_v42 = vld [vmem:[%s4178_s22 + $0x17e8] sm:$0xff]  ;;  %v311_v43 = vld [vmem:[%s4178_s22 + $0x398] sm:$0xff] }
 0x2f9   : > { %3628 = vmatpush.msrb.mxu3 %v1714_v35  ;;  %3493 = vmatmul.f32.vlgmr.msra.gmra.mxu0 %v4323_v2  ;;  %v532_v35 = vld [vmem:[%s4178_s22 + $0xa80] sm:$0xff] }
 0x2fa   : > { %3553 = vmatmul.f32.vlgmr.msra.gmra.mxu3 %v4327_v4  ;;  %3570 = vmatpush.msrb.mxu0 %v1064_v36  ;;  %v3215_v19 = vadd.f32 %v3214_v61, %v3195_v48  ;;  %v727_v36 = vld [vmem:[%s4178_s22 + $0x1098] sm:$0xff]  ;;  %v948_v45 = vld [vmem:[%s4178_s22 + $0x1780] sm:$0xff]  ;;  %v714_v48 = vld [vmem:[%s4178_s22 + $0x1030] sm:$0xff] }
 0x2fb   : > { %3589 = vmatpush.msrb.mxu1 %v1285_v47  ;;  %3610 = vmatpush.msrb.mxu2 %v1480_v51  ;;  %v3234_v56 = vpop.f32.mrf.mxu3  ;;  %v298_v47 = vld [vmem:[%s4178_s22 + $0x330] sm:$0xff]  ;;  %v519_v51 = vld [vmem:[%s4178_s22 + $0xa18] sm:$0xff] }
 0x2fc   : > { %3629 = vmatpush.msrb.mxu3 %v1701_v60  ;;  %3513 = vmatmul.f32.vlgmr.msra.gmra.mxu1 %v4334_v8  ;;  %v3235_v52 = vadd.f32 %v3234_v56, %v3215_v19  ;;  %v935_v61 = vld [vmem:[%s4178_s22 + $0x1718] sm:$0xff]  ;;  %v285_v60 = vld [vmem:[%s4178_s22 + $0x2c8] sm:$0xff]  ;;  %v922_v19 = vld [vmem:[%s4178_s22 + $0x16b0] sm:$0xff] }
 0x2fd   : > { %3571 = vmatpush.msrb.mxu0 %v1051_v49  ;;  %3590 = vmatpush.msrb.mxu1 %v1272_v54  ;;  %v506_v49 = vld [vmem:[%s4178_s22 + $0x9b0] sm:$0xff]  ;;  %v701_v54 = vld [vmem:[%s4178_s22 + $0xfc8] sm:$0xff]  ;;  %v688_v56 = vld [vmem:[%s4178_s22 + $0xf60] sm:$0xff] }
 0x2fe   : > { %3611 = vmatpush.msrb.mxu2 %v1467_v30  ;;  %3630 = vmatpush.msrb.mxu3 %v1688_v55  ;;  %v3254_v44 = vpop.f32.mrf.mxu0  ;;  %v272_v30 = vld [vmem:[%s4178_s22 + $0x260] sm:$0xff]  ;;  %v493_v55 = vld [vmem:[%s4178_s22 + $0x948] sm:$0xff] }
 0x2ff   : > { %3572 = vmatpush.msrb.mxu0 %v1038_v58  ;;  %3591 = vmatpush.msrb.mxu1 %v1259_v59  ;;  %v3255_v5 = vadd.f32 %v3254_v44, %v3235_v52  ;;  %v909_v58 = vld [vmem:[%s4178_s22 + $0x1648] sm:$0xff]  ;;  %v259_v59 = vld [vmem:[%s4178_s22 + $0x1f8] sm:$0xff]  ;;  %v480_v52 = vld [vmem:[%s4178_s22 + $0x8e0] sm:$0xff] }
 0x300   : > { %3612 = vmatpush.msrb.mxu2 %v1454_v0  ;;  %3631 = vmatpush.msrb.mxu3 %v1675_v41  ;;  %v675_v0 = vld [vmem:[%s4178_s22 + $0xef8] sm:$0xff]  ;;  %v896_v41 = vld [vmem:[%s4178_s22 + $0x15e0] sm:$0xff] }
 0x301   : > { %3613 = vmatmul.f32.vlgmr.msrb.gmra.mxu2 %v4349_v18  ;;  %3637 = vmatpush.msra.mxu0 %v402_v3  ;;  %v3274_v33 = vpop.f32.mrf.mxu1  ;;  %v246_v3 = vld [vmem:[%s4178_s22 + $0x190] sm:$0xff]  ;;  %v467_v44 = vld [vmem:[%s4178_s22 + $0x878] sm:$0xff] }
 0x302   : > { %3677 = vmatpush.msra.mxu2 %v818_v6  ;;  %3592 = vmatpush.msrb.mxu1 %v1246_v1  ;;  %v3275_v14 = vadd.f32 %v3274_v33, %v3255_v5  ;;  %v3294_v16 = vpop.f32.mrf.mxu2  ;;  %v662_v6 = vld [vmem:[%s4178_s22 + $0xe90] sm:$0xff]  ;;  %v883_v1 = vld [vmem:[%s4178_s22 + $0x1578] sm:$0xff]  ;;  %v233_v5 = vld [vmem:[%s4178_s22 + $0x128] sm:$0xff] }
 0x303   : > { %3632 = vmatpush.msrb.mxu3 %v1662_v9  ;;  %3573 = vmatmul.f32.vlgmr.msrb.gmra.mxu0 %v4355_v22  ;;  %v454_v9 = vld [vmem:[%s4178_s22 + $0x810] sm:$0xff] }
 0x304   : > { %3633 = vmatmul.f32.vlgmr.msrb.gmra.mxu3 %v4359_v24  ;;  %3638 = vmatpush.msra.mxu0 %v389_v63  ;;  %v3295_v17 = vadd.f32 %v3294_v16, %v3275_v14  ;;  %v649_v63 = vld [vmem:[%s4178_s22 + $0xe28] sm:$0xff]  ;;  %v870_v33 = vld [vmem:[%s4178_s22 + $0x1510] sm:$0xff]  ;;  %v636_v14 = vld [vmem:[%s4178_s22 + $0xdc0] sm:$0xff] }
 0x305   : > { %3657 = vmatpush.msra.mxu1 %v610_v12  ;;  %3678 = vmatpush.msra.mxu2 %v805_v13  ;;  %v3314_v26 = vpop.f32.mrf.mxu3  ;;  %v220_v12 = vld [vmem:[%s4178_s22 + $0xc0] sm:$0xff]  ;;  %v441_v13 = vld [vmem:[%s4178_s22 + $0x7a8] sm:$0xff] }
 0x306   : > { %3697 = vmatpush.msra.mxu3 %v1026_v7  ;;  %3593 = vmatmul.f32.vlgmr.msrb.gmra.mxu1 %v4366_v28  ;;  %v5823_v57 = vadd.f32 %v3314_v26, %v3295_v17  ;;  %v857_v16 = vld [vmem:[%s4178_s22 + $0x14a8] sm:$0xff]  ;;  %v207_v7 = vld [vmem:[%s4178_s22 + $0x58] sm:$0xff]  ;;  %v844_v17 = vld [vmem:[%s4178_s22 + $0x1440] sm:$0xff] }
 0x307   : > { %3639 = vmatpush.msra.mxu0 %v376_v10  ;;  %3658 = vmatpush.msra.mxu1 %v597_v46  ;;  %v428_v10 = vld [vmem:[%s4178_s22 + $0x740] sm:$0xff]  ;;  %v623_v46 = vld [vmem:[%s4178_s22 + $0xd58] sm:$0xff] }
 0x308   : > { %3679 = vmatpush.msra.mxu2 %v792_v21  ;;  %3698 = vmatpush.msra.mxu3 %v1013_v25  ;;  %v1234_v21 = vld [vmem:[%s4178_s22 + $0x2070] sm:$0xff]  ;;  %v415_v26 = vld [vmem:[%s4178_s22 + $0x6d8] sm:$0xff] }
 0x309   : > { %3640 = vmatpush.msra.mxu0 %v363_v23  ;;  %3659 = vmatpush.msra.mxu1 %v584_v11  ;;  %v1650_v25 = vld [vmem:[%s4178_s22 + $0x2d70] sm:$0xff]  ;;  %v831_v23 = vld [vmem:[%s4178_s22 + $0x13d8] sm:$0xff]  ;;  %v1221_v11 = vld [vmem:[%s4178_s22 + $0x2008] sm:$0xff] }
 0x30a   : > { %3680 = vmatpush.msra.mxu2 %v779_v29  ;;  %3699 = vmatpush.msra.mxu3 %v1000_v31  ;;  %v1442_v29 = vld [vmem:[%s4178_s22 + $0x26f0] sm:$0xff]  ;;  %v1637_v31 = vld [vmem:[%s4178_s22 + $0x2d08] sm:$0xff] }
 0x30b   : > { %3641 = vmatpush.msra.mxu0 %v350_v32  ;;  %3660 = vmatpush.msra.mxu1 %v571_v34  ;;  %v1858_v32 = vld [vmem:[%s4178_s22 + $0x33f0] sm:$0xff]  ;;  %v1208_v34 = vld [vmem:[%s4178_s22 + $0x1fa0] sm:$0xff] }
 0x30c   : > { %3681 = vmatpush.msra.mxu2 %v766_v37  ;;  %3700 = vmatpush.msra.mxu3 %v987_v38  ;;  %v1429_v37 = vld [vmem:[%s4178_s22 + $0x2688] sm:$0xff]  ;;  %v1624_v38 = vld [vmem:[%s4178_s22 + $0x2ca0] sm:$0xff] }
 0x30d   : > { %3642 = vmatpush.msra.mxu0 %v337_v15  ;;  %3661 = vmatpush.msra.mxu1 %v558_v20  ;;  %v1845_v15 = vld [vmem:[%s4178_s22 + $0x3388] sm:$0xff]  ;;  %v1195_v20 = vld [vmem:[%s4178_s22 + $0x1f38] sm:$0xff] }
 0x30e   : > { %3682 = vmatpush.msra.mxu2 %v753_v53  ;;  %3701 = vmatpush.msra.mxu3 %v974_v39  ;;  %v1416_v53 = vld [vmem:[%s4178_s22 + $0x2620] sm:$0xff]  ;;  %v1611_v39 = vld [vmem:[%s4178_s22 + $0x2c38] sm:$0xff] }
 0x30f   : > { %3643 = vmatpush.msra.mxu0 %v324_v40  ;;  %3662 = vmatpush.msra.mxu1 %v545_v50  ;;  %v1832_v40 = vld [vmem:[%s4178_s22 + $0x3320] sm:$0xff]  ;;  %v1182_v50 = vld [vmem:[%s4178_s22 + $0x1ed0] sm:$0xff] }
 0x310   : > { %3683 = vmatpush.msra.mxu2 %v740_v27  ;;  %3702 = vmatpush.msra.mxu3 %v961_v42  ;;  %v1403_v27 = vld [vmem:[%s4178_s22 + $0x25b8] sm:$0xff]  ;;  %v1598_v42 = vld [vmem:[%s4178_s22 + $0x2bd0] sm:$0xff] }
 0x311   : > { %3644 = vmatpush.msra.mxu0 %v311_v43  ;;  %3663 = vmatpush.msra.mxu1 %v532_v35  ;;  %v1819_v43 = vld [vmem:[%s4178_s22 + $0x32b8] sm:$0xff]  ;;  %v1169_v35 = vld [vmem:[%s4178_s22 + $0x1e68] sm:$0xff] }
 0x312   : > { %3684 = vmatpush.msra.mxu2 %v727_v36  ;;  %3703 = vmatpush.msra.mxu3 %v948_v45  ;;  %v1390_v36 = vld [vmem:[%s4178_s22 + $0x2550] sm:$0xff]  ;;  %v1585_v45 = vld [vmem:[%s4178_s22 + $0x2b68] sm:$0xff] }
 0x313   : > { %3645 = vmatpush.msra.mxu0 %v298_v47  ;;  %3664 = vmatpush.msra.mxu1 %v519_v51  ;;  %v1806_v47 = vld [vmem:[%s4178_s22 + $0x3250] sm:$0xff]  ;;  %v1156_v51 = vld [vmem:[%s4178_s22 + $0x1e00] sm:$0xff] }
 0x314   : > { %3685 = vmatpush.msra.mxu2 %v714_v48  ;;  %3704 = vmatpush.msra.mxu3 %v935_v61  ;;  %v1377_v48 = vld [vmem:[%s4178_s22 + $0x24e8] sm:$0xff]  ;;  %v1572_v61 = vld [vmem:[%s4178_s22 + $0x2b00] sm:$0xff] }
 0x315   : > { %3646 = vmatpush.msra.mxu0 %v285_v60  ;;  %3665 = vmatpush.msra.mxu1 %v506_v49  ;;  %v1793_v60 = vld [vmem:[%s4178_s22 + $0x31e8] sm:$0xff]  ;;  %v1143_v49 = vld [vmem:[%s4178_s22 + $0x1d98] sm:$0xff] }
 0x316   : > { %3686 = vmatpush.msra.mxu2 %v701_v54  ;;  %3705 = vmatpush.msra.mxu3 %v922_v19  ;;  %v1364_v54 = vld [vmem:[%s4178_s22 + $0x2480] sm:$0xff]  ;;  %v1559_v19 = vld [vmem:[%s4178_s22 + $0x2a98] sm:$0xff] }
 0x317   : > { %3647 = vmatpush.msra.mxu0 %v272_v30  ;;  %3666 = vmatpush.msra.mxu1 %v493_v55  ;;  %v1780_v30 = vld [vmem:[%s4178_s22 + $0x3180] sm:$0xff]  ;;  %v1130_v55 = vld [vmem:[%s4178_s22 + $0x1d30] sm:$0xff] }
 0x318   : > { %3687 = vmatpush.msra.mxu2 %v688_v56  ;;  %3706 = vmatpush.msra.mxu3 %v909_v58  ;;  %v1351_v56 = vld [vmem:[%s4178_s22 + $0x2418] sm:$0xff]  ;;  %v1546_v58 = vld [vmem:[%s4178_s22 + $0x2a30] sm:$0xff] }
 0x319   : > { %3648 = vmatpush.msra.mxu0 %v259_v59  ;;  %3667 = vmatpush.msra.mxu1 %v480_v52  ;;  %v1767_v59 = vld [vmem:[%s4178_s22 + $0x3118] sm:$0xff]  ;;  %v1117_v52 = vld [vmem:[%s4178_s22 + $0x1cc8] sm:$0xff] }
 0x31a   : > { %3688 = vmatpush.msra.mxu2 %v675_v0  ;;  %3707 = vmatpush.msra.mxu3 %v896_v41  ;;  %v1338_v0 = vld [vmem:[%s4178_s22 + $0x23b0] sm:$0xff]  ;;  %v1533_v41 = vld [vmem:[%s4178_s22 + $0x29c8] sm:$0xff] }
 0x31b   : > { %3649 = vmatpush.msra.mxu0 %v246_v3  ;;  %3668 = vmatpush.msra.mxu1 %v467_v44  ;;  %v1754_v3 = vld [vmem:[%s4178_s22 + $0x30b0] sm:$0xff]  ;;  %v1104_v44 = vld [vmem:[%s4178_s22 + $0x1c60] sm:$0xff] }
 0x31c   : > { %3689 = vmatpush.msra.mxu2 %v662_v6  ;;  %3708 = vmatpush.msra.mxu3 %v883_v1  ;;  %v1325_v6 = vld [vmem:[%s4178_s22 + $0x2348] sm:$0xff]  ;;  %v1520_v1 = vld [vmem:[%s4178_s22 + $0x2960] sm:$0xff] }
 0x31d   : > { %3650 = vmatpush.msra.mxu0 %v233_v5  ;;  %3669 = vmatpush.msra.mxu1 %v454_v9  ;;  %v1741_v5 = vld [vmem:[%s4178_s22 + $0x3048] sm:$0xff]  ;;  %v1091_v9 = vld [vmem:[%s4178_s22 + $0x1bf8] sm:$0xff] }
 0x31e   : > { %3690 = vmatpush.msra.mxu2 %v649_v63  ;;  %3709 = vmatpush.msra.mxu3 %v870_v33  ;;  %v1312_v63 = vld [vmem:[%s4178_s22 + $0x22e0] sm:$0xff]  ;;  %v1507_v33 = vld [vmem:[%s4178_s22 + $0x28f8] sm:$0xff] }
 0x31f   : > { %3651 = vmatpush.msra.mxu0 %v220_v12  ;;  %3670 = vmatpush.msra.mxu1 %v441_v13  ;;  %v1728_v12 = vld [vmem:[%s4178_s22 + $0x2fe0] sm:$0xff]  ;;  %v1078_v13 = vld [vmem:[%s4178_s22 + $0x1b90] sm:$0xff] }
 0x320   : > { %3691 = vmatpush.msra.mxu2 %v636_v14  ;;  %3710 = vmatpush.msra.mxu3 %v857_v16  ;;  %v1299_v14 = vld [vmem:[%s4178_s22 + $0x2278] sm:$0xff]  ;;  %v1494_v16 = vld [vmem:[%s4178_s22 + $0x2890] sm:$0xff] }
 0x321   : > { %3652 = vmatpush.msra.mxu0 %v207_v7  ;;  %3671 = vmatpush.msra.mxu1 %v428_v10  ;;  %v1715_v7 = vld [vmem:[%s4178_s22 + $0x2f78] sm:$0xff]  ;;  %v1065_v10 = vld [vmem:[%s4178_s22 + $0x1b28] sm:$0xff] }
 0x322   : > { %3692 = vmatpush.msra.mxu2 %v623_v46  ;;  %3711 = vmatpush.msra.mxu3 %v844_v17  ;;  %v1286_v46 = vld [vmem:[%s4178_s22 + $0x2210] sm:$0xff]  ;;  %v1481_v17 = vld [vmem:[%s4178_s22 + $0x2828] sm:$0xff] }
 0x323   : > { %3717 = vmatpush.msrb.mxu0 %v1234_v21  ;;  %3672 = vmatpush.msra.mxu1 %v415_v26  ;;  %v1702_v21 = vld [vmem:[%s4178_s22 + $0x2f10] sm:$0xff]  ;;  %v1273_v26 = vld [vmem:[%s4178_s22 + $0x21a8] sm:$0xff] }
 0x324   : > { %3757 = vmatpush.msrb.mxu2 %v1650_v25  ;;  %3712 = vmatpush.msra.mxu3 %v831_v23  ;;  %v1052_v25 = vld [vmem:[%s4178_s22 + $0x1ac0] sm:$0xff] }
 0x325   : > { %3718 = vmatpush.msrb.mxu0 %v1221_v11  ;;  %3737 = vmatpush.msrb.mxu1 %v1442_v29  ;;  %v1468_v23 = vld [vmem:[%s4178_s22 + $0x27c0] sm:$0xff]  ;;  %v1689_v11 = vld [vmem:[%s4178_s22 + $0x2ea8] sm:$0xff]  ;;  %v1039_v29 = vld [vmem:[%s4178_s22 + $0x1a58] sm:$0xff] }
 0x326   : > { %3758 = vmatpush.msrb.mxu2 %v1637_v31  ;;  %3777 = vmatpush.msrb.mxu3 %v1858_v32  ;;  %v1260_v31 = vld [vmem:[%s4178_s22 + $0x2140] sm:$0xff]  ;;  %v1455_v32 = vld [vmem:[%s4178_s22 + $0x2758] sm:$0xff] }
 0x327   : > { %3719 = vmatpush.msrb.mxu0 %v1208_v34  ;;  %3738 = vmatpush.msrb.mxu1 %v1429_v37  ;;  %v1676_v34 = vld [vmem:[%s4178_s22 + $0x2e40] sm:$0xff]  ;;  %v403_v37 = vld [vmem:[%s4178_s22 + $0x678] sm:$0xff] }
 0x328   : > { %3759 = vmatpush.msrb.mxu2 %v1624_v38  ;;  %3778 = vmatpush.msrb.mxu3 %v1845_v15  ;;  %v819_v38 = vld [vmem:[%s4178_s22 + $0x1378] sm:$0xff] }
 0x329   : > { %3720 = vmatpush.msrb.mxu0 %v1195_v20  ;;  %3739 = vmatpush.msrb.mxu1 %v1416_v53  ;;  %v1247_v15 = vld [vmem:[%s4178_s22 + $0x20d8] sm:$0xff]  ;;  %v390_v53 = vld [vmem:[%s4178_s22 + $0x610] sm:$0xff] }
 0x32a   : > { %3760 = vmatpush.msrb.mxu2 %v1611_v39  ;;  %3779 = vmatpush.msrb.mxu3 %v1832_v40  ;;  %v1663_v20 = vld [vmem:[%s4178_s22 + $0x2dd8] sm:$0xff]  ;;  %v806_v40 = vld [vmem:[%s4178_s22 + $0x1310] sm:$0xff] }
 0x32b   : > { %3721 = vmatpush.msrb.mxu0 %v1182_v50  ;;  %3740 = vmatpush.msrb.mxu1 %v1403_v27  ;;  %v611_v39 = vld [vmem:[%s4178_s22 + $0xcf8] sm:$0xff]  ;;  %v377_v27 = vld [vmem:[%s4178_s22 + $0x5a8] sm:$0xff] }
 0x32c   : > { %3761 = vmatpush.msrb.mxu2 %v1598_v42  ;;  %3780 = vmatpush.msrb.mxu3 %v1819_v43  ;;  %v1027_v50 = vld [vmem:[%s4178_s22 + $0x19f8] sm:$0xff]  ;;  %v598_v42 = vld [vmem:[%s4178_s22 + $0xc90] sm:$0xff]  ;;  %v793_v43 = vld [vmem:[%s4178_s22 + $0x12a8] sm:$0xff] }
 0x32d   : > { %3722 = vmatpush.msrb.mxu0 %v1169_v35  ;;  %3741 = vmatpush.msrb.mxu1 %v1390_v36  ;;  %v1014_v35 = vld [vmem:[%s4178_s22 + $0x1990] sm:$0xff]  ;;  %v364_v36 = vld [vmem:[%s4178_s22 + $0x540] sm:$0xff] }
 0x32e   : > { %3762 = vmatpush.msrb.mxu2 %v1585_v45  ;;  %3781 = vmatpush.msrb.mxu3 %v1806_v47  ;;  %v585_v45 = vld [vmem:[%s4178_s22 + $0xc28] sm:$0xff]  ;;  %v780_v47 = vld [vmem:[%s4178_s22 + $0x1240] sm:$0xff] }
 0x32f   : > { %3723 = vmatpush.msrb.mxu0 %v1156_v51  ;;  %3742 = vmatpush.msrb.mxu1 %v1377_v48  ;;  %v1001_v51 = vld [vmem:[%s4178_s22 + $0x1928] sm:$0xff]  ;;  %v351_v48 = vld [vmem:[%s4178_s22 + $0x4d8] sm:$0xff] }
 0x330   : > { %3763 = vmatpush.msrb.mxu2 %v1572_v61  ;;  %3782 = vmatpush.msrb.mxu3 %v1793_v60  ;;  %v572_v61 = vld [vmem:[%s4178_s22 + $0xbc0] sm:$0xff]  ;;  %v767_v60 = vld [vmem:[%s4178_s22 + $0x11d8] sm:$0xff] }
 0x331   : > { %3724 = vmatpush.msrb.mxu0 %v1143_v49  ;;  %3743 = vmatpush.msrb.mxu1 %v1364_v54  ;;  %v988_v49 = vld [vmem:[%s4178_s22 + $0x18c0] sm:$0xff]  ;;  %v338_v54 = vld [vmem:[%s4178_s22 + $0x470] sm:$0xff] }
 0x332   : > { %3764 = vmatpush.msrb.mxu2 %v1559_v19  ;;  %3783 = vmatpush.msrb.mxu3 %v1780_v30  ;;  %v559_v19 = vld [vmem:[%s4178_s22 + $0xb58] sm:$0xff]  ;;  %v754_v30 = vld [vmem:[%s4178_s22 + $0x1170] sm:$0xff] }
 0x333   : > { %3725 = vmatpush.msrb.mxu0 %v1130_v55  ;;  %3744 = vmatpush.msrb.mxu1 %v1351_v56  ;;  %v975_v55 = vld [vmem:[%s4178_s22 + $0x1858] sm:$0xff]  ;;  %v325_v56 = vld [vmem:[%s4178_s22 + $0x408] sm:$0xff] }
 0x334   : > { %3765 = vmatpush.msrb.mxu2 %v1546_v58  ;;  %3784 = vmatpush.msrb.mxu3 %v1767_v59  ;;  %v546_v58 = vld [vmem:[%s4178_s22 + $0xaf0] sm:$0xff]  ;;  %v741_v59 = vld [vmem:[%s4178_s22 + $0x1108] sm:$0xff] }
 0x335   : > { %3726 = vmatpush.msrb.mxu0 %v1117_v52  ;;  %3745 = vmatpush.msrb.mxu1 %v1338_v0  ;;  %v962_v52 = vld [vmem:[%s4178_s22 + $0x17f0] sm:$0xff]  ;;  %v312_v0 = vld [vmem:[%s4178_s22 + $0x3a0] sm:$0xff] }
 0x336   : > { %3766 = vmatpush.msrb.mxu2 %v1533_v41  ;;  %3785 = vmatpush.msrb.mxu3 %v1754_v3  ;;  %v533_v41 = vld [vmem:[%s4178_s22 + $0xa88] sm:$0xff]  ;;  %v728_v3 = vld [vmem:[%s4178_s22 + $0x10a0] sm:$0xff] }
 0x337   : > { %3727 = vmatpush.msrb.mxu0 %v1104_v44  ;;  %3746 = vmatpush.msrb.mxu1 %v1325_v6  ;;  %v949_v44 = vld [vmem:[%s4178_s22 + $0x1788] sm:$0xff]  ;;  %v299_v6 = vld [vmem:[%s4178_s22 + $0x338] sm:$0xff] }
 0x338   : > { %3767 = vmatpush.msrb.mxu2 %v1520_v1  ;;  %3786 = vmatpush.msrb.mxu3 %v1741_v5  ;;  %v520_v1 = vld [vmem:[%s4178_s22 + $0xa20] sm:$0xff]  ;;  %v715_v5 = vld [vmem:[%s4178_s22 + $0x1038] sm:$0xff] }
 0x339   : > { %3728 = vmatpush.msrb.mxu0 %v1091_v9  ;;  %3747 = vmatpush.msrb.mxu1 %v1312_v63  ;;  %v936_v9 = vld [vmem:[%s4178_s22 + $0x1720] sm:$0xff]  ;;  %v286_v63 = vld [vmem:[%s4178_s22 + $0x2d0] sm:$0xff] }
 0x33a   : > { %3768 = vmatpush.msrb.mxu2 %v1507_v33  ;;  %3787 = vmatpush.msrb.mxu3 %v1728_v12  ;;  %v507_v33 = vld [vmem:[%s4178_s22 + $0x9b8] sm:$0xff]  ;;  %v702_v12 = vld [vmem:[%s4178_s22 + $0xfd0] sm:$0xff] }
 0x33b   : > { %3729 = vmatpush.msrb.mxu0 %v1078_v13  ;;  %3748 = vmatpush.msrb.mxu1 %v1299_v14  ;;  %v923_v13 = vld [vmem:[%s4178_s22 + $0x16b8] sm:$0xff]  ;;  %v273_v14 = vld [vmem:[%s4178_s22 + $0x268] sm:$0xff] }
 0x33c   : > { %3769 = vmatpush.msrb.mxu2 %v1494_v16  ;;  %3788 = vmatpush.msrb.mxu3 %v1715_v7  ;;  %v494_v16 = vld [vmem:[%s4178_s22 + $0x950] sm:$0xff]  ;;  %v689_v7 = vld [vmem:[%s4178_s22 + $0xf68] sm:$0xff] }
 0x33d   : > { %3730 = vmatpush.msrb.mxu0 %v1065_v10  ;;  %3749 = vmatpush.msrb.mxu1 %v1286_v46  ;;  %v910_v10 = vld [vmem:[%s4178_s22 + $0x1650] sm:$0xff]  ;;  %v260_v46 = vld [vmem:[%s4178_s22 + $0x200] sm:$0xff] }
 0x33e   : > { %3770 = vmatpush.msrb.mxu2 %v1481_v17  ;;  %3789 = vmatpush.msrb.mxu3 %v1702_v21  ;;  %v481_v17 = vld [vmem:[%s4178_s22 + $0x8e8] sm:$0xff]  ;;  %v676_v21 = vld [vmem:[%s4178_s22 + $0xf00] sm:$0xff] }
 0x33f   : > { %3731 = vmatpush.msrb.mxu0 %v1052_v25  ;;  %3750 = vmatpush.msrb.mxu1 %v1273_v26  ;;  %v897_v25 = vld [vmem:[%s4178_s22 + $0x15e8] sm:$0xff]  ;;  %v247_v26 = vld [vmem:[%s4178_s22 + $0x198] sm:$0xff] }
 0x340   : > { %3771 = vmatpush.msrb.mxu2 %v1468_v23  ;;  %3790 = vmatpush.msrb.mxu3 %v1689_v11  ;;  %v468_v23 = vld [vmem:[%s4178_s22 + $0x880] sm:$0xff]  ;;  %v663_v11 = vld [vmem:[%s4178_s22 + $0xe98] sm:$0xff] }
 0x341   : > { %3693 = vmatmul.f32.vlgmr.msra.gmra.mxu2 %v4317_v62  ;;  %3732 = vmatpush.msrb.mxu0 %v1039_v29  ;;  %v884_v29 = vld [vmem:[%s4178_s22 + $0x1580] sm:$0xff] }
 0x342   : > { %3751 = vmatpush.msrb.mxu1 %v1260_v31  ;;  %3772 = vmatpush.msrb.mxu2 %v1455_v32  ;;  %v234_v31 = vld [vmem:[%s4178_s22 + $0x130] sm:$0xff]  ;;  %v455_v32 = vld [vmem:[%s4178_s22 + $0x818] sm:$0xff] }
 0x343   : > { %3791 = vmatpush.msrb.mxu3 %v1676_v34  ;;  %3653 = vmatmul.f32.vlgmr.msra.gmra.mxu0 %v4323_v2  ;;  %v650_v34 = vld [vmem:[%s4178_s22 + $0xe30] sm:$0xff] }
 0x344   : > { %3713 = vmatmul.f32.vlgmr.msra.gmra.mxu3 %v4327_v4  ;;  %3797 = vmatpush.msra.mxu0 %v403_v37  ;;  %v871_v37 = vld [vmem:[%s4178_s22 + $0x1518] sm:$0xff] }
 0x345   : > { %3837 = vmatpush.msra.mxu2 %v819_v38  ;;  %3752 = vmatpush.msrb.mxu1 %v1247_v15  ;;  %v221_v38 = vld [vmem:[%s4178_s22 + $0xc8] sm:$0xff]  ;;  %v442_v15 = vld [vmem:[%s4178_s22 + $0x7b0] sm:$0xff] }
 0x346   : > { %3792 = vmatpush.msrb.mxu3 %v1663_v20  ;;  %3673 = vmatmul.f32.vlgmr.msra.gmra.mxu1 %v4334_v8  ;;  %v637_v20 = vld [vmem:[%s4178_s22 + $0xdc8] sm:$0xff] }
 0x347   : > { %3798 = vmatpush.msra.mxu0 %v390_v53  ;;  %3817 = vmatpush.msra.mxu1 %v611_v39  ;;  %v858_v53 = vld [vmem:[%s4178_s22 + $0x14b0] sm:$0xff]  ;;  %v208_v39 = vld [vmem:[%s4178_s22 + $0x60] sm:$0xff] }
 0x348   : > { %3838 = vmatpush.msra.mxu2 %v806_v40  ;;  %3857 = vmatpush.msra.mxu3 %v1027_v50  ;;  %v429_v40 = vld [vmem:[%s4178_s22 + $0x748] sm:$0xff]  ;;  %v624_v50 = vld [vmem:[%s4178_s22 + $0xd60] sm:$0xff] }
 0x349   : > { %3799 = vmatpush.msra.mxu0 %v377_v27  ;;  %3818 = vmatpush.msra.mxu1 %v598_v42  ;;  %v845_v27 = vld [vmem:[%s4178_s22 + $0x1448] sm:$0xff]  ;;  %v1235_v42 = vld [vmem:[%s4178_s22 + $0x2078] sm:$0xff] }
 0x34a   : > { %3839 = vmatpush.msra.mxu2 %v793_v43  ;;  %3858 = vmatpush.msra.mxu3 %v1014_v35  ;;  %v1651_v43 = vld [vmem:[%s4178_s22 + $0x2d78] sm:$0xff]  ;;  %v416_v35 = vld [vmem:[%s4178_s22 + $0x6e0] sm:$0xff] }
 0x34b   : > { %3773 = vmatmul.f32.vlgmr.msrb.gmra.mxu2 %v4349_v18  ;;  %3800 = vmatpush.msra.mxu0 %v364_v36  ;;  %v832_v36 = vld [vmem:[%s4178_s22 + $0x13e0] sm:$0xff] }
 0x34c   : > { %3819 = vmatpush.msra.mxu1 %v585_v45  ;;  %3840 = vmatpush.msra.mxu2 %v780_v47  ;;  %v1222_v45 = vld [vmem:[%s4178_s22 + $0x2010] sm:$0xff]  ;;  %v1443_v47 = vld [vmem:[%s4178_s22 + $0x26f8] sm:$0xff] }
 0x34d   : > { %3859 = vmatpush.msra.mxu3 %v1001_v51  ;;  %3733 = vmatmul.f32.vlgmr.msrb.gmra.mxu0 %v4355_v22  ;;  %v1638_v51 = vld [vmem:[%s4178_s22 + $0x2d10] sm:$0xff] }
 0x34e   : > { %3793 = vmatmul.f32.vlgmr.msrb.gmra.mxu3 %v4359_v24  ;;  %3801 = vmatpush.msra.mxu0 %v351_v48  ;;  %v1859_v48 = vld [vmem:[%s4178_s22 + $0x33f8] sm:$0xff] }
 0x34f   : > { %3820 = vmatpush.msra.mxu1 %v572_v61  ;;  %3841 = vmatpush.msra.mxu2 %v767_v60  ;;  %v1209_v61 = vld [vmem:[%s4178_s22 + $0x1fa8] sm:$0xff]  ;;  %v1430_v60 = vld [vmem:[%s4178_s22 + $0x2690] sm:$0xff] }
 0x350   : > { %3860 = vmatpush.msra.mxu3 %v988_v49  ;;  %3753 = vmatmul.f32.vlgmr.msrb.gmra.mxu1 %v4366_v28  ;;  %v1625_v49 = vld [vmem:[%s4178_s22 + $0x2ca8] sm:$0xff] }
 0x351   : > { %3802 = vmatpush.msra.mxu0 %v338_v54  ;;  %3821 = vmatpush.msra.mxu1 %v559_v19  ;;  %v1846_v54 = vld [vmem:[%s4178_s22 + $0x3390] sm:$0xff]  ;;  %v1196_v19 = vld [vmem:[%s4178_s22 + $0x1f40] sm:$0xff] }
 0x352   : > { %3842 = vmatpush.msra.mxu2 %v754_v30  ;;  %3861 = vmatpush.msra.mxu3 %v975_v55  ;;  %v1417_v30 = vld [vmem:[%s4178_s22 + $0x2628] sm:$0xff]  ;;  %v1612_v55 = vld [vmem:[%s4178_s22 + $0x2c40] sm:$0xff] }
 0x353   : > { %3803 = vmatpush.msra.mxu0 %v325_v56  ;;  %3822 = vmatpush.msra.mxu1 %v546_v58  ;;  %v1833_v56 = vld [vmem:[%s4178_s22 + $0x3328] sm:$0xff]  ;;  %v1183_v58 = vld [vmem:[%s4178_s22 + $0x1ed8] sm:$0xff] }
 0x354   : > { %3843 = vmatpush.msra.mxu2 %v741_v59  ;;  %3862 = vmatpush.msra.mxu3 %v962_v52  ;;  %v1404_v59 = vld [vmem:[%s4178_s22 + $0x25c0] sm:$0xff]  ;;  %v1599_v52 = vld [vmem:[%s4178_s22 + $0x2bd8] sm:$0xff] }
 0x355   : > { %3804 = vmatpush.msra.mxu0 %v312_v0  ;;  %3823 = vmatpush.msra.mxu1 %v533_v41  ;;  %v1820_v0 = vld [vmem:[%s4178_s22 + $0x32c0] sm:$0xff]  ;;  %v1170_v41 = vld [vmem:[%s4178_s22 + $0x1e70] sm:$0xff] }
 0x356   : > { %3844 = vmatpush.msra.mxu2 %v728_v3  ;;  %3863 = vmatpush.msra.mxu3 %v949_v44  ;;  %v1391_v3 = vld [vmem:[%s4178_s22 + $0x2558] sm:$0xff]  ;;  %v1586_v44 = vld [vmem:[%s4178_s22 + $0x2b70] sm:$0xff] }
 0x357   : > { %3805 = vmatpush.msra.mxu0 %v299_v6  ;;  %3824 = vmatpush.msra.mxu1 %v520_v1  ;;  %v1807_v6 = vld [vmem:[%s4178_s22 + $0x3258] sm:$0xff]  ;;  %v1157_v1 = vld [vmem:[%s4178_s22 + $0x1e08] sm:$0xff] }
 0x358   : > { %3845 = vmatpush.msra.mxu2 %v715_v5  ;;  %3864 = vmatpush.msra.mxu3 %v936_v9  ;;  %v1378_v5 = vld [vmem:[%s4178_s22 + $0x24f0] sm:$0xff]  ;;  %v1573_v9 = vld [vmem:[%s4178_s22 + $0x2b08] sm:$0xff] }
 0x359   : > { %3806 = vmatpush.msra.mxu0 %v286_v63  ;;  %3825 = vmatpush.msra.mxu1 %v507_v33  ;;  %v1794_v63 = vld [vmem:[%s4178_s22 + $0x31f0] sm:$0xff]  ;;  %v1144_v33 = vld [vmem:[%s4178_s22 + $0x1da0] sm:$0xff] }
 0x35a   : > { %3846 = vmatpush.msra.mxu2 %v702_v12  ;;  %3865 = vmatpush.msra.mxu3 %v923_v13  ;;  %v1365_v12 = vld [vmem:[%s4178_s22 + $0x2488] sm:$0xff]  ;;  %v1560_v13 = vld [vmem:[%s4178_s22 + $0x2aa0] sm:$0xff] }
 0x35b   : > { %3807 = vmatpush.msra.mxu0 %v273_v14  ;;  %3826 = vmatpush.msra.mxu1 %v494_v16  ;;  %v1781_v14 = vld [vmem:[%s4178_s22 + $0x3188] sm:$0xff]  ;;  %v1131_v16 = vld [vmem:[%s4178_s22 + $0x1d38] sm:$0xff] }
 0x35c   : > { %3847 = vmatpush.msra.mxu2 %v689_v7  ;;  %3866 = vmatpush.msra.mxu3 %v910_v10  ;;  %v1352_v7 = vld [vmem:[%s4178_s22 + $0x2420] sm:$0xff]  ;;  %v1547_v10 = vld [vmem:[%s4178_s22 + $0x2a38] sm:$0xff] }
 0x35d   : > { %3808 = vmatpush.msra.mxu0 %v260_v46  ;;  %3827 = vmatpush.msra.mxu1 %v481_v17  ;;  %v1768_v46 = vld [vmem:[%s4178_s22 + $0x3120] sm:$0xff]  ;;  %v1118_v17 = vld [vmem:[%s4178_s22 + $0x1cd0] sm:$0xff] }
 0x35e   : > { %3848 = vmatpush.msra.mxu2 %v676_v21  ;;  %3867 = vmatpush.msra.mxu3 %v897_v25  ;;  %v1339_v21 = vld [vmem:[%s4178_s22 + $0x23b8] sm:$0xff]  ;;  %v1534_v25 = vld [vmem:[%s4178_s22 + $0x29d0] sm:$0xff] }
 0x35f   : > { %3809 = vmatpush.msra.mxu0 %v247_v26  ;;  %3828 = vmatpush.msra.mxu1 %v468_v23  ;;  %v1755_v26 = vld [vmem:[%s4178_s22 + $0x30b8] sm:$0xff]  ;;  %v1105_v23 = vld [vmem:[%s4178_s22 + $0x1c68] sm:$0xff] }
 0x360   : > { %3849 = vmatpush.msra.mxu2 %v663_v11  ;;  %3868 = vmatpush.msra.mxu3 %v884_v29  ;;  %v1326_v11 = vld [vmem:[%s4178_s22 + $0x2350] sm:$0xff]  ;;  %v1521_v29 = vld [vmem:[%s4178_s22 + $0x2968] sm:$0xff] }
 0x361   : > { %3810 = vmatpush.msra.mxu0 %v234_v31  ;;  %3829 = vmatpush.msra.mxu1 %v455_v32  ;;  %v1742_v31 = vld [vmem:[%s4178_s22 + $0x3050] sm:$0xff]  ;;  %v1092_v32 = vld [vmem:[%s4178_s22 + $0x1c00] sm:$0xff] }
 0x362   : > { %3850 = vmatpush.msra.mxu2 %v650_v34  ;;  %3869 = vmatpush.msra.mxu3 %v871_v37  ;;  %v1313_v34 = vld [vmem:[%s4178_s22 + $0x22e8] sm:$0xff]  ;;  %v1508_v37 = vld [vmem:[%s4178_s22 + $0x2900] sm:$0xff] }
 0x363   : > { %3811 = vmatpush.msra.mxu0 %v221_v38  ;;  %3830 = vmatpush.msra.mxu1 %v442_v15  ;;  %v1729_v38 = vld [vmem:[%s4178_s22 + $0x2fe8] sm:$0xff]  ;;  %v1079_v15 = vld [vmem:[%s4178_s22 + $0x1b98] sm:$0xff] }
 0x364   : > { %3851 = vmatpush.msra.mxu2 %v637_v20  ;;  %3870 = vmatpush.msra.mxu3 %v858_v53  ;;  %v1300_v20 = vld [vmem:[%s4178_s22 + $0x2280] sm:$0xff]  ;;  %v1495_v53 = vld [vmem:[%s4178_s22 + $0x2898] sm:$0xff] }
 0x365   : > { %3812 = vmatpush.msra.mxu0 %v208_v39  ;;  %3831 = vmatpush.msra.mxu1 %v429_v40  ;;  %v1716_v39 = vld [vmem:[%s4178_s22 + $0x2f80] sm:$0xff]  ;;  %v1287_v40 = vld [vmem:[%s4178_s22 + $0x2218] sm:$0xff] }
 0x366   : > { %3852 = vmatpush.msra.mxu2 %v624_v50  ;;  %3871 = vmatpush.msra.mxu3 %v845_v27  ;;  %v1482_v50 = vld [vmem:[%s4178_s22 + $0x2830] sm:$0xff]  ;;  %v1703_v27 = vld [vmem:[%s4178_s22 + $0x2f18] sm:$0xff] }
 0x367   : > { %3877 = vmatpush.msrb.mxu0 %v1235_v42  ;;  %3832 = vmatpush.msra.mxu1 %v416_v35  ;;  %v1274_v42 = vld [vmem:[%s4178_s22 + $0x21b0] sm:$0xff]  ;;  %v1040_v35 = vld [vmem:[%s4178_s22 + $0x1a60] sm:$0xff] }
 0x368   : > { %3917 = vmatpush.msrb.mxu2 %v1651_v43  ;;  %3872 = vmatpush.msra.mxu3 %v832_v36  ;;  %v1690_v43 = vld [vmem:[%s4178_s22 + $0x2eb0] sm:$0xff]  ;;  %v1261_v36 = vld [vmem:[%s4178_s22 + $0x2148] sm:$0xff] }
 0x369   : > { %3878 = vmatpush.msrb.mxu0 %v1222_v45  ;;  %3897 = vmatpush.msrb.mxu1 %v1443_v47  ;;  %v1456_v45 = vld [vmem:[%s4178_s22 + $0x2760] sm:$0xff]  ;;  %v1677_v47 = vld [vmem:[%s4178_s22 + $0x2e48] sm:$0xff] }
 0x36a   : > { %3918 = vmatpush.msrb.mxu2 %v1638_v51  ;;  %3937 = vmatpush.msrb.mxu3 %v1859_v48  ;;  %v1664_v51 = vld [vmem:[%s4178_s22 + $0x2de0] sm:$0xff]  ;;  %v3334_v48 = vpop.f32.mrf.mxu0 }
 0x36b   : > { %3879 = vmatpush.msrb.mxu0 %v1209_v61  ;;  %3898 = vmatpush.msrb.mxu1 %v1430_v60  ;;  %v3354_v61 = vpop.f32.mrf.mxu1  ;;  %v3374_v60 = vpop.f32.mrf.mxu2 }
 0x36c   : > { %3919 = vmatpush.msrb.mxu2 %v1625_v49  ;;  %3938 = vmatpush.msrb.mxu3 %v1846_v54  ;;  %v3394_v49 = vpop.f32.mrf.mxu3 }
 0x36d   : > { %3880 = vmatpush.msrb.mxu0 %v1196_v19  ;;  %3899 = vmatpush.msrb.mxu1 %v1417_v30 }
 0x36e   : > { %3920 = vmatpush.msrb.mxu2 %v1612_v55  ;;  %3939 = vmatpush.msrb.mxu3 %v1833_v56 }
 0x36f   : > { %3881 = vmatpush.msrb.mxu0 %v1183_v58  ;;  %3900 = vmatpush.msrb.mxu1 %v1404_v59 }
 0x370   : > { %3921 = vmatpush.msrb.mxu2 %v1599_v52  ;;  %3940 = vmatpush.msrb.mxu3 %v1820_v0 }
 0x371   : > { %3882 = vmatpush.msrb.mxu0 %v1170_v41  ;;  %3901 = vmatpush.msrb.mxu1 %v1391_v3 }
 0x372   : > { %3922 = vmatpush.msrb.mxu2 %v1586_v44  ;;  %3941 = vmatpush.msrb.mxu3 %v1807_v6  ;;  %v3414_v54 = vpop.f32.mrf.mxu0  ;;  %v3355_v6 = vadd.f32 %v3354_v61, %v3334_v48 }
 0x373   : > { %3883 = vmatpush.msrb.mxu0 %v1157_v1  ;;  %3902 = vmatpush.msrb.mxu1 %v1378_v5  ;;  %v3434_v19 = vpop.f32.mrf.mxu1  ;;  %v3454_v30 = vpop.f32.mrf.mxu2 }
 0x374   : > { %3923 = vmatpush.msrb.mxu2 %v1573_v9  ;;  %3942 = vmatpush.msrb.mxu3 %v1794_v63  ;;  %v3474_v55 = vpop.f32.mrf.mxu3  ;;  %v3375_v63 = vadd.f32 %v3374_v60, %v3355_v6 }
 0x375   : > { %3884 = vmatpush.msrb.mxu0 %v1144_v33  ;;  %3903 = vmatpush.msrb.mxu1 %v1365_v12 }
 0x376   : > { %3924 = vmatpush.msrb.mxu2 %v1560_v13  ;;  %3943 = vmatpush.msrb.mxu3 %v1781_v14 }
 0x377   : > { %3885 = vmatpush.msrb.mxu0 %v1131_v16  ;;  %3904 = vmatpush.msrb.mxu1 %v1352_v7  ;;  %v3395_v16 = vadd.f32 %v3394_v49, %v3375_v63  ;;  %v194_v49 = vld [vmem:[#allocation2 + $0x8] sm:$0x1f] }
 0x378   : > { %3925 = vmatpush.msrb.mxu2 %v1547_v10  ;;  %3944 = vmatpush.msrb.mxu3 %v1768_v46 }
 0x379   : > { %3886 = vmatpush.msrb.mxu0 %v1118_v17  ;;  %3905 = vmatpush.msrb.mxu1 %v1339_v21  ;;  %v3415_v21 = vadd.f32 %v3414_v54, %v3395_v16 }
 0x37a   : > { %3926 = vmatpush.msrb.mxu2 %v1534_v25  ;;  %3945 = vmatpush.msrb.mxu3 %v1755_v26  ;;  %v3494_v56 = vpop.f32.mrf.mxu0 }
 0x37b   : > { %3887 = vmatpush.msrb.mxu0 %v1105_v23  ;;  %3906 = vmatpush.msrb.mxu1 %v1326_v11  ;;  %v3514_v58 = vpop.f32.mrf.mxu1  ;;  %v3534_v59 = vpop.f32.mrf.mxu2 }
 0x37c   : > { %3927 = vmatpush.msrb.mxu2 %v1521_v29  ;;  %3946 = vmatpush.msrb.mxu3 %v1742_v31  ;;  %v3515_v1 = vadd.f32 %v3514_v58, %v3494_v56  ;;  %v3435_v31 = vadd.f32 %v3434_v19, %v3415_v21 }
 0x37d   : > { %3853 = vmatmul.f32.vlgmr.msra.gmra.mxu2 %v4317_v62  ;;  %3888 = vmatpush.msrb.mxu0 %v1092_v32  ;;  %v1066_v62 = vld [vmem:[%s4178_s22 + $0x1b30] sm:$0xff] }
 0x37e   : > { %3907 = vmatpush.msrb.mxu1 %v1313_v34  ;;  %3928 = vmatpush.msrb.mxu2 %v1508_v37  ;;  %v3535_v33 = vadd.f32 %v3534_v59, %v3515_v1 }
 0x37f   : > { %3947 = vmatpush.msrb.mxu3 %v1729_v38  ;;  %3813 = vmatmul.f32.vlgmr.msra.gmra.mxu0 %v4323_v2  ;;  %v1053_v2 = vld [vmem:[%s4178_s22 + $0x1ac8] sm:$0xff] }
 0x380   : > { %3873 = vmatmul.f32.vlgmr.msra.gmra.mxu3 %v4327_v4  ;;  %3889 = vmatpush.msrb.mxu0 %v1079_v15  ;;  %v1469_v4 = vld [vmem:[%s4178_s22 + $0x27c8] sm:$0xff] }
 0x381   : > { %3908 = vmatpush.msrb.mxu1 %v1300_v20  ;;  %3929 = vmatpush.msrb.mxu2 %v1495_v53  ;;  %v3455_v20 = vadd.f32 %v3454_v30, %v3435_v31 }
 0x382   : > { %3948 = vmatpush.msrb.mxu3 %v1716_v39  ;;  %3833 = vmatmul.f32.vlgmr.msra.gmra.mxu1 %v4334_v8  ;;  %v1248_v8 = vld [vmem:[%s4178_s22 + $0x20e0] sm:$0xff]  ;;  %v3574_v52 = vpop.f32.mrf.mxu0 }
 0x383   : > { %3890 = vmatpush.msrb.mxu0 %v1066_v62  ;;  %3909 = vmatpush.msrb.mxu1 %v1287_v40 }
 0x384   : > { %3930 = vmatpush.msrb.mxu2 %v1482_v50  ;;  %3949 = vmatpush.msrb.mxu3 %v1703_v27  ;;  %v3614_v0 = vpop.f32.mrf.mxu2  ;;  %v3475_v27 = vadd.f32 %v3474_v55, %v3455_v20 }
 0x385   : > { %3891 = vmatpush.msrb.mxu0 %v1053_v2  ;;  %3910 = vmatpush.msrb.mxu1 %v1274_v42 }
 0x386   : > { %3931 = vmatpush.msrb.mxu2 %v1469_v4  ;;  %3950 = vmatpush.msrb.mxu3 %v1690_v43 }
 0x387   : > { %3892 = vmatpush.msrb.mxu0 %v1040_v35  ;;  %3911 = vmatpush.msrb.mxu1 %v1261_v36  ;;  %v3977_v36 = vrot.slane %v3475_v27, 7 }
 0x388   : > { %3932 = vmatpush.msrb.mxu2 %v1456_v45  ;;  %3951 = vmatpush.msrb.mxu3 %v1677_v47 }
 0x389   : > { %3893 = vmatmul.f32.vlgmr.msrb.gmra.mxu0 %v4355_v22  ;;  %3933 = vmatmul.f32.vlgmr.msrb.gmra.mxu2 %v4349_v18  ;;  %v3554_v22 = vpop.f32.mrf.mxu3  ;;  %v3594_v18 = vpop.f32.mrf.mxu1  ;;  %v3995_v60 = vsel %vm3981_vm1, %v5823_v57, %v3977_v36 }
 0x38a   : > { %3912 = vmatpush.msrb.mxu1 %v1248_v8  ;;  %3952 = vmatpush.msrb.mxu3 %v1664_v51  ;;  %v3555_v7 = vadd.f32 %v3554_v22, %v3535_v33  ;;  %v4006_v51 = vlaneseq }
 0x38b   : > { %3913 = vmatmul.f32.vlgmr.msrb.gmra.mxu1 %v4366_v28  ;;  %3953 = vmatmul.f32.vlgmr.msrb.gmra.mxu3 %v4359_v24 }
 0x38c   : > { %v3575_v25 = vadd.f32 %v3574_v52, %v3555_v7  ;;  %vm4008_vm10 = vcmp.lt.s32.totalorder %v4006_v51, 576 }
 0x38e   : > { %v3595_v34 = vadd.f32 %v3594_v18, %v3575_v25 }
 0x390   : > { %v3615_v39 = vadd.f32 %v3614_v0, %v3595_v34 }
 0x391   : > { %v3634_v41 = vpop.f32.mrf.mxu3 }
 0x392   : > { %v3635_v2 = vadd.f32 %v3634_v41, %v3615_v39 }
 0x394   : > { %v3978_v47 = vrot.slane %v3635_v2, 6 }
 0x396   : > { %v3996_v54 = vsel %vm3985_vm3, %v3995_v60, %v3978_v47 }
 0x3c0   : > { %v3654_v3 = vpop.f32.mrf.mxu0 }
 0x3c3   : > { %v3674_v28 = vpop.f32.mrf.mxu1 }
 0x3c4   : > { %v3694_v44 = vpop.f32.mrf.mxu2  ;;  %v3675_v9 = vadd.f32 %v3674_v28, %v3654_v3 }
 0x3c6   : > { %v3695_v14 = vadd.f32 %v3694_v44, %v3675_v9 }
 0x3c7   : > { %v3714_v24 = vpop.f32.mrf.mxu3 }
 0x3c8   : > { %v3715_v17 = vadd.f32 %v3714_v24, %v3695_v14 }
 0x3ca   : > { %v3734_v5 = vpop.f32.mrf.mxu0 }
 0x3cb   : > { %v3735_v29 = vadd.f32 %v3734_v5, %v3715_v17 }
 0x3cd   : > { %v3754_v12 = vpop.f32.mrf.mxu1 }
 0x3ce   : > { %v3774_v13 = vpop.f32.mrf.mxu2  ;;  %v3755_v15 = vadd.f32 %v3754_v12, %v3735_v29 }
 0x3d0   : > { %v3775_v50 = vadd.f32 %v3774_v13, %v3755_v15 }
 0x3d1   : > { %v3794_v10 = vpop.f32.mrf.mxu3 }
 0x3d2   : > { %v3795_v43 = vadd.f32 %v3794_v10, %v3775_v50 }
 0x3d4   : > { %v3979_v48 = vrot.slane %v3795_v43, 5 }
 0x3fc   : > { %v3814_v46 = vpop.f32.mrf.mxu0 }
 0x3ff   : > { %v3834_v26 = vpop.f32.mrf.mxu1 }
 0x400   : > { %v3835_v23 = vadd.f32 %v3834_v26, %v3814_v46  ;;  %v3854_v11 = vpop.f32.mrf.mxu2 }
 0x402   : > { %v3855_v32 = vadd.f32 %v3854_v11, %v3835_v23 }
 0x403   : > { %v3874_v37 = vpop.f32.mrf.mxu3 }
 0x404   : > { %v3875_v38 = vadd.f32 %v3874_v37, %v3855_v32 }
 0x406   : > { %v3894_v53 = vpop.f32.mrf.mxu0 }
 0x407   : > { %v3895_v62 = vadd.f32 %v3894_v53, %v3875_v38 }
 0x408   : > { %v3914_v40 = vpop.f32.mrf.mxu1 }
 0x409   : > { %v3915_v42 = vadd.f32 %v3914_v40, %v3895_v62 }
 0x40c   : > { %v3934_v4 = vpop.f32.mrf.mxu2 }
 0x40d   : > { %v3935_v35 = vadd.f32 %v3934_v4, %v3915_v42 }
 0x40e   : > { %v3954_v45 = vpop.f32.mrf.mxu3 }
 0x40f   : > { %v3955_v8 = vadd.f32 %v3954_v45, %v3935_v35 }
 0x411   : > { %v3980_v61 = vrot.slane %v3955_v8, 4 }
 0x413   : > { %v3998_v19 = vsel %vm3997_vm8, %v3979_v48, %v3980_v61 }
 0x414   : > { %v4000_v30 = vsel %vm3999_vm9, %v3996_v54, %v3998_v19 }
 0x415   : > { %v4004_v55 = vadd.f32 %v4000_v30, %v194_v49 }
 0x417   : > { %4010 = vst.msk [vmem:[#allocation2 + $0x8] sm:$0x1f] %vm4008_vm10, %v4004_v55 }
 0x418   : > { %4082 = dma.vmem_to_hbm [thread:$0]  (%p4085_p6), %s4018_s30, 208, %s4020_s6, [#allocation3]  }
 0x419   : > { %4129 = dma.done.wait (%p4085_p6), [#allocation3], 208  }
 0x41a   : > { %4131 = vsyncadd (%p4085_p6), [#allocation3], 4294967088 }
 0x41b PF: > { %s14_s12 = sadd.s32 1, %s4134_s12  }
 0x41c   : > { %p11_p7 = scmp.ge.s32.totalorder %s14_s12, 8  }
 0x41e   :  { %13 = sbr.rel (!%p11_p7) target bundleno = 1 (0x1), region = 66 }
 0x423   :  { %4033 = vsyncpa [#allocation3], 1 }
 0x424   :  { %4035 = vsyncpa [#allocation3 + $0x1], 1 }

</bundles_post_ra>
